<compile_context>
chip_gen: v5e
topology: v5e:2x2
jax: 0.10.0
libtpu: 0.0.40
codegen_flags: <defaults>
</compile_context>

<pallas_src>
import jax
import jax.numpy as jnp
import numpy as np
from jax.experimental import pallas as pl
from jax.experimental.pallas import tpu as pltpu


# --------------------------------------------------------------------------
# helpers
# --------------------------------------------------------------------------
def _round_up(x, m):
    return (x + m - 1) // m * m


def _cdiv(a, b):
    return -(-a // b)


_VMEM_BUDGET = 24 * 1024 * 1024      # per-grid-step working-set target (bytes)
_VMEM_LIMIT_CAP = 48 * 1024 * 1024   # stays under v7x's 64 MiB physical VMEM


def _vmem_bytes(t_chunk, BB, Hp, in_pad):
    """Estimated VMEM working set of one grid step (bytes)."""
    x_b = 2 * t_chunk * BB * in_pad * 2           # bf16 input block, double-buffered
    out_b = 2 * t_chunk * BB * Hp * 2             # bf16 output block, double-buffered
    gi_b = 2 * t_chunk * BB * 3 * Hp * 4          # f32 gi scratch + matmul temp
    w_b = (in_pad + Hp) * 3 * Hp * 2              # resident bf16 weights
    misc = BB * Hp * 4 + 4 * Hp * 4 + (1 << 20)   # h scratch, biases, slack
    return x_b + out_b + gi_b + w_b + misc


def _pick_t_chunk_cap(BB, Hp, in_pad, max_chunk=32):
    t = 1
    while t < max_chunk and _vmem_bytes(t + 1, BB, Hp, in_pad) <= _VMEM_BUDGET:
        t += 1
    return t


def _pick_bb(Bp):
    """Rows per batch block.  Bp is already a multiple of 16."""
    if Bp <= 16:
        return Bp
    # >=2 batch blocks when the batch allows it: engages the v7x megacore via
    # the "parallel" grid axis; on v5e/v6e it is just a cheap serial pass.
    return min(128, _round_up(_cdiv(Bp, 2), 16))


# --------------------------------------------------------------------------
# One-time weight packing (PyTorch (3H, in) layout -> lane-aligned bf16).
# Gate g lives in columns [g*Hp, g*Hp + H); padded rows/cols/biases are zero,
# which keeps padded hidden lanes exactly zero through the recurrence.
# --------------------------------------------------------------------------
def _pack_gates_T(w, H, Hp, rows):
    in_size = w.shape[1]
    parts = []
    for g in range(3):
        wg = w[g * H:(g + 1) * H, :].T                      # (in, H)
        wg = jnp.pad(wg, ((0, rows - in_size), (0, Hp - H)))
        parts.append(wg)
    return jnp.concatenate(parts, axis=1)                   # (rows, 3*Hp)


def _pack_bias(b, H, Hp):
    parts = [jnp.pad(b[g * H:(g + 1) * H], (0, Hp - H)) for g in range(3)]
    return jnp.concatenate(parts)


def pack_gru_layer(w_ih, w_hh, b_ih, b_hh):
    H = w_hh.shape[1]
    in_size = w_ih.shape[1]
    Hp = _round_up(H, 128)
    in_pad = _round_up(in_size, 128)
    wih = _pack_gates_T(w_ih, H, Hp, in_pad).astype(jnp.bfloat16)   # (in_pad, 3Hp)
    whh = _pack_gates_T(w_hh, H, Hp, Hp).astype(jnp.bfloat16)       # (Hp, 3Hp)
    # b_ir+b_hr and b_iz+b_hz folded into the input-projection bias; only b_hn
    # stays separate (it sits inside the r * (.) term of the n gate).
    b_comb = jnp.concatenate([b_ih[:H] + b_hh[:H],
                              b_ih[H:2 * H] + b_hh[H:2 * H],
                              b_ih[2 * H:]])
    bias_i = _pack_bias(b_comb, H, Hp).reshape(1, 3 * Hp).astype(jnp.float32)
    b_hn = jnp.pad(b_hh[2 * H:], (0, Hp - H)).reshape(1, Hp).astype(jnp.float32)
    return dict(wih=wih, whh=whh, bias_i=bias_i, b_hn=b_hn,
                H=H, Hp=Hp, in_size=in_size, in_pad=in_pad)


def pack_encoder_params(params):
    return dict(
        embedding=params["embedding"],
        layers=[pack_gru_layer(l["w_ih"], l["w_hh"], l["b_ih"], l["b_hh"])
                for l in params["layers"]])


# --------------------------------------------------------------------------
# Fused GRU kernel: per grid step (batch block b, time chunk t)
#   1) gi = x_chunk @ W_ih + bias      (one large MXU matmul, bf16 -> f32)
#   2) sequential recurrence over the chunk, hidden state in VMEM scratch:
#        r = sigmoid(gi_r + h W_hr)
#        z = sigmoid(gi_z + h W_hz)
#        n = tanh   (gi_n + r * (h W_hn + b_hn))
#        h = n + z * (h - n)
# --------------------------------------------------------------------------
def gru_fused_kernel(x_ref, wih_ref, whh_ref, bias_ref, bhn_ref, out_ref,
                     h_scr, gi_scr):
    @pl.when(pl.program_id(1) == 0)          # first time chunk of this batch block
    def _():
        h_scr[...] = jnp.zeros_like(h_scr)

    t_chunk, BB, in_pad = x_ref.shape
    Hp = h_scr.shape[-1]

    # Time-independent input projection for the whole chunk (lane-aligned gates).
    x = x_ref[...].reshape(t_chunk * BB, in_pad)                       # bf16
    gi = jnp.dot(x, wih_ref[...], preferred_element_type=jnp.float32)  # f32
    gi_scr[...] = (gi + bias_ref[...]).reshape(t_chunk, BB, 3 * Hp)

    whh = whh_ref[...]                                                 # bf16 resident
    bhn = jnp.broadcast_to(bhn_ref[...], (BB, Hp))   # hoisted (no CSE inside loop)

    def step(t, h):
        gi_t = gi_scr[t]                                               # (BB, 3Hp) f32
        gh = jnp.dot(h.astype(jnp.bfloat16), whh,
                     preferred_element_type=jnp.float32)               # (BB, 3Hp) f32
        r = jax.nn.sigmoid(gi_t[:, 0:Hp] + gh[:, 0:Hp])
        z = jax.nn.sigmoid(gi_t[:, Hp:2 * Hp] + gh[:, Hp:2 * Hp])
        n = jnp.tanh(gi_t[:, 2 * Hp:3 * Hp] + r * (gh[:, 2 * Hp:3 * Hp] + bhn))
        h_new = n + z * (h - n)
        out_ref[t] = h_new.astype(out_ref.dtype)
        return h_new

    unroll = t_chunk if t_chunk <= 8 else 4    # bound vreg pressure at big chunks
    h_last = jax.lax.fori_loop(0, t_chunk, step, h_scr[...], unroll=unroll)
    h_scr[...] = h_last


_SB_STATE = {"checked": False, "ok": True}     # does pl.Buffered(1) lower here?


def gru_layer_packed(x, lp):
    """x: (seq, B, in) — B / in may already be padded.  Returns the padded
    (seq, Bp, Hp) bf16 layer output (padding kept for the next layer)."""
    seq, B_in, in_size = x.shape
    Hp, in_pad = lp["Hp"], lp["in_pad"]
    assert in_size <= in_pad

    Bp = _round_up(B_in, 16)
    BB = _pick_bb(Bp)
    Bp = _round_up(Bp, BB)
    n_bblocks = Bp // BB

    # VMEM-budget-driven time chunk; ceil-split to minimize seq padding.
    t_cap = max(1, min(_pick_t_chunk_cap(BB, Hp, in_pad), seq))
    n_chunks = _cdiv(seq, t_cap)
    t_chunk = _cdiv(seq, n_chunks)
    seq_pad = t_chunk * n_chunks

    xp = jnp.pad(x.astype(jnp.bfloat16),
                 ((0, seq_pad - seq), (0, Bp - B_in), (0, in_pad - in_size)))

    vmem_limit = int(min(_VMEM_LIMIT_CAP,
                         max(32 * 1024 * 1024,
                             2 * _vmem_bytes(t_chunk, BB, Hp, in_pad))))

    def run(single_buffer):
        def resident(shape):
            idx = lambda b, t: (0,) * len(shape)
            if single_buffer:
                return pl.BlockSpec(shape, idx, pipeline_mode=pl.Buffered(1))
            return pl.BlockSpec(shape, idx)

        return pl.pallas_call(
            gru_fused_kernel,
            out_shape=jax.ShapeDtypeStruct((seq_pad, Bp, Hp), jnp.bfloat16),
            grid_spec=pltpu.PrefetchScalarGridSpec(
                num_scalar_prefetch=0,
                grid=(n_bblocks, n_chunks),
                in_specs=[
                    pl.BlockSpec((t_chunk, BB, in_pad), lambda b, t: (t, b, 0)),
                    resident((in_pad, 3 * Hp)),     # W_ih, resident
                    resident((Hp, 3 * Hp)),         # W_hh, resident
                    resident((1, 3 * Hp)),          # folded input bias
                    resident((1, Hp)),              # b_hn
                ],
                out_specs=pl.BlockSpec((t_chunk, BB, Hp), lambda b, t: (t, b, 0)),
                scratch_shapes=[
                    pltpu.VMEM((BB, Hp), jnp.float32),               # hidden state
                    pltpu.VMEM((t_chunk, BB, 3 * Hp), jnp.float32),  # gi for the chunk
                ],
            ),
            compiler_params=pltpu.CompilerParams(
                dimension_semantics=("parallel", "arbitrary"),
                vmem_limit_bytes=vmem_limit,
            ),
        )(xp, lp["wih"], lp["whh"], lp["bias_i"], lp["b_hn"])

    if not _SB_STATE["checked"]:
        try:
            out = jax.block_until_ready(run(True))
            _SB_STATE.update(checked=True, ok=True)
        except Exception:
            _SB_STATE.update(checked=True, ok=False)
            out = run(False)
    else:
        out = run(_SB_STATE["ok"])

    return out[:seq]    # drop seq padding; keep Bp / Hp padding for next layer


# --------------------------------------------------------------------------
# Parameter construction (deterministic, matches nn.Embedding / nn.GRU shapes)
# --------------------------------------------------------------------------
def init_params(key, vocab_size, embed_size, num_hiddens, num_layers):
    keys = jax.random.split(key, 1 + 4 * num_layers)
    params = {"embedding": jax.random.normal(keys[0], (vocab_size, embed_size),
                                             jnp.float32)}
    bound = 1.0 / np.sqrt(num_hiddens)
    layers = []
    for l in range(num_layers):
        in_size = embed_size if l == 0 else num_hiddens
        k = keys[1 + 4 * l: 1 + 4 * (l + 1)]
        layers.append(dict(
            w_ih=jax.random.uniform(k[0], (3 * num_hiddens, in_size),
                                    jnp.float32, -bound, bound),
            w_hh=jax.random.uniform(k[1], (3 * num_hiddens, num_hiddens),
                                    jnp.float32, -bound, bound),
            b_ih=jax.random.uniform(k[2], (3 * num_hiddens,),
                                    jnp.float32, -bound, bound),
            b_hh=jax.random.uniform(k[3], (3 * num_hiddens,),
                                    jnp.float32, -bound, bound),
        ))
    params["layers"] = layers
    return params


def encoder_forward(packed, X):
    """X: (batch, seq) int32 token ids.  Returns (output, state) like PyTorch:
       output (seq, batch, hidden) f32, state (num_layers, batch, hidden) f32."""
    B, seq = X.shape
    H = packed["layers"][0]["H"]
    emb = jnp.take(packed["embedding"], X, axis=0)            # (B, seq, E) f32
    h = jnp.transpose(emb, (1, 0, 2)).astype(jnp.bfloat16)    # (seq, B, E) bf16
    finals = []
    for lp in packed["layers"]:
        h = gru_layer_packed(h, lp)                           # (seq, Bp, Hp) bf16
        finals.append(h[-1, :B, :H])
    output = h[:, :B, :H].astype(jnp.float32)
    state = jnp.stack(finals, axis=0).astype(jnp.float32)
    return output, state


# --------------------------------------------------------------------------
# Pure-JAX reference mirroring the kernel's precision policy (bf16 matmul
# inputs, f32 accumulation, f32 gate math, bf16 inter-layer activations).
# --------------------------------------------------------------------------
def gru_layer_ref(x, w_ih, w_hh, b_ih, b_hh):
    H = w_hh.shape[1]
    wih_b = w_ih.astype(jnp.bfloat16)
    whh_b = w_hh.astype(jnp.bfloat16)
    h = jnp.zeros((x.shape[1], H), jnp.float32)
    outs = []
    for t in range(x.shape[0]):
        gi = jnp.dot(x[t].astype(jnp.bfloat16), wih_b.T,
                     preferred_element_type=jnp.float32) + b_ih
        gh = jnp.dot(h.astype(jnp.bfloat16), whh_b.T,
                     preferred_element_type=jnp.float32) + b_hh
        r = jax.nn.sigmoid(gi[:, :H] + gh[:, :H])
        z = jax.nn.sigmoid(gi[:, H:2 * H] + gh[:, H:2 * H])
        n = jnp.tanh(gi[:, 2 * H:] + r * gh[:, 2 * H:])
        h = n + z * (h - n)
        outs.append(h)
    return jnp.stack(outs, axis=0)


def encoder_forward_ref(params, X):
    emb = jnp.take(params["embedding"], X, axis=0)
    h = jnp.transpose(emb, (1, 0, 2))
    finals = []
    for layer in params["layers"]:
        h = gru_layer_ref(h.astype(jnp.float32), layer["w_ih"], layer["w_hh"],
                          layer["b_ih"], layer["b_hh"])
        h = h.astype(jnp.bfloat16)        # mirror the kernel's bf16 handoff
        finals.append(h[-1])
    return h.astype(jnp.float32), jnp.stack(finals, 0).astype(jnp.float32)


def _check(vocab, embed, hidden, layers, batch, seq, seed):
    key = jax.random.PRNGKey(seed)
    pkey, xkey = jax.random.split(key)
    params = init_params(pkey, vocab, embed, hidden, layers)
    X = jax.random.randint(xkey, (batch, seq), 0, vocab, jnp.int32)

    packed = pack_encoder_params(params)          # one-time packing
    output, state = encoder_forward(packed, X)
    output = jax.block_until_ready(output)
    state = jax.block_until_ready(state)

    ref_out, ref_state = encoder_forward_ref(params, X)
    # Tolerance accounts for the bf16 inter-layer activations / output stores.
    np.testing.assert_allclose(np.asarray(output), np.asarray(ref_out),
                               rtol=1e-2, atol=1e-2)
    np.testing.assert_allclose(np.asarray(state), np.asarray(ref_state),
                               rtol=1e-2, atol=1e-2)
    assert output.shape == (seq, batch, hidden)
    assert state.shape == (layers, batch, hidden)


if __name__ == "__main__":
    # canonical small demo shapes (H < 128 -> per-gate lane padding, see TODO)
    _check(vocab=32, embed=16, hidden=32, layers=2, batch=4, seq=8, seed=0)
    # padding paths: H not a multiple of 128, odd seq, multiple batch blocks
    _check(vocab=40, embed=24, hidden=160, layers=2, batch=20, seq=37, seed=1)
    print("KERNEL_OK")
</pallas_src>

<mosaic_0001>
module attributes {stable_mosaic.version = 11 : i64} {
  func.func @gru_fused_kernel(%arg0: i32, %arg1: i32, %arg2: memref<8x16x128xbf16, #tpu.memory_space<vmem>>, %arg3: memref<128x384xbf16, #tpu.memory_space<vmem>>, %arg4: memref<128x384xbf16, #tpu.memory_space<vmem>>, %arg5: memref<1x384xf32, #tpu.memory_space<vmem>>, %arg6: memref<1x128xf32, #tpu.memory_space<vmem>>, %arg7: memref<8x16x128xbf16, #tpu.memory_space<vmem>>, %arg8: memref<16x128xf32, #tpu.memory_space<vmem>>, %arg9: memref<8x16x384xf32, #tpu.memory_space<vmem>>) attributes {dimension_semantics = [#tpu.dimension_semantics<parallel>, #tpu.dimension_semantics<arbitrary>], iteration_bounds = array<i64: 1, 1>, scalar_prefetch = 0 : i64, scratch_operands = 2 : i64, tpu.core_type = #tpu.core_type<tc>, window_params = [{transform_indices = @transform_0, window_bounds = array<i64: 8, 16, 128>}, {pipeline_mode = #tpu.pipeline_mode<synchronous>, transform_indices = @transform_1, window_bounds = array<i64: 128, 384>}, {pipeline_mode = #tpu.pipeline_mode<synchronous>, transform_indices = @transform_2, window_bounds = array<i64: 128, 384>}, {pipeline_mode = #tpu.pipeline_mode<synchronous>, transform_indices = @transform_3, window_bounds = array<i64: 1, 384>}, {pipeline_mode = #tpu.pipeline_mode<synchronous>, transform_indices = @transform_4, window_bounds = array<i64: 1, 128>}, {transform_indices = @transform_5, window_bounds = array<i64: 8, 16, 128>}]} {
    %c0_i32 = arith.constant 0 : i32
    %0 = arith.cmpi eq, %arg1, %c0_i32 : i32
    %1 = arith.extui %0 : i1 to i32
    %c0_i32_0 = arith.constant 0 : i32
    %2 = arith.cmpi ne, %1, %c0_i32_0 : i32
    scf.if %2 {
      %cst_75 = arith.constant 0.000000e+00 : f32
      %298 = vector.broadcast %cst_75 : f32 to vector<16x128xf32>
      %c0_76 = arith.constant 0 : index
      %c0_77 = arith.constant 0 : index
      %299 = vector.load %arg8[%c0_76, %c0_77] : memref<16x128xf32, #tpu.memory_space<vmem>>, vector<16x128xf32>
      tpu.vector_store %arg8[%c0_76, %c0_77], %298 {strides = array<i32>} : memref<16x128xf32, #tpu.memory_space<vmem>>, vector<16x128xf32>,
    } else {
    }
    %c0 = arith.constant 0 : index
    %c0_1 = arith.constant 0 : index
    %c0_2 = arith.constant 0 : index
    %3 = vector.load %arg2[%c0, %c0_1, %c0_2] : memref<8x16x128xbf16, #tpu.memory_space<vmem>>, vector<8x16x128xbf16>
    %4 = vector.shape_cast %3 : vector<8x16x128xbf16> to vector<128x128xbf16>
    %c0_3 = arith.constant 0 : index
    %c0_4 = arith.constant 0 : index
    %5 = vector.load %arg3[%c0_3, %c0_4] : memref<128x384xbf16, #tpu.memory_space<vmem>>, vector<128x384xbf16>
    %cst = arith.constant dense<0.000000e+00> : vector<128x384xf32>
    %6 = tpu.matmul %4, %5, %cst {dimension_numbers = #tpu.dot_dimension_numbers<[1], [0], [0], [1], [0, 0, 1, 1], [], []>} : vector<128x128xbf16>, vector<128x384xbf16>, vector<128x384xf32> -> vector<128x384xf32>
    %c0_5 = arith.constant 0 : index
    %c0_6 = arith.constant 0 : index
    %7 = vector.load %arg5[%c0_5, %c0_6] : memref<1x384xf32, #tpu.memory_space<vmem>>, vector<1x384xf32>
    %8 = vector.broadcast %7 : vector<1x384xf32> to vector<128x384xf32>
    %9 = arith.addf %6, %8 : vector<128x384xf32>
    %10 = vector.shape_cast %9 : vector<128x384xf32> to vector<8x16x384xf32>
    %c0_7 = arith.constant 0 : index
    %c0_8 = arith.constant 0 : index
    %c0_9 = arith.constant 0 : index
    %11 = vector.load %arg9[%c0_7, %c0_8, %c0_9] : memref<8x16x384xf32, #tpu.memory_space<vmem>>, vector<8x16x384xf32>
    tpu.vector_store %arg9[%c0_7, %c0_8, %c0_9], %10 {strides = array<i32>} : memref<8x16x384xf32, #tpu.memory_space<vmem>>, vector<8x16x384xf32>,
    %c0_10 = arith.constant 0 : index
    %c0_11 = arith.constant 0 : index
    %12 = vector.load %arg4[%c0_10, %c0_11] : memref<128x384xbf16, #tpu.memory_space<vmem>>, vector<128x384xbf16>
    %c0_12 = arith.constant 0 : index
    %c0_13 = arith.constant 0 : index
    %13 = vector.load %arg6[%c0_12, %c0_13] : memref<1x128xf32, #tpu.memory_space<vmem>>, vector<1x128xf32>
    %14 = vector.shape_cast %13 : vector<1x128xf32> to vector<1x128xf32>
    %15 = vector.broadcast %14 : vector<1x128xf32> to vector<16x128xf32>
    %c0_14 = arith.constant 0 : index
    %c0_15 = arith.constant 0 : index
    %16 = vector.load %arg8[%c0_14, %c0_15] : memref<16x128xf32, #tpu.memory_space<vmem>>, vector<16x128xf32>
    %c0_i32_16 = arith.constant 0 : i32
    %17 = arith.index_cast %c0_i32_16 : i32 to index
    %c0_17 = arith.constant 0 : index
    %c0_18 = arith.constant 0 : index
    %18 = vector.load %arg9[%17, %c0_17, %c0_18] : memref<8x16x384xf32, #tpu.memory_space<vmem>>, vector<1x16x384xf32>
    %19 = vector.shape_cast %18 : vector<1x16x384xf32> to vector<16x384xf32>
    %20 = arith.truncf %16 : vector<16x128xf32> to vector<16x128xbf16>
    %cst_19 = arith.constant dense<0.000000e+00> : vector<16x384xf32>
    %21 = tpu.matmul %20, %12, %cst_19 {dimension_numbers = #tpu.dot_dimension_numbers<[1], [0], [0], [1], [0, 0, 1, 1], [], []>} : vector<16x128xbf16>, vector<128x384xbf16>, vector<16x384xf32> -> vector<16x384xf32>
    %22 = vector.extract_strided_slice %19 {offsets = [0, 0], sizes = [16, 128], strides = [1, 1]} : vector<16x384xf32> to vector<16x128xf32>
    %23 = vector.extract_strided_slice %21 {offsets = [0, 0], sizes = [16, 128], strides = [1, 1]} : vector<16x384xf32> to vector<16x128xf32>
    %24 = arith.addf %22, %23 : vector<16x128xf32>
    %25 = arith.negf %24 : vector<16x128xf32>
    %26 = math.exp %25 : vector<16x128xf32>
    %cst_20 = arith.constant 1.000000e+00 : f32
    %27 = vector.broadcast %cst_20 : f32 to vector<16x128xf32>
    %28 = arith.addf %27, %26 : vector<16x128xf32>
    %29 = arith.divf %27, %28 : vector<16x128xf32>
    %30 = vector.extract_strided_slice %19 {offsets = [0, 128], sizes = [16, 128], strides = [1, 1]} : vector<16x384xf32> to vector<16x128xf32>
    %31 = vector.extract_strided_slice %21 {offsets = [0, 128], sizes = [16, 128], strides = [1, 1]} : vector<16x384xf32> to vector<16x128xf32>
    %32 = arith.addf %30, %31 : vector<16x128xf32>
    %33 = arith.negf %32 : vector<16x128xf32>
    %34 = math.exp %33 : vector<16x128xf32>
    %cst_21 = arith.constant 1.000000e+00 : f32
    %35 = vector.broadcast %cst_21 : f32 to vector<16x128xf32>
    %36 = arith.addf %35, %34 : vector<16x128xf32>
    %37 = arith.divf %35, %36 : vector<16x128xf32>
    %38 = vector.extract_strided_slice %19 {offsets = [0, 256], sizes = [16, 128], strides = [1, 1]} : vector<16x384xf32> to vector<16x128xf32>
    %39 = vector.extract_strided_slice %21 {offsets = [0, 256], sizes = [16, 128], strides = [1, 1]} : vector<16x384xf32> to vector<16x128xf32>
    %40 = arith.addf %39, %15 : vector<16x128xf32>
    %41 = arith.mulf %29, %40 : vector<16x128xf32>
    %42 = arith.addf %38, %41 : vector<16x128xf32>
    %43 = math.tanh %42 : vector<16x128xf32>
    %44 = arith.subf %16, %43 : vector<16x128xf32>
    %45 = arith.mulf %37, %44 : vector<16x128xf32>
    %46 = arith.addf %43, %45 : vector<16x128xf32>
    %47 = arith.truncf %46 : vector<16x128xf32> to vector<16x128xbf16>
    %48 = arith.index_cast %c0_i32_16 : i32 to index
    %c0_22 = arith.constant 0 : index
    %c0_23 = arith.constant 0 : index
    %49 = vector.load %arg7[%48, %c0_22, %c0_23] : memref<8x16x128xbf16, #tpu.memory_space<vmem>>, vector<1x16x128xbf16>
    %50 = vector.shape_cast %49 : vector<1x16x128xbf16> to vector<16x128xbf16>
    %51 = vector.shape_cast %47 : vector<16x128xbf16> to vector<1x16x128xbf16>
    tpu.vector_store %arg7[%48, %c0_22, %c0_23], %51 {strides = array<i32>} : memref<8x16x128xbf16, #tpu.memory_space<vmem>>, vector<1x16x128xbf16>,
    %c1_i32 = arith.constant 1 : i32
    %52 = arith.index_cast %c1_i32 : i32 to index
    %c0_24 = arith.constant 0 : index
    %c0_25 = arith.constant 0 : index
    %53 = vector.load %arg9[%52, %c0_24, %c0_25] : memref<8x16x384xf32, #tpu.memory_space<vmem>>, vector<1x16x384xf32>
    %54 = vector.shape_cast %53 : vector<1x16x384xf32> to vector<16x384xf32>
    %55 = arith.truncf %46 : vector<16x128xf32> to vector<16x128xbf16>
    %cst_26 = arith.constant dense<0.000000e+00> : vector<16x384xf32>
    %56 = tpu.matmul %55, %12, %cst_26 {dimension_numbers = #tpu.dot_dimension_numbers<[1], [0], [0], [1], [0, 0, 1, 1], [], []>} : vector<16x128xbf16>, vector<128x384xbf16>, vector<16x384xf32> -> vector<16x384xf32>
    %57 = vector.extract_strided_slice %54 {offsets = [0, 0], sizes = [16, 128], strides = [1, 1]} : vector<16x384xf32> to vector<16x128xf32>
    %58 = vector.extract_strided_slice %56 {offsets = [0, 0], sizes = [16, 128], strides = [1, 1]} : vector<16x384xf32> to vector<16x128xf32>
    %59 = arith.addf %57, %58 : vector<16x128xf32>
    %60 = arith.negf %59 : vector<16x128xf32>
    %61 = math.exp %60 : vector<16x128xf32>
    %cst_27 = arith.constant 1.000000e+00 : f32
    %62 = vector.broadcast %cst_27 : f32 to vector<16x128xf32>
    %63 = arith.addf %62, %61 : vector<16x128xf32>
    %64 = arith.divf %62, %63 : vector<16x128xf32>
    %65 = vector.extract_strided_slice %54 {offsets = [0, 128], sizes = [16, 128], strides = [1, 1]} : vector<16x384xf32> to vector<16x128xf32>
    %66 = vector.extract_strided_slice %56 {offsets = [0, 128], sizes = [16, 128], strides = [1, 1]} : vector<16x384xf32> to vector<16x128xf32>
    %67 = arith.addf %65, %66 : vector<16x128xf32>
    %68 = arith.negf %67 : vector<16x128xf32>
    %69 = math.exp %68 : vector<16x128xf32>
    %cst_28 = arith.constant 1.000000e+00 : f32
    %70 = vector.broadcast %cst_28 : f32 to vector<16x128xf32>
    %71 = arith.addf %70, %69 : vector<16x128xf32>
    %72 = arith.divf %70, %71 : vector<16x128xf32>
    %73 = vector.extract_strided_slice %54 {offsets = [0, 256], sizes = [16, 128], strides = [1, 1]} : vector<16x384xf32> to vector<16x128xf32>
    %74 = vector.extract_strided_slice %56 {offsets = [0, 256], sizes = [16, 128], strides = [1, 1]} : vector<16x384xf32> to vector<16x128xf32>
    %75 = arith.addf %74, %15 : vector<16x128xf32>
    %76 = arith.mulf %64, %75 : vector<16x128xf32>
    %77 = arith.addf %73, %76 : vector<16x128xf32>
    %78 = math.tanh %77 : vector<16x128xf32>
    %79 = arith.subf %46, %78 : vector<16x128xf32>
    %80 = arith.mulf %72, %79 : vector<16x128xf32>
    %81 = arith.addf %78, %80 : vector<16x128xf32>
    %82 = arith.truncf %81 : vector<16x128xf32> to vector<16x128xbf16>
    %83 = arith.index_cast %c1_i32 : i32 to index
    %c0_29 = arith.constant 0 : index
    %c0_30 = arith.constant 0 : index
    %84 = vector.load %arg7[%83, %c0_29, %c0_30] : memref<8x16x128xbf16, #tpu.memory_space<vmem>>, vector<1x16x128xbf16>
    %85 = vector.shape_cast %84 : vector<1x16x128xbf16> to vector<16x128xbf16>
    %86 = vector.shape_cast %82 : vector<16x128xbf16> to vector<1x16x128xbf16>
    tpu.vector_store %arg7[%83, %c0_29, %c0_30], %86 {strides = array<i32>} : memref<8x16x128xbf16, #tpu.memory_space<vmem>>, vector<1x16x128xbf16>,
    %c2_i32 = arith.constant 2 : i32
    %87 = arith.index_cast %c2_i32 : i32 to index
    %c0_31 = arith.constant 0 : index
    %c0_32 = arith.constant 0 : index
    %88 = vector.load %arg9[%87, %c0_31, %c0_32] : memref<8x16x384xf32, #tpu.memory_space<vmem>>, vector<1x16x384xf32>
    %89 = vector.shape_cast %88 : vector<1x16x384xf32> to vector<16x384xf32>
    %90 = arith.truncf %81 : vector<16x128xf32> to vector<16x128xbf16>
    %cst_33 = arith.constant dense<0.000000e+00> : vector<16x384xf32>
    %91 = tpu.matmul %90, %12, %cst_33 {dimension_numbers = #tpu.dot_dimension_numbers<[1], [0], [0], [1], [0, 0, 1, 1], [], []>} : vector<16x128xbf16>, vector<128x384xbf16>, vector<16x384xf32> -> vector<16x384xf32>
    %92 = vector.extract_strided_slice %89 {offsets = [0, 0], sizes = [16, 128], strides = [1, 1]} : vector<16x384xf32> to vector<16x128xf32>
    %93 = vector.extract_strided_slice %91 {offsets = [0, 0], sizes = [16, 128], strides = [1, 1]} : vector<16x384xf32> to vector<16x128xf32>
    %94 = arith.addf %92, %93 : vector<16x128xf32>
    %95 = arith.negf %94 : vector<16x128xf32>
    %96 = math.exp %95 : vector<16x128xf32>
    %cst_34 = arith.constant 1.000000e+00 : f32
    %97 = vector.broadcast %cst_34 : f32 to vector<16x128xf32>
    %98 = arith.addf %97, %96 : vector<16x128xf32>
    %99 = arith.divf %97, %98 : vector<16x128xf32>
    %100 = vector.extract_strided_slice %89 {offsets = [0, 128], sizes = [16, 128], strides = [1, 1]} : vector<16x384xf32> to vector<16x128xf32>
    %101 = vector.extract_strided_slice %91 {offsets = [0, 128], sizes = [16, 128], strides = [1, 1]} : vector<16x384xf32> to vector<16x128xf32>
    %102 = arith.addf %100, %101 : vector<16x128xf32>
    %103 = arith.negf %102 : vector<16x128xf32>
    %104 = math.exp %103 : vector<16x128xf32>
    %cst_35 = arith.constant 1.000000e+00 : f32
    %105 = vector.broadcast %cst_35 : f32 to vector<16x128xf32>
    %106 = arith.addf %105, %104 : vector<16x128xf32>
    %107 = arith.divf %105, %106 : vector<16x128xf32>
    %108 = vector.extract_strided_slice %89 {offsets = [0, 256], sizes = [16, 128], strides = [1, 1]} : vector<16x384xf32> to vector<16x128xf32>
    %109 = vector.extract_strided_slice %91 {offsets = [0, 256], sizes = [16, 128], strides = [1, 1]} : vector<16x384xf32> to vector<16x128xf32>
    %110 = arith.addf %109, %15 : vector<16x128xf32>
    %111 = arith.mulf %99, %110 : vector<16x128xf32>
    %112 = arith.addf %108, %111 : vector<16x128xf32>
    %113 = math.tanh %112 : vector<16x128xf32>
    %114 = arith.subf %81, %113 : vector<16x128xf32>
    %115 = arith.mulf %107, %114 : vector<16x128xf32>
    %116 = arith.addf %113, %115 : vector<16x128xf32>
    %117 = arith.truncf %116 : vector<16x128xf32> to vector<16x128xbf16>
    %118 = arith.index_cast %c2_i32 : i32 to index
    %c0_36 = arith.constant 0 : index
    %c0_37 = arith.constant 0 : index
    %119 = vector.load %arg7[%118, %c0_36, %c0_37] : memref<8x16x128xbf16, #tpu.memory_space<vmem>>, vector<1x16x128xbf16>
    %120 = vector.shape_cast %119 : vector<1x16x128xbf16> to vector<16x128xbf16>
    %121 = vector.shape_cast %117 : vector<16x128xbf16> to vector<1x16x128xbf16>
    tpu.vector_store %arg7[%118, %c0_36, %c0_37], %121 {strides = array<i32>} : memref<8x16x128xbf16, #tpu.memory_space<vmem>>, vector<1x16x128xbf16>,
    %c3_i32 = arith.constant 3 : i32
    %122 = arith.index_cast %c3_i32 : i32 to index
    %c0_38 = arith.constant 0 : index
    %c0_39 = arith.constant 0 : index
    %123 = vector.load %arg9[%122, %c0_38, %c0_39] : memref<8x16x384xf32, #tpu.memory_space<vmem>>, vector<1x16x384xf32>
    %124 = vector.shape_cast %123 : vector<1x16x384xf32> to vector<16x384xf32>
    %125 = arith.truncf %116 : vector<16x128xf32> to vector<16x128xbf16>
    %cst_40 = arith.constant dense<0.000000e+00> : vector<16x384xf32>
    %126 = tpu.matmul %125, %12, %cst_40 {dimension_numbers = #tpu.dot_dimension_numbers<[1], [0], [0], [1], [0, 0, 1, 1], [], []>} : vector<16x128xbf16>, vector<128x384xbf16>, vector<16x384xf32> -> vector<16x384xf32>
    %127 = vector.extract_strided_slice %124 {offsets = [0, 0], sizes = [16, 128], strides = [1, 1]} : vector<16x384xf32> to vector<16x128xf32>
    %128 = vector.extract_strided_slice %126 {offsets = [0, 0], sizes = [16, 128], strides = [1, 1]} : vector<16x384xf32> to vector<16x128xf32>
    %129 = arith.addf %127, %128 : vector<16x128xf32>
    %130 = arith.negf %129 : vector<16x128xf32>
    %131 = math.exp %130 : vector<16x128xf32>
    %cst_41 = arith.constant 1.000000e+00 : f32
    %132 = vector.broadcast %cst_41 : f32 to vector<16x128xf32>
    %133 = arith.addf %132, %131 : vector<16x128xf32>
    %134 = arith.divf %132, %133 : vector<16x128xf32>
    %135 = vector.extract_strided_slice %124 {offsets = [0, 128], sizes = [16, 128], strides = [1, 1]} : vector<16x384xf32> to vector<16x128xf32>
    %136 = vector.extract_strided_slice %126 {offsets = [0, 128], sizes = [16, 128], strides = [1, 1]} : vector<16x384xf32> to vector<16x128xf32>
    %137 = arith.addf %135, %136 : vector<16x128xf32>
    %138 = arith.negf %137 : vector<16x128xf32>
    %139 = math.exp %138 : vector<16x128xf32>
    %cst_42 = arith.constant 1.000000e+00 : f32
    %140 = vector.broadcast %cst_42 : f32 to vector<16x128xf32>
    %141 = arith.addf %140, %139 : vector<16x128xf32>
    %142 = arith.divf %140, %141 : vector<16x128xf32>
    %143 = vector.extract_strided_slice %124 {offsets = [0, 256], sizes = [16, 128], strides = [1, 1]} : vector<16x384xf32> to vector<16x128xf32>
    %144 = vector.extract_strided_slice %126 {offsets = [0, 256], sizes = [16, 128], strides = [1, 1]} : vector<16x384xf32> to vector<16x128xf32>
    %145 = arith.addf %144, %15 : vector<16x128xf32>
    %146 = arith.mulf %134, %145 : vector<16x128xf32>
    %147 = arith.addf %143, %146 : vector<16x128xf32>
    %148 = math.tanh %147 : vector<16x128xf32>
    %149 = arith.subf %116, %148 : vector<16x128xf32>
    %150 = arith.mulf %142, %149 : vector<16x128xf32>
    %151 = arith.addf %148, %150 : vector<16x128xf32>
    %152 = arith.truncf %151 : vector<16x128xf32> to vector<16x128xbf16>
    %153 = arith.index_cast %c3_i32 : i32 to index
    %c0_43 = arith.constant 0 : index
    %c0_44 = arith.constant 0 : index
    %154 = vector.load %arg7[%153, %c0_43, %c0_44] : memref<8x16x128xbf16, #tpu.memory_space<vmem>>, vector<1x16x128xbf16>
    %155 = vector.shape_cast %154 : vector<1x16x128xbf16> to vector<16x128xbf16>
    %156 = vector.shape_cast %152 : vector<16x128xbf16> to vector<1x16x128xbf16>
    tpu.vector_store %arg7[%153, %c0_43, %c0_44], %156 {strides = array<i32>} : memref<8x16x128xbf16, #tpu.memory_space<vmem>>, vector<1x16x128xbf16>,
    %c4_i32 = arith.constant 4 : i32
    %157 = arith.index_cast %c4_i32 : i32 to index
    %c0_45 = arith.constant 0 : index
    %c0_46 = arith.constant 0 : index
    %158 = vector.load %arg9[%157, %c0_45, %c0_46] : memref<8x16x384xf32, #tpu.memory_space<vmem>>, vector<1x16x384xf32>
    %159 = vector.shape_cast %158 : vector<1x16x384xf32> to vector<16x384xf32>
    %160 = arith.truncf %151 : vector<16x128xf32> to vector<16x128xbf16>
    %cst_47 = arith.constant dense<0.000000e+00> : vector<16x384xf32>
    %161 = tpu.matmul %160, %12, %cst_47 {dimension_numbers = #tpu.dot_dimension_numbers<[1], [0], [0], [1], [0, 0, 1, 1], [], []>} : vector<16x128xbf16>, vector<128x384xbf16>, vector<16x384xf32> -> vector<16x384xf32>
    %162 = vector.extract_strided_slice %159 {offsets = [0, 0], sizes = [16, 128], strides = [1, 1]} : vector<16x384xf32> to vector<16x128xf32>
    %163 = vector.extract_strided_slice %161 {offsets = [0, 0], sizes = [16, 128], strides = [1, 1]} : vector<16x384xf32> to vector<16x128xf32>
    %164 = arith.addf %162, %163 : vector<16x128xf32>
    %165 = arith.negf %164 : vector<16x128xf32>
    %166 = math.exp %165 : vector<16x128xf32>
    %cst_48 = arith.constant 1.000000e+00 : f32
    %167 = vector.broadcast %cst_48 : f32 to vector<16x128xf32>
    %168 = arith.addf %167, %166 : vector<16x128xf32>
    %169 = arith.divf %167, %168 : vector<16x128xf32>
    %170 = vector.extract_strided_slice %159 {offsets = [0, 128], sizes = [16, 128], strides = [1, 1]} : vector<16x384xf32> to vector<16x128xf32>
    %171 = vector.extract_strided_slice %161 {offsets = [0, 128], sizes = [16, 128], strides = [1, 1]} : vector<16x384xf32> to vector<16x128xf32>
    %172 = arith.addf %170, %171 : vector<16x128xf32>
    %173 = arith.negf %172 : vector<16x128xf32>
    %174 = math.exp %173 : vector<16x128xf32>
    %cst_49 = arith.constant 1.000000e+00 : f32
    %175 = vector.broadcast %cst_49 : f32 to vector<16x128xf32>
    %176 = arith.addf %175, %174 : vector<16x128xf32>
    %177 = arith.divf %175, %176 : vector<16x128xf32>
    %178 = vector.extract_strided_slice %159 {offsets = [0, 256], sizes = [16, 128], strides = [1, 1]} : vector<16x384xf32> to vector<16x128xf32>
    %179 = vector.extract_strided_slice %161 {offsets = [0, 256], sizes = [16, 128], strides = [1, 1]} : vector<16x384xf32> to vector<16x128xf32>
    %180 = arith.addf %179, %15 : vector<16x128xf32>
    %181 = arith.mulf %169, %180 : vector<16x128xf32>
    %182 = arith.addf %178, %181 : vector<16x128xf32>
    %183 = math.tanh %182 : vector<16x128xf32>
    %184 = arith.subf %151, %183 : vector<16x128xf32>
    %185 = arith.mulf %177, %184 : vector<16x128xf32>
    %186 = arith.addf %183, %185 : vector<16x128xf32>
    %187 = arith.truncf %186 : vector<16x128xf32> to vector<16x128xbf16>
    %188 = arith.index_cast %c4_i32 : i32 to index
    %c0_50 = arith.constant 0 : index
    %c0_51 = arith.constant 0 : index
    %189 = vector.load %arg7[%188, %c0_50, %c0_51] : memref<8x16x128xbf16, #tpu.memory_space<vmem>>, vector<1x16x128xbf16>
    %190 = vector.shape_cast %189 : vector<1x16x128xbf16> to vector<16x128xbf16>
    %191 = vector.shape_cast %187 : vector<16x128xbf16> to vector<1x16x128xbf16>
    tpu.vector_store %arg7[%188, %c0_50, %c0_51], %191 {strides = array<i32>} : memref<8x16x128xbf16, #tpu.memory_space<vmem>>, vector<1x16x128xbf16>,
    %c5_i32 = arith.constant 5 : i32
    %192 = arith.index_cast %c5_i32 : i32 to index
    %c0_52 = arith.constant 0 : index
    %c0_53 = arith.constant 0 : index
    %193 = vector.load %arg9[%192, %c0_52, %c0_53] : memref<8x16x384xf32, #tpu.memory_space<vmem>>, vector<1x16x384xf32>
    %194 = vector.shape_cast %193 : vector<1x16x384xf32> to vector<16x384xf32>
    %195 = arith.truncf %186 : vector<16x128xf32> to vector<16x128xbf16>
    %cst_54 = arith.constant dense<0.000000e+00> : vector<16x384xf32>
    %196 = tpu.matmul %195, %12, %cst_54 {dimension_numbers = #tpu.dot_dimension_numbers<[1], [0], [0], [1], [0, 0, 1, 1], [], []>} : vector<16x128xbf16>, vector<128x384xbf16>, vector<16x384xf32> -> vector<16x384xf32>
    %197 = vector.extract_strided_slice %194 {offsets = [0, 0], sizes = [16, 128], strides = [1, 1]} : vector<16x384xf32> to vector<16x128xf32>
    %198 = vector.extract_strided_slice %196 {offsets = [0, 0], sizes = [16, 128], strides = [1, 1]} : vector<16x384xf32> to vector<16x128xf32>
    %199 = arith.addf %197, %198 : vector<16x128xf32>
    %200 = arith.negf %199 : vector<16x128xf32>
    %201 = math.exp %200 : vector<16x128xf32>
    %cst_55 = arith.constant 1.000000e+00 : f32
    %202 = vector.broadcast %cst_55 : f32 to vector<16x128xf32>
    %203 = arith.addf %202, %201 : vector<16x128xf32>
    %204 = arith.divf %202, %203 : vector<16x128xf32>
    %205 = vector.extract_strided_slice %194 {offsets = [0, 128], sizes = [16, 128], strides = [1, 1]} : vector<16x384xf32> to vector<16x128xf32>
    %206 = vector.extract_strided_slice %196 {offsets = [0, 128], sizes = [16, 128], strides = [1, 1]} : vector<16x384xf32> to vector<16x128xf32>
    %207 = arith.addf %205, %206 : vector<16x128xf32>
    %208 = arith.negf %207 : vector<16x128xf32>
    %209 = math.exp %208 : vector<16x128xf32>
    %cst_56 = arith.constant 1.000000e+00 : f32
    %210 = vector.broadcast %cst_56 : f32 to vector<16x128xf32>
    %211 = arith.addf %210, %209 : vector<16x128xf32>
    %212 = arith.divf %210, %211 : vector<16x128xf32>
    %213 = vector.extract_strided_slice %194 {offsets = [0, 256], sizes = [16, 128], strides = [1, 1]} : vector<16x384xf32> to vector<16x128xf32>
    %214 = vector.extract_strided_slice %196 {offsets = [0, 256], sizes = [16, 128], strides = [1, 1]} : vector<16x384xf32> to vector<16x128xf32>
    %215 = arith.addf %214, %15 : vector<16x128xf32>
    %216 = arith.mulf %204, %215 : vector<16x128xf32>
    %217 = arith.addf %213, %216 : vector<16x128xf32>
    %218 = math.tanh %217 : vector<16x128xf32>
    %219 = arith.subf %186, %218 : vector<16x128xf32>
    %220 = arith.mulf %212, %219 : vector<16x128xf32>
    %221 = arith.addf %218, %220 : vector<16x128xf32>
    %222 = arith.truncf %221 : vector<16x128xf32> to vector<16x128xbf16>
    %223 = arith.index_cast %c5_i32 : i32 to index
    %c0_57 = arith.constant 0 : index
    %c0_58 = arith.constant 0 : index
    %224 = vector.load %arg7[%223, %c0_57, %c0_58] : memref<8x16x128xbf16, #tpu.memory_space<vmem>>, vector<1x16x128xbf16>
    %225 = vector.shape_cast %224 : vector<1x16x128xbf16> to vector<16x128xbf16>
    %226 = vector.shape_cast %222 : vector<16x128xbf16> to vector<1x16x128xbf16>
    tpu.vector_store %arg7[%223, %c0_57, %c0_58], %226 {strides = array<i32>} : memref<8x16x128xbf16, #tpu.memory_space<vmem>>, vector<1x16x128xbf16>,
    %c6_i32 = arith.constant 6 : i32
    %227 = arith.index_cast %c6_i32 : i32 to index
    %c0_59 = arith.constant 0 : index
    %c0_60 = arith.constant 0 : index
    %228 = vector.load %arg9[%227, %c0_59, %c0_60] : memref<8x16x384xf32, #tpu.memory_space<vmem>>, vector<1x16x384xf32>
    %229 = vector.shape_cast %228 : vector<1x16x384xf32> to vector<16x384xf32>
    %230 = arith.truncf %221 : vector<16x128xf32> to vector<16x128xbf16>
    %cst_61 = arith.constant dense<0.000000e+00> : vector<16x384xf32>
    %231 = tpu.matmul %230, %12, %cst_61 {dimension_numbers = #tpu.dot_dimension_numbers<[1], [0], [0], [1], [0, 0, 1, 1], [], []>} : vector<16x128xbf16>, vector<128x384xbf16>, vector<16x384xf32> -> vector<16x384xf32>
    %232 = vector.extract_strided_slice %229 {offsets = [0, 0], sizes = [16, 128], strides = [1, 1]} : vector<16x384xf32> to vector<16x128xf32>
    %233 = vector.extract_strided_slice %231 {offsets = [0, 0], sizes = [16, 128], strides = [1, 1]} : vector<16x384xf32> to vector<16x128xf32>
    %234 = arith.addf %232, %233 : vector<16x128xf32>
    %235 = arith.negf %234 : vector<16x128xf32>
    %236 = math.exp %235 : vector<16x128xf32>
    %cst_62 = arith.constant 1.000000e+00 : f32
    %237 = vector.broadcast %cst_62 : f32 to vector<16x128xf32>
    %238 = arith.addf %237, %236 : vector<16x128xf32>
    %239 = arith.divf %237, %238 : vector<16x128xf32>
    %240 = vector.extract_strided_slice %229 {offsets = [0, 128], sizes = [16, 128], strides = [1, 1]} : vector<16x384xf32> to vector<16x128xf32>
    %241 = vector.extract_strided_slice %231 {offsets = [0, 128], sizes = [16, 128], strides = [1, 1]} : vector<16x384xf32> to vector<16x128xf32>
    %242 = arith.addf %240, %241 : vector<16x128xf32>
    %243 = arith.negf %242 : vector<16x128xf32>
    %244 = math.exp %243 : vector<16x128xf32>
    %cst_63 = arith.constant 1.000000e+00 : f32
    %245 = vector.broadcast %cst_63 : f32 to vector<16x128xf32>
    %246 = arith.addf %245, %244 : vector<16x128xf32>
    %247 = arith.divf %245, %246 : vector<16x128xf32>
    %248 = vector.extract_strided_slice %229 {offsets = [0, 256], sizes = [16, 128], strides = [1, 1]} : vector<16x384xf32> to vector<16x128xf32>
    %249 = vector.extract_strided_slice %231 {offsets = [0, 256], sizes = [16, 128], strides = [1, 1]} : vector<16x384xf32> to vector<16x128xf32>
    %250 = arith.addf %249, %15 : vector<16x128xf32>
    %251 = arith.mulf %239, %250 : vector<16x128xf32>
    %252 = arith.addf %248, %251 : vector<16x128xf32>
    %253 = math.tanh %252 : vector<16x128xf32>
    %254 = arith.subf %221, %253 : vector<16x128xf32>
    %255 = arith.mulf %247, %254 : vector<16x128xf32>
    %256 = arith.addf %253, %255 : vector<16x128xf32>
    %257 = arith.truncf %256 : vector<16x128xf32> to vector<16x128xbf16>
    %258 = arith.index_cast %c6_i32 : i32 to index
    %c0_64 = arith.constant 0 : index
    %c0_65 = arith.constant 0 : index
    %259 = vector.load %arg7[%258, %c0_64, %c0_65] : memref<8x16x128xbf16, #tpu.memory_space<vmem>>, vector<1x16x128xbf16>
    %260 = vector.shape_cast %259 : vector<1x16x128xbf16> to vector<16x128xbf16>
    %261 = vector.shape_cast %257 : vector<16x128xbf16> to vector<1x16x128xbf16>
    tpu.vector_store %arg7[%258, %c0_64, %c0_65], %261 {strides = array<i32>} : memref<8x16x128xbf16, #tpu.memory_space<vmem>>, vector<1x16x128xbf16>,
    %c7_i32 = arith.constant 7 : i32
    %262 = arith.index_cast %c7_i32 : i32 to index
    %c0_66 = arith.constant 0 : index
    %c0_67 = arith.constant 0 : index
    %263 = vector.load %arg9[%262, %c0_66, %c0_67] : memref<8x16x384xf32, #tpu.memory_space<vmem>>, vector<1x16x384xf32>
    %264 = vector.shape_cast %263 : vector<1x16x384xf32> to vector<16x384xf32>
    %265 = arith.truncf %256 : vector<16x128xf32> to vector<16x128xbf16>
    %cst_68 = arith.constant dense<0.000000e+00> : vector<16x384xf32>
    %266 = tpu.matmul %265, %12, %cst_68 {dimension_numbers = #tpu.dot_dimension_numbers<[1], [0], [0], [1], [0, 0, 1, 1], [], []>} : vector<16x128xbf16>, vector<128x384xbf16>, vector<16x384xf32> -> vector<16x384xf32>
    %267 = vector.extract_strided_slice %264 {offsets = [0, 0], sizes = [16, 128], strides = [1, 1]} : vector<16x384xf32> to vector<16x128xf32>
    %268 = vector.extract_strided_slice %266 {offsets = [0, 0], sizes = [16, 128], strides = [1, 1]} : vector<16x384xf32> to vector<16x128xf32>
    %269 = arith.addf %267, %268 : vector<16x128xf32>
    %270 = arith.negf %269 : vector<16x128xf32>
    %271 = math.exp %270 : vector<16x128xf32>
    %cst_69 = arith.constant 1.000000e+00 : f32
    %272 = vector.broadcast %cst_69 : f32 to vector<16x128xf32>
    %273 = arith.addf %272, %271 : vector<16x128xf32>
    %274 = arith.divf %272, %273 : vector<16x128xf32>
    %275 = vector.extract_strided_slice %264 {offsets = [0, 128], sizes = [16, 128], strides = [1, 1]} : vector<16x384xf32> to vector<16x128xf32>
    %276 = vector.extract_strided_slice %266 {offsets = [0, 128], sizes = [16, 128], strides = [1, 1]} : vector<16x384xf32> to vector<16x128xf32>
    %277 = arith.addf %275, %276 : vector<16x128xf32>
    %278 = arith.negf %277 : vector<16x128xf32>
    %279 = math.exp %278 : vector<16x128xf32>
    %cst_70 = arith.constant 1.000000e+00 : f32
    %280 = vector.broadcast %cst_70 : f32 to vector<16x128xf32>
    %281 = arith.addf %280, %279 : vector<16x128xf32>
    %282 = arith.divf %280, %281 : vector<16x128xf32>
    %283 = vector.extract_strided_slice %264 {offsets = [0, 256], sizes = [16, 128], strides = [1, 1]} : vector<16x384xf32> to vector<16x128xf32>
    %284 = vector.extract_strided_slice %266 {offsets = [0, 256], sizes = [16, 128], strides = [1, 1]} : vector<16x384xf32> to vector<16x128xf32>
    %285 = arith.addf %284, %15 : vector<16x128xf32>
    %286 = arith.mulf %274, %285 : vector<16x128xf32>
    %287 = arith.addf %283, %286 : vector<16x128xf32>
    %288 = math.tanh %287 : vector<16x128xf32>
    %289 = arith.subf %256, %288 : vector<16x128xf32>
    %290 = arith.mulf %282, %289 : vector<16x128xf32>
    %291 = arith.addf %288, %290 : vector<16x128xf32>
    %292 = arith.truncf %291 : vector<16x128xf32> to vector<16x128xbf16>
    %293 = arith.index_cast %c7_i32 : i32 to index
    %c0_71 = arith.constant 0 : index
    %c0_72 = arith.constant 0 : index
    %294 = vector.load %arg7[%293, %c0_71, %c0_72] : memref<8x16x128xbf16, #tpu.memory_space<vmem>>, vector<1x16x128xbf16>
    %295 = vector.shape_cast %294 : vector<1x16x128xbf16> to vector<16x128xbf16>
    %296 = vector.shape_cast %292 : vector<16x128xbf16> to vector<1x16x128xbf16>
    tpu.vector_store %arg7[%293, %c0_71, %c0_72], %296 {strides = array<i32>} : memref<8x16x128xbf16, #tpu.memory_space<vmem>>, vector<1x16x128xbf16>,
    %c8_i32 = arith.constant 8 : i32
    %c0_73 = arith.constant 0 : index
    %c0_74 = arith.constant 0 : index
    %297 = vector.load %arg8[%c0_73, %c0_74] : memref<16x128xf32, #tpu.memory_space<vmem>>, vector<16x128xf32>
    tpu.vector_store %arg8[%c0_73, %c0_74], %291 {strides = array<i32>} : memref<16x128xf32, #tpu.memory_space<vmem>>, vector<16x128xf32>,
    return
  }
  func.func @transform_0(%arg0: i32, %arg1: i32) -> (i32, i32, i32) {
    %c0_i32 = arith.constant 0 : i32
    %c0_i32_0 = arith.constant 0 : i32
    return %arg1, %arg0, %c0_i32 : i32, i32, i32
  }
  func.func @transform_1(%arg0: i32, %arg1: i32) -> (i32, i32) {
    %c0_i32 = arith.constant 0 : i32
    %c0_i32_0 = arith.constant 0 : i32
    %c0_i32_1 = arith.constant 0 : i32
    return %c0_i32, %c0_i32_0 : i32, i32
  }
  func.func @transform_2(%arg0: i32, %arg1: i32) -> (i32, i32) {
    %c0_i32 = arith.constant 0 : i32
    %c0_i32_0 = arith.constant 0 : i32
    %c0_i32_1 = arith.constant 0 : i32
    return %c0_i32, %c0_i32_0 : i32, i32
  }
  func.func @transform_3(%arg0: i32, %arg1: i32) -> (i32, i32) {
    %c0_i32 = arith.constant 0 : i32
    %c0_i32_0 = arith.constant 0 : i32
    %c0_i32_1 = arith.constant 0 : i32
    return %c0_i32, %c0_i32_0 : i32, i32
  }
  func.func @transform_4(%arg0: i32, %arg1: i32) -> (i32, i32) {
    %c0_i32 = arith.constant 0 : i32
    %c0_i32_0 = arith.constant 0 : i32
    %c0_i32_1 = arith.constant 0 : i32
    return %c0_i32, %c0_i32_0 : i32, i32
  }
  func.func @transform_5(%arg0: i32, %arg1: i32) -> (i32, i32, i32) {
    %c0_i32 = arith.constant 0 : i32
    %c0_i32_0 = arith.constant 0 : i32
    return %arg1, %arg0, %c0_i32 : i32, i32, i32
  }
}

module attributes {stable_mosaic.version = 11 : i64} {
  func.func @gru_fused_kernel(%arg0: i32, %arg1: i32, %arg2: memref<8x16x128xbf16, #tpu.memory_space<vmem>>, %arg3: memref<128x384xbf16, #tpu.memory_space<vmem>>, %arg4: memref<128x384xbf16, #tpu.memory_space<vmem>>, %arg5: memref<1x384xf32, #tpu.memory_space<vmem>>, %arg6: memref<1x128xf32, #tpu.memory_space<vmem>>, %arg7: memref<8x16x128xbf16, #tpu.memory_space<vmem>>, %arg8: memref<16x128xf32, #tpu.memory_space<vmem>>, %arg9: memref<8x16x384xf32, #tpu.memory_space<vmem>>) attributes {dimension_semantics = [#tpu.dimension_semantics<parallel>, #tpu.dimension_semantics<arbitrary>], iteration_bounds = array<i64: 1, 1>, scalar_prefetch = 0 : i64, scratch_operands = 2 : i64, tpu.core_type = #tpu.core_type<tc>, window_params = [{transform_indices = @transform_0, window_bounds = array<i64: 8, 16, 128>}, {pipeline_mode = #tpu.pipeline_mode<synchronous>, transform_indices = @transform_1, window_bounds = array<i64: 128, 384>}, {pipeline_mode = #tpu.pipeline_mode<synchronous>, transform_indices = @transform_2, window_bounds = array<i64: 128, 384>}, {pipeline_mode = #tpu.pipeline_mode<synchronous>, transform_indices = @transform_3, window_bounds = array<i64: 1, 384>}, {pipeline_mode = #tpu.pipeline_mode<synchronous>, transform_indices = @transform_4, window_bounds = array<i64: 1, 128>}, {transform_indices = @transform_5, window_bounds = array<i64: 8, 16, 128>}]} {
    %c0_i32 = arith.constant 0 : i32
    %0 = arith.cmpi eq, %arg1, %c0_i32 : i32
    %1 = arith.extui %0 : i1 to i32
    %c0_i32_0 = arith.constant 0 : i32
    %2 = arith.cmpi ne, %1, %c0_i32_0 : i32
    scf.if %2 {
      %cst_75 = arith.constant 0.000000e+00 : f32
      %298 = vector.broadcast %cst_75 : f32 to vector<16x128xf32>
      %c0_76 = arith.constant 0 : index
      %c0_77 = arith.constant 0 : index
      %299 = vector.load %arg8[%c0_76, %c0_77] : memref<16x128xf32, #tpu.memory_space<vmem>>, vector<16x128xf32>
      tpu.vector_store %arg8[%c0_76, %c0_77], %298 {strides = array<i32>} : memref<16x128xf32, #tpu.memory_space<vmem>>, vector<16x128xf32>,
    } else {
    }
    %c0 = arith.constant 0 : index
    %c0_1 = arith.constant 0 : index
    %c0_2 = arith.constant 0 : index
    %3 = vector.load %arg2[%c0, %c0_1, %c0_2] : memref<8x16x128xbf16, #tpu.memory_space<vmem>>, vector<8x16x128xbf16>
    %4 = vector.shape_cast %3 : vector<8x16x128xbf16> to vector<128x128xbf16>
    %c0_3 = arith.constant 0 : index
    %c0_4 = arith.constant 0 : index
    %5 = vector.load %arg3[%c0_3, %c0_4] : memref<128x384xbf16, #tpu.memory_space<vmem>>, vector<128x384xbf16>
    %cst = arith.constant dense<0.000000e+00> : vector<128x384xf32>
    %6 = tpu.matmul %4, %5, %cst {dimension_numbers = #tpu.dot_dimension_numbers<[1], [0], [0], [1], [0, 0, 1, 1], [], []>} : vector<128x128xbf16>, vector<128x384xbf16>, vector<128x384xf32> -> vector<128x384xf32>
    %c0_5 = arith.constant 0 : index
    %c0_6 = arith.constant 0 : index
    %7 = vector.load %arg5[%c0_5, %c0_6] : memref<1x384xf32, #tpu.memory_space<vmem>>, vector<1x384xf32>
    %8 = vector.broadcast %7 : vector<1x384xf32> to vector<128x384xf32>
    %9 = arith.addf %6, %8 : vector<128x384xf32>
    %10 = vector.shape_cast %9 : vector<128x384xf32> to vector<8x16x384xf32>
    %c0_7 = arith.constant 0 : index
    %c0_8 = arith.constant 0 : index
    %c0_9 = arith.constant 0 : index
    %11 = vector.load %arg9[%c0_7, %c0_8, %c0_9] : memref<8x16x384xf32, #tpu.memory_space<vmem>>, vector<8x16x384xf32>
    tpu.vector_store %arg9[%c0_7, %c0_8, %c0_9], %10 {strides = array<i32>} : memref<8x16x384xf32, #tpu.memory_space<vmem>>, vector<8x16x384xf32>,
    %c0_10 = arith.constant 0 : index
    %c0_11 = arith.constant 0 : index
    %12 = vector.load %arg4[%c0_10, %c0_11] : memref<128x384xbf16, #tpu.memory_space<vmem>>, vector<128x384xbf16>
    %c0_12 = arith.constant 0 : index
    %c0_13 = arith.constant 0 : index
    %13 = vector.load %arg6[%c0_12, %c0_13] : memref<1x128xf32, #tpu.memory_space<vmem>>, vector<1x128xf32>
    %14 = vector.shape_cast %13 : vector<1x128xf32> to vector<1x128xf32>
    %15 = vector.broadcast %14 : vector<1x128xf32> to vector<16x128xf32>
    %c0_14 = arith.constant 0 : index
    %c0_15 = arith.constant 0 : index
    %16 = vector.load %arg8[%c0_14, %c0_15] : memref<16x128xf32, #tpu.memory_space<vmem>>, vector<16x128xf32>
    %c0_i32_16 = arith.constant 0 : i32
    %17 = arith.index_cast %c0_i32_16 : i32 to index
    %c0_17 = arith.constant 0 : index
    %c0_18 = arith.constant 0 : index
    %18 = vector.load %arg9[%17, %c0_17, %c0_18] : memref<8x16x384xf32, #tpu.memory_space<vmem>>, vector<1x16x384xf32>
    %19 = vector.shape_cast %18 : vector<1x16x384xf32> to vector<16x384xf32>
    %20 = arith.truncf %16 : vector<16x128xf32> to vector<16x128xbf16>
    %cst_19 = arith.constant dense<0.000000e+00> : vector<16x384xf32>
    %21 = tpu.matmul %20, %12, %cst_19 {dimension_numbers = #tpu.dot_dimension_numbers<[1], [0], [0], [1], [0, 0, 1, 1], [], []>} : vector<16x128xbf16>, vector<128x384xbf16>, vector<16x384xf32> -> vector<16x384xf32>
    %22 = vector.extract_strided_slice %19 {offsets = [0, 0], sizes = [16, 128], strides = [1, 1]} : vector<16x384xf32> to vector<16x128xf32>
    %23 = vector.extract_strided_slice %21 {offsets = [0, 0], sizes = [16, 128], strides = [1, 1]} : vector<16x384xf32> to vector<16x128xf32>
    %24 = arith.addf %22, %23 : vector<16x128xf32>
    %25 = arith.negf %24 : vector<16x128xf32>
    %26 = math.exp %25 : vector<16x128xf32>
    %cst_20 = arith.constant 1.000000e+00 : f32
    %27 = vector.broadcast %cst_20 : f32 to vector<16x128xf32>
    %28 = arith.addf %27, %26 : vector<16x128xf32>
    %29 = arith.divf %27, %28 : vector<16x128xf32>
    %30 = vector.extract_strided_slice %19 {offsets = [0, 128], sizes = [16, 128], strides = [1, 1]} : vector<16x384xf32> to vector<16x128xf32>
    %31 = vector.extract_strided_slice %21 {offsets = [0, 128], sizes = [16, 128], strides = [1, 1]} : vector<16x384xf32> to vector<16x128xf32>
    %32 = arith.addf %30, %31 : vector<16x128xf32>
    %33 = arith.negf %32 : vector<16x128xf32>
    %34 = math.exp %33 : vector<16x128xf32>
    %cst_21 = arith.constant 1.000000e+00 : f32
    %35 = vector.broadcast %cst_21 : f32 to vector<16x128xf32>
    %36 = arith.addf %35, %34 : vector<16x128xf32>
    %37 = arith.divf %35, %36 : vector<16x128xf32>
    %38 = vector.extract_strided_slice %19 {offsets = [0, 256], sizes = [16, 128], strides = [1, 1]} : vector<16x384xf32> to vector<16x128xf32>
    %39 = vector.extract_strided_slice %21 {offsets = [0, 256], sizes = [16, 128], strides = [1, 1]} : vector<16x384xf32> to vector<16x128xf32>
    %40 = arith.addf %39, %15 : vector<16x128xf32>
    %41 = arith.mulf %29, %40 : vector<16x128xf32>
    %42 = arith.addf %38, %41 : vector<16x128xf32>
    %43 = math.tanh %42 : vector<16x128xf32>
    %44 = arith.subf %16, %43 : vector<16x128xf32>
    %45 = arith.mulf %37, %44 : vector<16x128xf32>
    %46 = arith.addf %43, %45 : vector<16x128xf32>
    %47 = arith.truncf %46 : vector<16x128xf32> to vector<16x128xbf16>
    %48 = arith.index_cast %c0_i32_16 : i32 to index
    %c0_22 = arith.constant 0 : index
    %c0_23 = arith.constant 0 : index
    %49 = vector.load %arg7[%48, %c0_22, %c0_23] : memref<8x16x128xbf16, #tpu.memory_space<vmem>>, vector<1x16x128xbf16>
    %50 = vector.shape_cast %49 : vector<1x16x128xbf16> to vector<16x128xbf16>
    %51 = vector.shape_cast %47 : vector<16x128xbf16> to vector<1x16x128xbf16>
    tpu.vector_store %arg7[%48, %c0_22, %c0_23], %51 {strides = array<i32>} : memref<8x16x128xbf16, #tpu.memory_space<vmem>>, vector<1x16x128xbf16>,
    %c1_i32 = arith.constant 1 : i32
    %52 = arith.index_cast %c1_i32 : i32 to index
    %c0_24 = arith.constant 0 : index
    %c0_25 = arith.constant 0 : index
    %53 = vector.load %arg9[%52, %c0_24, %c0_25] : memref<8x16x384xf32, #tpu.memory_space<vmem>>, vector<1x16x384xf32>
    %54 = vector.shape_cast %53 : vector<1x16x384xf32> to vector<16x384xf32>
    %55 = arith.truncf %46 : vector<16x128xf32> to vector<16x128xbf16>
    %cst_26 = arith.constant dense<0.000000e+00> : vector<16x384xf32>
    %56 = tpu.matmul %55, %12, %cst_26 {dimension_numbers = #tpu.dot_dimension_numbers<[1], [0], [0], [1], [0, 0, 1, 1], [], []>} : vector<16x128xbf16>, vector<128x384xbf16>, vector<16x384xf32> -> vector<16x384xf32>
    %57 = vector.extract_strided_slice %54 {offsets = [0, 0], sizes = [16, 128], strides = [1, 1]} : vector<16x384xf32> to vector<16x128xf32>
    %58 = vector.extract_strided_slice %56 {offsets = [0, 0], sizes = [16, 128], strides = [1, 1]} : vector<16x384xf32> to vector<16x128xf32>
    %59 = arith.addf %57, %58 : vector<16x128xf32>
    %60 = arith.negf %59 : vector<16x128xf32>
    %61 = math.exp %60 : vector<16x128xf32>
    %cst_27 = arith.constant 1.000000e+00 : f32
    %62 = vector.broadcast %cst_27 : f32 to vector<16x128xf32>
    %63 = arith.addf %62, %61 : vector<16x128xf32>
    %64 = arith.divf %62, %63 : vector<16x128xf32>
    %65 = vector.extract_strided_slice %54 {offsets = [0, 128], sizes = [16, 128], strides = [1, 1]} : vector<16x384xf32> to vector<16x128xf32>
    %66 = vector.extract_strided_slice %56 {offsets = [0, 128], sizes = [16, 128], strides = [1, 1]} : vector<16x384xf32> to vector<16x128xf32>
    %67 = arith.addf %65, %66 : vector<16x128xf32>
    %68 = arith.negf %67 : vector<16x128xf32>
    %69 = math.exp %68 : vector<16x128xf32>
    %cst_28 = arith.constant 1.000000e+00 : f32
    %70 = vector.broadcast %cst_28 : f32 to vector<16x128xf32>
    %71 = arith.addf %70, %69 : vector<16x128xf32>
    %72 = arith.divf %70, %71 : vector<16x128xf32>
    %73 = vector.extract_strided_slice %54 {offsets = [0, 256], sizes = [16, 128], strides = [1, 1]} : vector<16x384xf32> to vector<16x128xf32>
    %74 = vector.extract_strided_slice %56 {offsets = [0, 256], sizes = [16, 128], strides = [1, 1]} : vector<16x384xf32> to vector<16x128xf32>
    %75 = arith.addf %74, %15 : vector<16x128xf32>
    %76 = arith.mulf %64, %75 : vector<16x128xf32>
    %77 = arith.addf %73, %76 : vector<16x128xf32>
    %78 = math.tanh %77 : vector<16x128xf32>
    %79 = arith.subf %46, %78 : vector<16x128xf32>
    %80 = arith.mulf %72, %79 : vector<16x128xf32>
    %81 = arith.addf %78, %80 : vector<16x128xf32>
    %82 = arith.truncf %81 : vector<16x128xf32> to vector<16x128xbf16>
    %83 = arith.index_cast %c1_i32 : i32 to index
    %c0_29 = arith.constant 0 : index
    %c0_30 = arith.constant 0 : index
    %84 = vector.load %arg7[%83, %c0_29, %c0_30] : memref<8x16x128xbf16, #tpu.memory_space<vmem>>, vector<1x16x128xbf16>
    %85 = vector.shape_cast %84 : vector<1x16x128xbf16> to vector<16x128xbf16>
    %86 = vector.shape_cast %82 : vector<16x128xbf16> to vector<1x16x128xbf16>
    tpu.vector_store %arg7[%83, %c0_29, %c0_30], %86 {strides = array<i32>} : memref<8x16x128xbf16, #tpu.memory_space<vmem>>, vector<1x16x128xbf16>,
    %c2_i32 = arith.constant 2 : i32
    %87 = arith.index_cast %c2_i32 : i32 to index
    %c0_31 = arith.constant 0 : index
    %c0_32 = arith.constant 0 : index
    %88 = vector.load %arg9[%87, %c0_31, %c0_32] : memref<8x16x384xf32, #tpu.memory_space<vmem>>, vector<1x16x384xf32>
    %89 = vector.shape_cast %88 : vector<1x16x384xf32> to vector<16x384xf32>
    %90 = arith.truncf %81 : vector<16x128xf32> to vector<16x128xbf16>
    %cst_33 = arith.constant dense<0.000000e+00> : vector<16x384xf32>
    %91 = tpu.matmul %90, %12, %cst_33 {dimension_numbers = #tpu.dot_dimension_numbers<[1], [0], [0], [1], [0, 0, 1, 1], [], []>} : vector<16x128xbf16>, vector<128x384xbf16>, vector<16x384xf32> -> vector<16x384xf32>
    %92 = vector.extract_strided_slice %89 {offsets = [0, 0], sizes = [16, 128], strides = [1, 1]} : vector<16x384xf32> to vector<16x128xf32>
    %93 = vector.extract_strided_slice %91 {offsets = [0, 0], sizes = [16, 128], strides = [1, 1]} : vector<16x384xf32> to vector<16x128xf32>
    %94 = arith.addf %92, %93 : vector<16x128xf32>
    %95 = arith.negf %94 : vector<16x128xf32>
    %96 = math.exp %95 : vector<16x128xf32>
    %cst_34 = arith.constant 1.000000e+00 : f32
    %97 = vector.broadcast %cst_34 : f32 to vector<16x128xf32>
    %98 = arith.addf %97, %96 : vector<16x128xf32>
    %99 = arith.divf %97, %98 : vector<16x128xf32>
    %100 = vector.extract_strided_slice %89 {offsets = [0, 128], sizes = [16, 128], strides = [1, 1]} : vector<16x384xf32> to vector<16x128xf32>
    %101 = vector.extract_strided_slice %91 {offsets = [0, 128], sizes = [16, 128], strides = [1, 1]} : vector<16x384xf32> to vector<16x128xf32>
    %102 = arith.addf %100, %101 : vector<16x128xf32>
    %103 = arith.negf %102 : vector<16x128xf32>
    %104 = math.exp %103 : vector<16x128xf32>
    %cst_35 = arith.constant 1.000000e+00 : f32
    %105 = vector.broadcast %cst_35 : f32 to vector<16x128xf32>
    %106 = arith.addf %105, %104 : vector<16x128xf32>
    %107 = arith.divf %105, %106 : vector<16x128xf32>
    %108 = vector.extract_strided_slice %89 {offsets = [0, 256], sizes = [16, 128], strides = [1, 1]} : vector<16x384xf32> to vector<16x128xf32>
    %109 = vector.extract_strided_slice %91 {offsets = [0, 256], sizes = [16, 128], strides = [1, 1]} : vector<16x384xf32> to vector<16x128xf32>
    %110 = arith.addf %109, %15 : vector<16x128xf32>
    %111 = arith.mulf %99, %110 : vector<16x128xf32>
    %112 = arith.addf %108, %111 : vector<16x128xf32>
    %113 = math.tanh %112 : vector<16x128xf32>
    %114 = arith.subf %81, %113 : vector<16x128xf32>
    %115 = arith.mulf %107, %114 : vector<16x128xf32>
    %116 = arith.addf %113, %115 : vector<16x128xf32>
    %117 = arith.truncf %116 : vector<16x128xf32> to vector<16x128xbf16>
    %118 = arith.index_cast %c2_i32 : i32 to index
    %c0_36 = arith.constant 0 : index
    %c0_37 = arith.constant 0 : index
    %119 = vector.load %arg7[%118, %c0_36, %c0_37] : memref<8x16x128xbf16, #tpu.memory_space<vmem>>, vector<1x16x128xbf16>
    %120 = vector.shape_cast %119 : vector<1x16x128xbf16> to vector<16x128xbf16>
    %121 = vector.shape_cast %117 : vector<16x128xbf16> to vector<1x16x128xbf16>
    tpu.vector_store %arg7[%118, %c0_36, %c0_37], %121 {strides = array<i32>} : memref<8x16x128xbf16, #tpu.memory_space<vmem>>, vector<1x16x128xbf16>,
    %c3_i32 = arith.constant 3 : i32
    %122 = arith.index_cast %c3_i32 : i32 to index
    %c0_38 = arith.constant 0 : index
    %c0_39 = arith.constant 0 : index
    %123 = vector.load %arg9[%122, %c0_38, %c0_39] : memref<8x16x384xf32, #tpu.memory_space<vmem>>, vector<1x16x384xf32>
    %124 = vector.shape_cast %123 : vector<1x16x384xf32> to vector<16x384xf32>
    %125 = arith.truncf %116 : vector<16x128xf32> to vector<16x128xbf16>
    %cst_40 = arith.constant dense<0.000000e+00> : vector<16x384xf32>
    %126 = tpu.matmul %125, %12, %cst_40 {dimension_numbers = #tpu.dot_dimension_numbers<[1], [0], [0], [1], [0, 0, 1, 1], [], []>} : vector<16x128xbf16>, vector<128x384xbf16>, vector<16x384xf32> -> vector<16x384xf32>
    %127 = vector.extract_strided_slice %124 {offsets = [0, 0], sizes = [16, 128], strides = [1, 1]} : vector<16x384xf32> to vector<16x128xf32>
    %128 = vector.extract_strided_slice %126 {offsets = [0, 0], sizes = [16, 128], strides = [1, 1]} : vector<16x384xf32> to vector<16x128xf32>
    %129 = arith.addf %127, %128 : vector<16x128xf32>
    %130 = arith.negf %129 : vector<16x128xf32>
    %131 = math.exp %130 : vector<16x128xf32>
    %cst_41 = arith.constant 1.000000e+00 : f32
    %132 = vector.broadcast %cst_41 : f32 to vector<16x128xf32>
    %133 = arith.addf %132, %131 : vector<16x128xf32>
    %134 = arith.divf %132, %133 : vector<16x128xf32>
    %135 = vector.extract_strided_slice %124 {offsets = [0, 128], sizes = [16, 128], strides = [1, 1]} : vector<16x384xf32> to vector<16x128xf32>
    %136 = vector.extract_strided_slice %126 {offsets = [0, 128], sizes = [16, 128], strides = [1, 1]} : vector<16x384xf32> to vector<16x128xf32>
    %137 = arith.addf %135, %136 : vector<16x128xf32>
    %138 = arith.negf %137 : vector<16x128xf32>
    %139 = math.exp %138 : vector<16x128xf32>
    %cst_42 = arith.constant 1.000000e+00 : f32
    %140 = vector.broadcast %cst_42 : f32 to vector<16x128xf32>
    %141 = arith.addf %140, %139 : vector<16x128xf32>
    %142 = arith.divf %140, %141 : vector<16x128xf32>
    %143 = vector.extract_strided_slice %124 {offsets = [0, 256], sizes = [16, 128], strides = [1, 1]} : vector<16x384xf32> to vector<16x128xf32>
    %144 = vector.extract_strided_slice %126 {offsets = [0, 256], sizes = [16, 128], strides = [1, 1]} : vector<16x384xf32> to vector<16x128xf32>
    %145 = arith.addf %144, %15 : vector<16x128xf32>
    %146 = arith.mulf %134, %145 : vector<16x128xf32>
    %147 = arith.addf %143, %146 : vector<16x128xf32>
    %148 = math.tanh %147 : vector<16x128xf32>
    %149 = arith.subf %116, %148 : vector<16x128xf32>
    %150 = arith.mulf %142, %149 : vector<16x128xf32>
    %151 = arith.addf %148, %150 : vector<16x128xf32>
    %152 = arith.truncf %151 : vector<16x128xf32> to vector<16x128xbf16>
    %153 = arith.index_cast %c3_i32 : i32 to index
    %c0_43 = arith.constant 0 : index
    %c0_44 = arith.constant 0 : index
    %154 = vector.load %arg7[%153, %c0_43, %c0_44] : memref<8x16x128xbf16, #tpu.memory_space<vmem>>, vector<1x16x128xbf16>
    %155 = vector.shape_cast %154 : vector<1x16x128xbf16> to vector<16x128xbf16>
    %156 = vector.shape_cast %152 : vector<16x128xbf16> to vector<1x16x128xbf16>
    tpu.vector_store %arg7[%153, %c0_43, %c0_44], %156 {strides = array<i32>} : memref<8x16x128xbf16, #tpu.memory_space<vmem>>, vector<1x16x128xbf16>,
    %c4_i32 = arith.constant 4 : i32
    %157 = arith.index_cast %c4_i32 : i32 to index
    %c0_45 = arith.constant 0 : index
    %c0_46 = arith.constant 0 : index
    %158 = vector.load %arg9[%157, %c0_45, %c0_46] : memref<8x16x384xf32, #tpu.memory_space<vmem>>, vector<1x16x384xf32>
    %159 = vector.shape_cast %158 : vector<1x16x384xf32> to vector<16x384xf32>
    %160 = arith.truncf %151 : vector<16x128xf32> to vector<16x128xbf16>
    %cst_47 = arith.constant dense<0.000000e+00> : vector<16x384xf32>
    %161 = tpu.matmul %160, %12, %cst_47 {dimension_numbers = #tpu.dot_dimension_numbers<[1], [0], [0], [1], [0, 0, 1, 1], [], []>} : vector<16x128xbf16>, vector<128x384xbf16>, vector<16x384xf32> -> vector<16x384xf32>
    %162 = vector.extract_strided_slice %159 {offsets = [0, 0], sizes = [16, 128], strides = [1, 1]} : vector<16x384xf32> to vector<16x128xf32>
    %163 = vector.extract_strided_slice %161 {offsets = [0, 0], sizes = [16, 128], strides = [1, 1]} : vector<16x384xf32> to vector<16x128xf32>
    %164 = arith.addf %162, %163 : vector<16x128xf32>
    %165 = arith.negf %164 : vector<16x128xf32>
    %166 = math.exp %165 : vector<16x128xf32>
    %cst_48 = arith.constant 1.000000e+00 : f32
    %167 = vector.broadcast %cst_48 : f32 to vector<16x128xf32>
    %168 = arith.addf %167, %166 : vector<16x128xf32>
    %169 = arith.divf %167, %168 : vector<16x128xf32>
    %170 = vector.extract_strided_slice %159 {offsets = [0, 128], sizes = [16, 128], strides = [1, 1]} : vector<16x384xf32> to vector<16x128xf32>
    %171 = vector.extract_strided_slice %161 {offsets = [0, 128], sizes = [16, 128], strides = [1, 1]} : vector<16x384xf32> to vector<16x128xf32>
    %172 = arith.addf %170, %171 : vector<16x128xf32>
    %173 = arith.negf %172 : vector<16x128xf32>
    %174 = math.exp %173 : vector<16x128xf32>
    %cst_49 = arith.constant 1.000000e+00 : f32
    %175 = vector.broadcast %cst_49 : f32 to vector<16x128xf32>
    %176 = arith.addf %175, %174 : vector<16x128xf32>
    %177 = arith.divf %175, %176 : vector<16x128xf32>
    %178 = vector.extract_strided_slice %159 {offsets = [0, 256], sizes = [16, 128], strides = [1, 1]} : vector<16x384xf32> to vector<16x128xf32>
    %179 = vector.extract_strided_slice %161 {offsets = [0, 256], sizes = [16, 128], strides = [1, 1]} : vector<16x384xf32> to vector<16x128xf32>
    %180 = arith.addf %179, %15 : vector<16x128xf32>
    %181 = arith.mulf %169, %180 : vector<16x128xf32>
    %182 = arith.addf %178, %181 : vector<16x128xf32>
    %183 = math.tanh %182 : vector<16x128xf32>
    %184 = arith.subf %151, %183 : vector<16x128xf32>
    %185 = arith.mulf %177, %184 : vector<16x128xf32>
    %186 = arith.addf %183, %185 : vector<16x128xf32>
    %187 = arith.truncf %186 : vector<16x128xf32> to vector<16x128xbf16>
    %188 = arith.index_cast %c4_i32 : i32 to index
    %c0_50 = arith.constant 0 : index
    %c0_51 = arith.constant 0 : index
    %189 = vector.load %arg7[%188, %c0_50, %c0_51] : memref<8x16x128xbf16, #tpu.memory_space<vmem>>, vector<1x16x128xbf16>
    %190 = vector.shape_cast %189 : vector<1x16x128xbf16> to vector<16x128xbf16>
    %191 = vector.shape_cast %187 : vector<16x128xbf16> to vector<1x16x128xbf16>
    tpu.vector_store %arg7[%188, %c0_50, %c0_51], %191 {strides = array<i32>} : memref<8x16x128xbf16, #tpu.memory_space<vmem>>, vector<1x16x128xbf16>,
    %c5_i32 = arith.constant 5 : i32
    %192 = arith.index_cast %c5_i32 : i32 to index
    %c0_52 = arith.constant 0 : index
    %c0_53 = arith.constant 0 : index
    %193 = vector.load %arg9[%192, %c0_52, %c0_53] : memref<8x16x384xf32, #tpu.memory_space<vmem>>, vector<1x16x384xf32>
    %194 = vector.shape_cast %193 : vector<1x16x384xf32> to vector<16x384xf32>
    %195 = arith.truncf %186 : vector<16x128xf32> to vector<16x128xbf16>
    %cst_54 = arith.constant dense<0.000000e+00> : vector<16x384xf32>
    %196 = tpu.matmul %195, %12, %cst_54 {dimension_numbers = #tpu.dot_dimension_numbers<[1], [0], [0], [1], [0, 0, 1, 1], [], []>} : vector<16x128xbf16>, vector<128x384xbf16>, vector<16x384xf32> -> vector<16x384xf32>
    %197 = vector.extract_strided_slice %194 {offsets = [0, 0], sizes = [16, 128], strides = [1, 1]} : vector<16x384xf32> to vector<16x128xf32>
    %198 = vector.extract_strided_slice %196 {offsets = [0, 0], sizes = [16, 128], strides = [1, 1]} : vector<16x384xf32> to vector<16x128xf32>
    %199 = arith.addf %197, %198 : vector<16x128xf32>
    %200 = arith.negf %199 : vector<16x128xf32>
    %201 = math.exp %200 : vector<16x128xf32>
    %cst_55 = arith.constant 1.000000e+00 : f32
    %202 = vector.broadcast %cst_55 : f32 to vector<16x128xf32>
    %203 = arith.addf %202, %201 : vector<16x128xf32>
    %204 = arith.divf %202, %203 : vector<16x128xf32>
    %205 = vector.extract_strided_slice %194 {offsets = [0, 128], sizes = [16, 128], strides = [1, 1]} : vector<16x384xf32> to vector<16x128xf32>
    %206 = vector.extract_strided_slice %196 {offsets = [0, 128], sizes = [16, 128], strides = [1, 1]} : vector<16x384xf32> to vector<16x128xf32>
    %207 = arith.addf %205, %206 : vector<16x128xf32>
    %208 = arith.negf %207 : vector<16x128xf32>
    %209 = math.exp %208 : vector<16x128xf32>
    %cst_56 = arith.constant 1.000000e+00 : f32
    %210 = vector.broadcast %cst_56 : f32 to vector<16x128xf32>
    %211 = arith.addf %210, %209 : vector<16x128xf32>
    %212 = arith.divf %210, %211 : vector<16x128xf32>
    %213 = vector.extract_strided_slice %194 {offsets = [0, 256], sizes = [16, 128], strides = [1, 1]} : vector<16x384xf32> to vector<16x128xf32>
    %214 = vector.extract_strided_slice %196 {offsets = [0, 256], sizes = [16, 128], strides = [1, 1]} : vector<16x384xf32> to vector<16x128xf32>
    %215 = arith.addf %214, %15 : vector<16x128xf32>
    %216 = arith.mulf %204, %215 : vector<16x128xf32>
    %217 = arith.addf %213, %216 : vector<16x128xf32>
    %218 = math.tanh %217 : vector<16x128xf32>
    %219 = arith.subf %186, %218 : vector<16x128xf32>
    %220 = arith.mulf %212, %219 : vector<16x128xf32>
    %221 = arith.addf %218, %220 : vector<16x128xf32>
    %222 = arith.truncf %221 : vector<16x128xf32> to vector<16x128xbf16>
    %223 = arith.index_cast %c5_i32 : i32 to index
    %c0_57 = arith.constant 0 : index
    %c0_58 = arith.constant 0 : index
    %224 = vector.load %arg7[%223, %c0_57, %c0_58] : memref<8x16x128xbf16, #tpu.memory_space<vmem>>, vector<1x16x128xbf16>
    %225 = vector.shape_cast %224 : vector<1x16x128xbf16> to vector<16x128xbf16>
    %226 = vector.shape_cast %222 : vector<16x128xbf16> to vector<1x16x128xbf16>
    tpu.vector_store %arg7[%223, %c0_57, %c0_58], %226 {strides = array<i32>} : memref<8x16x128xbf16, #tpu.memory_space<vmem>>, vector<1x16x128xbf16>,
    %c6_i32 = arith.constant 6 : i32
    %227 = arith.index_cast %c6_i32 : i32 to index
    %c0_59 = arith.constant 0 : index
    %c0_60 = arith.constant 0 : index
    %228 = vector.load %arg9[%227, %c0_59, %c0_60] : memref<8x16x384xf32, #tpu.memory_space<vmem>>, vector<1x16x384xf32>
    %229 = vector.shape_cast %228 : vector<1x16x384xf32> to vector<16x384xf32>
    %230 = arith.truncf %221 : vector<16x128xf32> to vector<16x128xbf16>
    %cst_61 = arith.constant dense<0.000000e+00> : vector<16x384xf32>
    %231 = tpu.matmul %230, %12, %cst_61 {dimension_numbers = #tpu.dot_dimension_numbers<[1], [0], [0], [1], [0, 0, 1, 1], [], []>} : vector<16x128xbf16>, vector<128x384xbf16>, vector<16x384xf32> -> vector<16x384xf32>
    %232 = vector.extract_strided_slice %229 {offsets = [0, 0], sizes = [16, 128], strides = [1, 1]} : vector<16x384xf32> to vector<16x128xf32>
    %233 = vector.extract_strided_slice %231 {offsets = [0, 0], sizes = [16, 128], strides = [1, 1]} : vector<16x384xf32> to vector<16x128xf32>
    %234 = arith.addf %232, %233 : vector<16x128xf32>
    %235 = arith.negf %234 : vector<16x128xf32>
    %236 = math.exp %235 : vector<16x128xf32>
    %cst_62 = arith.constant 1.000000e+00 : f32
    %237 = vector.broadcast %cst_62 : f32 to vector<16x128xf32>
    %238 = arith.addf %237, %236 : vector<16x128xf32>
    %239 = arith.divf %237, %238 : vector<16x128xf32>
    %240 = vector.extract_strided_slice %229 {offsets = [0, 128], sizes = [16, 128], strides = [1, 1]} : vector<16x384xf32> to vector<16x128xf32>
    %241 = vector.extract_strided_slice %231 {offsets = [0, 128], sizes = [16, 128], strides = [1, 1]} : vector<16x384xf32> to vector<16x128xf32>
    %242 = arith.addf %240, %241 : vector<16x128xf32>
    %243 = arith.negf %242 : vector<16x128xf32>
    %244 = math.exp %243 : vector<16x128xf32>
    %cst_63 = arith.constant 1.000000e+00 : f32
    %245 = vector.broadcast %cst_63 : f32 to vector<16x128xf32>
    %246 = arith.addf %245, %244 : vector<16x128xf32>
    %247 = arith.divf %245, %246 : vector<16x128xf32>
    %248 = vector.extract_strided_slice %229 {offsets = [0, 256], sizes = [16, 128], strides = [1, 1]} : vector<16x384xf32> to vector<16x128xf32>
    %249 = vector.extract_strided_slice %231 {offsets = [0, 256], sizes = [16, 128], strides = [1, 1]} : vector<16x384xf32> to vector<16x128xf32>
    %250 = arith.addf %249, %15 : vector<16x128xf32>
    %251 = arith.mulf %239, %250 : vector<16x128xf32>
    %252 = arith.addf %248, %251 : vector<16x128xf32>
    %253 = math.tanh %252 : vector<16x128xf32>
    %254 = arith.subf %221, %253 : vector<16x128xf32>
    %255 = arith.mulf %247, %254 : vector<16x128xf32>
    %256 = arith.addf %253, %255 : vector<16x128xf32>
    %257 = arith.truncf %256 : vector<16x128xf32> to vector<16x128xbf16>
    %258 = arith.index_cast %c6_i32 : i32 to index
    %c0_64 = arith.constant 0 : index
    %c0_65 = arith.constant 0 : index
    %259 = vector.load %arg7[%258, %c0_64, %c0_65] : memref<8x16x128xbf16, #tpu.memory_space<vmem>>, vector<1x16x128xbf16>
    %260 = vector.shape_cast %259 : vector<1x16x128xbf16> to vector<16x128xbf16>
    %261 = vector.shape_cast %257 : vector<16x128xbf16> to vector<1x16x128xbf16>
    tpu.vector_store %arg7[%258, %c0_64, %c0_65], %261 {strides = array<i32>} : memref<8x16x128xbf16, #tpu.memory_space<vmem>>, vector<1x16x128xbf16>,
    %c7_i32 = arith.constant 7 : i32
    %262 = arith.index_cast %c7_i32 : i32 to index
    %c0_66 = arith.constant 0 : index
    %c0_67 = arith.constant 0 : index
    %263 = vector.load %arg9[%262, %c0_66, %c0_67] : memref<8x16x384xf32, #tpu.memory_space<vmem>>, vector<1x16x384xf32>
    %264 = vector.shape_cast %263 : vector<1x16x384xf32> to vector<16x384xf32>
    %265 = arith.truncf %256 : vector<16x128xf32> to vector<16x128xbf16>
    %cst_68 = arith.constant dense<0.000000e+00> : vector<16x384xf32>
    %266 = tpu.matmul %265, %12, %cst_68 {dimension_numbers = #tpu.dot_dimension_numbers<[1], [0], [0], [1], [0, 0, 1, 1], [], []>} : vector<16x128xbf16>, vector<128x384xbf16>, vector<16x384xf32> -> vector<16x384xf32>
    %267 = vector.extract_strided_slice %264 {offsets = [0, 0], sizes = [16, 128], strides = [1, 1]} : vector<16x384xf32> to vector<16x128xf32>
    %268 = vector.extract_strided_slice %266 {offsets = [0, 0], sizes = [16, 128], strides = [1, 1]} : vector<16x384xf32> to vector<16x128xf32>
    %269 = arith.addf %267, %268 : vector<16x128xf32>
    %270 = arith.negf %269 : vector<16x128xf32>
    %271 = math.exp %270 : vector<16x128xf32>
    %cst_69 = arith.constant 1.000000e+00 : f32
    %272 = vector.broadcast %cst_69 : f32 to vector<16x128xf32>
    %273 = arith.addf %272, %271 : vector<16x128xf32>
    %274 = arith.divf %272, %273 : vector<16x128xf32>
    %275 = vector.extract_strided_slice %264 {offsets = [0, 128], sizes = [16, 128], strides = [1, 1]} : vector<16x384xf32> to vector<16x128xf32>
    %276 = vector.extract_strided_slice %266 {offsets = [0, 128], sizes = [16, 128], strides = [1, 1]} : vector<16x384xf32> to vector<16x128xf32>
    %277 = arith.addf %275, %276 : vector<16x128xf32>
    %278 = arith.negf %277 : vector<16x128xf32>
    %279 = math.exp %278 : vector<16x128xf32>
    %cst_70 = arith.constant 1.000000e+00 : f32
    %280 = vector.broadcast %cst_70 : f32 to vector<16x128xf32>
    %281 = arith.addf %280, %279 : vector<16x128xf32>
    %282 = arith.divf %280, %281 : vector<16x128xf32>
    %283 = vector.extract_strided_slice %264 {offsets = [0, 256], sizes = [16, 128], strides = [1, 1]} : vector<16x384xf32> to vector<16x128xf32>
    %284 = vector.extract_strided_slice %266 {offsets = [0, 256], sizes = [16, 128], strides = [1, 1]} : vector<16x384xf32> to vector<16x128xf32>
    %285 = arith.addf %284, %15 : vector<16x128xf32>
    %286 = arith.mulf %274, %285 : vector<16x128xf32>
    %287 = arith.addf %283, %286 : vector<16x128xf32>
    %288 = math.tanh %287 : vector<16x128xf32>
    %289 = arith.subf %256, %288 : vector<16x128xf32>
    %290 = arith.mulf %282, %289 : vector<16x128xf32>
    %291 = arith.addf %288, %290 : vector<16x128xf32>
    %292 = arith.truncf %291 : vector<16x128xf32> to vector<16x128xbf16>
    %293 = arith.index_cast %c7_i32 : i32 to index
    %c0_71 = arith.constant 0 : index
    %c0_72 = arith.constant 0 : index
    %294 = vector.load %arg7[%293, %c0_71, %c0_72] : memref<8x16x128xbf16, #tpu.memory_space<vmem>>, vector<1x16x128xbf16>
    %295 = vector.shape_cast %294 : vector<1x16x128xbf16> to vector<16x128xbf16>
    %296 = vector.shape_cast %292 : vector<16x128xbf16> to vector<1x16x128xbf16>
    tpu.vector_store %arg7[%293, %c0_71, %c0_72], %296 {strides = array<i32>} : memref<8x16x128xbf16, #tpu.memory_space<vmem>>, vector<1x16x128xbf16>,
    %c8_i32 = arith.constant 8 : i32
    %c0_73 = arith.constant 0 : index
    %c0_74 = arith.constant 0 : index
    %297 = vector.load %arg8[%c0_73, %c0_74] : memref<16x128xf32, #tpu.memory_space<vmem>>, vector<16x128xf32>
    tpu.vector_store %arg8[%c0_73, %c0_74], %291 {strides = array<i32>} : memref<16x128xf32, #tpu.memory_space<vmem>>, vector<16x128xf32>,
    return
  }
  func.func @transform_0(%arg0: i32, %arg1: i32) -> (i32, i32, i32) {
    %c0_i32 = arith.constant 0 : i32
    %c0_i32_0 = arith.constant 0 : i32
    return %arg1, %arg0, %c0_i32 : i32, i32, i32
  }
  func.func @transform_1(%arg0: i32, %arg1: i32) -> (i32, i32) {
    %c0_i32 = arith.constant 0 : i32
    %c0_i32_0 = arith.constant 0 : i32
    %c0_i32_1 = arith.constant 0 : i32
    return %c0_i32, %c0_i32_0 : i32, i32
  }
  func.func @transform_2(%arg0: i32, %arg1: i32) -> (i32, i32) {
    %c0_i32 = arith.constant 0 : i32
    %c0_i32_0 = arith.constant 0 : i32
    %c0_i32_1 = arith.constant 0 : i32
    return %c0_i32, %c0_i32_0 : i32, i32
  }
  func.func @transform_3(%arg0: i32, %arg1: i32) -> (i32, i32) {
    %c0_i32 = arith.constant 0 : i32
    %c0_i32_0 = arith.constant 0 : i32
    %c0_i32_1 = arith.constant 0 : i32
    return %c0_i32, %c0_i32_0 : i32, i32
  }
  func.func @transform_4(%arg0: i32, %arg1: i32) -> (i32, i32) {
    %c0_i32 = arith.constant 0 : i32
    %c0_i32_0 = arith.constant 0 : i32
    %c0_i32_1 = arith.constant 0 : i32
    return %c0_i32, %c0_i32_0 : i32, i32
  }
  func.func @transform_5(%arg0: i32, %arg1: i32) -> (i32, i32, i32) {
    %c0_i32 = arith.constant 0 : i32
    %c0_i32_0 = arith.constant 0 : i32
    return %arg1, %arg0, %c0_i32 : i32, i32, i32
  }
}

</mosaic_0001>

<bundles_post_ra>
// kernel: tpu_custom_call.1
= control target key start
LH: loop header
LB: loop body
LE: loop exit
PB: predicated region body
PF: predicated region fallthrough
CT: control target
= control target key end

     0   :  { %10 = vsyncpa [#allocation5], 0  ;;  %s3325_s0 = inlined_call_operand.hbm [shape: bf16[8,16,128], index: 0, kind: input, shape index: {}]   ;;  %s3326_s1 = inlined_call_operand.hbm [shape: bf16[128,384], index: 1, kind: input, shape index: {}]   ;;  %s3327_s2 = inlined_call_operand.hbm [shape: bf16[128,384], index: 2, kind: input, shape index: {}]   ;;  %s3328_s3 = inlined_call_operand.hbm [shape: f32[1,384], index: 3, kind: input, shape index: {}]   ;;  %s3329_s4 = inlined_call_operand.vmem [shape: f32[1,128], index: 4, kind: input, shape index: {}]   ;;  %s3330_s5 = inlined_call_operand.hbm [shape: bf16[8,16,128], index: 5, kind: output, shape index: {}]  }
   0x1   :  { %11 = vsyncpa [#allocation8], 0 }
   0x2   :  { %12 = vsyncpa [#allocation11], 0  ;;  %s31_s20 = sshll.u32 %s3326_s1, 4  ;;  %s32_s20 = int_to_ptr.hbm [resolvable:$true] %s31_s20 }
   0x3   :  { %13 = vsyncpa [#allocation6], 0  ;;  %s2581_s21 = smov [#allocation7]   ;;  %s18_s25 = sshll.u32 %s3325_s0, 4  ;;  %s19_s25 = int_to_ptr.hbm [resolvable:$true] %s18_s25 }
   0x4   :  { %s33_s22 = sshll.u32 %s2581_s21, 4  ;;  %s2582_s26 = smov 192   ;;  %s34_s22 = int_to_ptr.vmem [resolvable:$true] %s33_s22 }
   0x5   :  { %s2583_s27 = smov 12   ;;  %s2584_s28 = smov [#allocation4]  }
   0x6   :  { %39 = dma.hbm_to_vmem [thread:$0]  %s32_s20, 3072, %s34_s22, [#allocation8], %s2582_s26, %s2582_s26, %s2583_s27  }
   0x7   :  { %s20_s29 = sshll.u32 %s2584_s28, 4  ;;  %s2585_s30 = smov 64   ;;  %s21_s29 = int_to_ptr.vmem [resolvable:$true] %s20_s29 }
   0x8   :  { %s2586_s6 = smov 4   ;;  %s44_s8 = sshll.u32 %s3327_s2, 4  ;;  %s45_s8 = int_to_ptr.hbm [resolvable:$true] %s44_s8 }
   0x9   :  { %26 = dma.hbm_to_vmem [thread:$0]  %s19_s25, 1024, %s21_s29, [#allocation5], %s2585_s30, %s2585_s30, %s2586_s6  }
   0xa   :  { %s2587_s9 = smov [#allocation9]   ;;  %s58_s12 = sshll.u32 %s3328_s3, 4  ;;  %s59_s12 = int_to_ptr.hbm [resolvable:$true] %s58_s12 }
   0xb   :  { %s46_s0 = sshll.u32 %s2587_s9, 4  ;;  %s2588_s13 = smov [#allocation10]   ;;  %s47_s0 = int_to_ptr.vmem [resolvable:$true] %s46_s0 }
   0xc   :  { %52 = dma.hbm_to_vmem [thread:$0]  %s45_s8, 3072, %s47_s0, [#allocation8], %s2582_s26, %s2582_s26, %s2583_s27  }
   0xd   :  { %s60_s14 = sshll.u32 %s2588_s13, 4  ;;  %s61_s14 = int_to_ptr.vmem [resolvable:$true] %s60_s14 }
   0xe   :  { %63 = dma.hbm_to_vmem [thread:$0]  %s59_s12, 48, %s61_s14, [#allocation11]  }
   0xf   :  { %2573 = dma.done.wait [#allocation5], 1024  }
  0x10   :  { %2574 = vsyncadd [#allocation5], 4294966272 }
  0x11   :  { %2575 = dma.done.wait [#allocation8], 6144  }
  0x12   :  { %2576 = vsyncadd [#allocation8], 4294961152 }
  0x13   :  { %2577 = dma.done.wait [#allocation11], 48  }
  0x14   :  { %2578 = vsyncadd [#allocation11], 4294967248  ;;  %v2143_v0 = vld [vmem:[#allocation9 + $0xa8] sm:$0xf]  ;;  %v2239_v1 = vld [vmem:[#allocation9 + $0xb0] sm:$0xf0] }
  0x15   :  { %v2131_v2 = vld [vmem:[#allocation9 + $0x90] sm:$0xf]  ;;  %v2636_v3 = vor.u32 %v2239_v1, %v2143_v0  ;;  %v2236_v4 = vld [vmem:[#allocation9 + $0x98] sm:$0xf0]  ;;  %v2047_v5 = vld [vmem:[#allocation7 + $0xa8] sm:$0xf] }
  0x16   :  { %v2215_v6 = vld [vmem:[#allocation7 + $0xb0] sm:$0xf0]  ;;  %v2639_v7 = vor.u32 %v2236_v4, %v2131_v2  ;;  %v2035_v9 = vld [vmem:[#allocation7 + $0x90] sm:$0xf]  ;;  %v2212_v10 = vld [vmem:[#allocation7 + $0x98] sm:$0xf0] }
  0x17   :  { %688 = vmatpush.bf16.msra.mxu3 %v2636_v3  ;;  %v2048_v8 = vor.u32 %v2215_v6, %v2047_v5  ;;  %v2119_v11 = vld [vmem:[#allocation9 + $0x78] sm:$0xf]  ;;  %v2233_v12 = vld [vmem:[#allocation9 + $0x80] sm:$0xf0]  ;;  %v2036_v13 = vor.u32 %v2212_v10, %v2035_v9  ;;  %v2107_v17 = vld [vmem:[#allocation9 + $0x60] sm:$0xf] }
  0x18   :  { %v2023_v14 = vld [vmem:[#allocation7 + $0x78] sm:$0xf]  ;;  %v2209_v15 = vld [vmem:[#allocation7 + $0x80] sm:$0xf0]  ;;  %v2642_v16 = vor.u32 %v2233_v12, %v2119_v11  ;;  %v2230_v18 = vld [vmem:[#allocation9 + $0x68] sm:$0xf0] }
  0x19   :  { %320 = vmatpush.bf16.msra.mxu0 %v2048_v8  ;;  %v2024_v19 = vor.u32 %v2209_v15, %v2023_v14  ;;  %v2011_v20 = vld [vmem:[#allocation7 + $0x60] sm:$0xf]  ;;  %v2206_v21 = vld [vmem:[#allocation7 + $0x68] sm:$0xf0]  ;;  %v2645_v23 = vor.u32 %v2230_v18, %v2107_v17  ;;  %v2049_v24 = vld [vmem:[#allocation7 + $0xb4] sm:$0xf0] }
  0x1a   :  { %v2214_v22 = vld [vmem:[#allocation7 + $0xac] sm:$0xf]  ;;  %v2095_v25 = vld [vmem:[#allocation9 + $0x48] sm:$0xf]  ;;  %v2227_v26 = vld [vmem:[#allocation9 + $0x50] sm:$0xf0]  ;;  %v2012_v28 = vor.u32 %v2206_v21, %v2011_v20 }
  0x1b   :  { %689 = vmatpush.bf16.msra.mxu3 %v2639_v7  ;;  %v2052_v27 = vor.u32 %v2214_v22, %v2049_v24  ;;  %v2211_v29 = vld [vmem:[#allocation7 + $0x94] sm:$0xf]  ;;  %v2037_v30 = vld [vmem:[#allocation7 + $0x9c] sm:$0xf0]  ;;  %v1999_v31 = vld [vmem:[#allocation7 + $0x48] sm:$0xf]  ;;  %v2648_v34 = vor.u32 %v2227_v26, %v2095_v25 }
  0x1c   :  { %v2203_v32 = vld [vmem:[#allocation7 + $0x50] sm:$0xf0]  ;;  %v2040_v33 = vor.u32 %v2211_v29, %v2037_v30  ;;  %v2208_v35 = vld [vmem:[#allocation7 + $0x7c] sm:$0xf]  ;;  %v2025_v36 = vld [vmem:[#allocation7 + $0x84] sm:$0xf0] }
  0x1d   :  { %321 = vmatpush.bf16.msra.mxu0 %v2036_v13  ;;  %369 = vmatpush.bf16.msra.mxu1 %v2052_v27  ;;  %v2083_v37 = vld [vmem:[#allocation9 + $0x30] sm:$0xf]  ;;  %v2224_v38 = vld [vmem:[#allocation9 + $0x38] sm:$0xf0]  ;;  %v2000_v39 = vor.u32 %v2203_v32, %v1999_v31  ;;  %v2028_v42 = vor.u32 %v2208_v35, %v2025_v36  ;;  %v2071_v44 = vld [vmem:[#allocation9 + $0x18] sm:$0xf] }
  0x1e   :  { %v1987_v40 = vld [vmem:[#allocation7 + $0x30] sm:$0xf]  ;;  %v2200_v41 = vld [vmem:[#allocation7 + $0x38] sm:$0xf0]  ;;  %v2651_v43 = vor.u32 %v2224_v38, %v2083_v37  ;;  %v2205_v45 = vld [vmem:[#allocation7 + $0x64] sm:$0xf] }
  0x1f   :  { %690 = vmatpush.bf16.msra.mxu3 %v2642_v16  ;;  %v2013_v46 = vld [vmem:[#allocation7 + $0x6c] sm:$0xf0]  ;;  %v2221_v47 = vld [vmem:[#allocation9 + $0x20] sm:$0xf0]  ;;  %v2216_v49 = vld [vmem:[#allocation7 + $0xb8] sm:$0xf0]  ;;  %v1988_v50 = vor.u32 %v2200_v41, %v1987_v40 }
  0x20   :  { %v2055_v48 = vld [vmem:[#allocation7 + $0xb0] sm:$0xf]  ;;  %v1975_v52 = vld [vmem:[#allocation7 + $0x18] sm:$0xf]  ;;  %v2197_v53 = vld [vmem:[#allocation7 + $0x20] sm:$0xf0]  ;;  %v2016_v54 = vor.u32 %v2205_v45, %v2013_v46  ;;  %v2654_v55 = vor.u32 %v2221_v47, %v2071_v44 }
  0x21   :  { %322 = vmatpush.bf16.msra.mxu0 %v2024_v19  ;;  %370 = vmatpush.bf16.msra.mxu1 %v2040_v33  ;;  %v2056_v51 = vor.u32 %v2216_v49, %v2055_v48  ;;  %v2059_v56 = vld [vmem:[#allocation9] sm:$0xf]  ;;  %v2202_v57 = vld [vmem:[#allocation7 + $0x4c] sm:$0xf]  ;;  %v2001_v58 = vld [vmem:[#allocation7 + $0x54] sm:$0xf0]  ;;  %v1976_v0 = vor.u32 %v2197_v53, %v1975_v52 }
  0x22   :  { %v2218_v59 = vld [vmem:[#allocation9 + $0x8] sm:$0xf0]  ;;  %v2043_v60 = vld [vmem:[#allocation7 + $0x98] sm:$0xf]  ;;  %v2213_v61 = vld [vmem:[#allocation7 + $0xa0] sm:$0xf0]  ;;  %v2004_v5 = vor.u32 %v2202_v57, %v2001_v58 }
  0x23   :  { %691 = vmatpush.bf16.msra.mxu3 %v2645_v23  ;;  %418 = vmatpush.bf16.msra.mxu2 %v2056_v51  ;;  %v2238_v62 = vld [vmem:[#allocation9 + $0xac] sm:$0xf]  ;;  %v2145_v63 = vld [vmem:[#allocation9 + $0xb4] sm:$0xf0]  ;;  %v2044_v1 = vor.u32 %v2213_v61, %v2043_v60  ;;  %v1963_v2 = vld [vmem:[#allocation7] sm:$0xf]  ;;  %v2657_v6 = vor.u32 %v2218_v59, %v2059_v56 }
  0x24   :  { %v2194_v4 = vld [vmem:[#allocation7 + $0x8] sm:$0xf0]  ;;  %v2199_v8 = vld [vmem:[#allocation7 + $0x34] sm:$0xf]  ;;  %v1989_v9 = vld [vmem:[#allocation7 + $0x3c] sm:$0xf0]  ;;  %v2659_v10 = vor.u32 %v2238_v62, %v2145_v63 }
  0x25   :  { %323 = vmatpush.bf16.msra.mxu0 %v2012_v28  ;;  %371 = vmatpush.bf16.msra.mxu1 %v2028_v42  ;;  %v2031_v11 = vld [vmem:[#allocation7 + $0x80] sm:$0xf]  ;;  %v2210_v12 = vld [vmem:[#allocation7 + $0x88] sm:$0xf0]  ;;  %v2235_v13 = vld [vmem:[#allocation9 + $0x94] sm:$0xf]  ;;  %v1964_v15 = vor.u32 %v2194_v4, %v1963_v2  ;;  %v1992_v18 = vor.u32 %v2199_v8, %v1989_v9 }
  0x26   :  { %v2133_v14 = vld [vmem:[#allocation9 + $0x9c] sm:$0xf0]  ;;  %v2032_v17 = vor.u32 %v2210_v12, %v2031_v11  ;;  %v2196_v19 = vld [vmem:[#allocation7 + $0x1c] sm:$0xf]  ;;  %v1977_v20 = vld [vmem:[#allocation7 + $0x24] sm:$0xf0] }
  0x27   :  { %692 = vmatpush.bf16.msra.mxu3 %v2648_v34  ;;  %419 = vmatpush.bf16.msra.mxu2 %v2044_v1  ;;  %v2663_v21 = vor.u32 %v2235_v13, %v2133_v14  ;;  %v2665_v22 = vld [vmem:[#allocation4] sm:$0xff]  ;;  %v2019_v24 = vld [vmem:[#allocation7 + $0x68] sm:$0xf]  ;;  %v2207_v25 = vld [vmem:[#allocation7 + $0x70] sm:$0xf0]  ;;  %v2589_v29 = vmov 0.0|0.0   ;;  %v1980_v30 = vor.u32 %v2196_v19, %v1977_v20 }
  0x28   :  { %v2232_v26 = vld [vmem:[#allocation9 + $0x7c] sm:$0xf]  ;;  %v2121_v27 = vld [vmem:[#allocation9 + $0x84] sm:$0xf0]  ;;  %v2020_v28 = vor.u32 %v2207_v25, %v2019_v24  ;;  %v2193_v31 = vld [vmem:[#allocation7 + $0x4] sm:$0xf] }
  0x29   :  { %324 = vmatpush.bf16.msra.mxu0 %v2000_v39  ;;  %372 = vmatpush.bf16.msra.mxu1 %v2016_v54  ;;  %v1965_v32 = vld [vmem:[#allocation7 + $0xc] sm:$0xf0]  ;;  %v2670_v33 = vor.u32 %v2232_v26, %v2121_v27  ;;  %v2204_v36 = vld [vmem:[#allocation7 + $0x58] sm:$0xf0]  ;;  %v2229_v37 = vld [vmem:[#allocation9 + $0x64] sm:$0xf] }
  0x2a   :  { %v2007_v35 = vld [vmem:[#allocation7 + $0x50] sm:$0xf]  ;;  %v2240_v41 = vld [vmem:[#allocation9 + $0xb8] sm:$0xf0]  ;;  %v1968_v42 = vor.u32 %v2193_v31, %v1965_v32  ;;  %v1995_v45 = vld [vmem:[#allocation7 + $0x38] sm:$0xf] }
  0x2b   :  { %693 = vmatpush.bf16.msra.mxu3 %v2651_v43  ;;  %420 = vmatpush.bf16.msra.mxu2 %v2032_v17  ;;  %v2109_v38 = vld [vmem:[#allocation9 + $0x6c] sm:$0xf0]  ;;  %v2008_v39 = vor.u32 %v2204_v36, %v2007_v35  ;;  %v2201_v46 = vld [vmem:[#allocation7 + $0x40] sm:$0xf0]  ;;  %v2226_v47 = vld [vmem:[#allocation9 + $0x4c] sm:$0xf] }
  0x2c   :  { %v2151_v40 = vld [vmem:[#allocation9 + $0xb0] sm:$0xf]  ;;  %v2675_v44 = vor.u32 %v2229_v37, %v2109_v38  ;;  %v2097_v48 = vld [vmem:[#allocation9 + $0x54] sm:$0xf0]  ;;  %v2237_v52 = vld [vmem:[#allocation9 + $0xa0] sm:$0xf0] }
  0x2d   :  { %325 = vmatpush.bf16.msra.mxu0 %v1988_v50  ;;  %373 = vmatpush.bf16.msra.mxu1 %v2004_v5  ;;  %v2677_v49 = vor.u32 %v2240_v41, %v2151_v40  ;;  %v1996_v50 = vor.u32 %v2201_v46, %v1995_v45  ;;  %v2139_v51 = vld [vmem:[#allocation9 + $0x98] sm:$0xf]  ;;  %v2681_v53 = vor.u32 %v2226_v47, %v2097_v48  ;;  %v1983_v54 = vld [vmem:[#allocation7 + $0x20] sm:$0xf]  ;;  %v2198_v56 = vld [vmem:[#allocation7 + $0x28] sm:$0xf0] }
  0x2e   :  { %v2223_v57 = vld [vmem:[#allocation9 + $0x34] sm:$0xf]  ;;  %v2085_v58 = vld [vmem:[#allocation9 + $0x3c] sm:$0xf0]  ;;  %v2684_v59 = vor.u32 %v2237_v52, %v2139_v51  ;;  %v1984_v60 = vor.u32 %v2198_v56, %v1983_v54  ;;  %v2234_v62 = vld [vmem:[#allocation9 + $0x88] sm:$0xf0] }
  0x2f   :  { %694 = vmatpush.bf16.msra.mxu3 %v2654_v55  ;;  %421 = vmatpush.bf16.msra.mxu2 %v2020_v28  ;;  %v2127_v61 = vld [vmem:[#allocation9 + $0x80] sm:$0xf]  ;;  %v2689_v63 = vor.u32 %v2223_v57, %v2085_v58  ;;  %v2195_v1 = vld [vmem:[#allocation7 + $0x10] sm:$0xf0]  ;;  %v2220_v2 = vld [vmem:[#allocation9 + $0x1c] sm:$0xf] }
  0x30   :  { %v2073_v4 = vld [vmem:[#allocation9 + $0x24] sm:$0xf0]  ;;  %v2692_v5 = vor.u32 %v2234_v62, %v2127_v61  ;;  %v2231_v11 = vld [vmem:[#allocation9 + $0x70] sm:$0xf0]  ;;  %v2217_v13 = vld [vmem:[#allocation9 + $0x4] sm:$0xf] }
  0x31   :  { %326 = vmatpush.bf16.msra.mxu0 %v1976_v0  ;;  %374 = vmatpush.bf16.msra.mxu1 %v1992_v18  ;;  %v1971_v0 = vld [vmem:[#allocation7 + $0x8] sm:$0xf]  ;;  %v2696_v12 = vor.u32 %v2220_v2, %v2073_v4  ;;  %v2061_v14 = vld [vmem:[#allocation9 + $0xc] sm:$0xf0]  ;;  %v2228_v18 = vld [vmem:[#allocation9 + $0x58] sm:$0xf0] }
  0x32   :  { %v1972_v8 = vor.u32 %v2195_v1, %v1971_v0  ;;  %v2115_v9 = vld [vmem:[#allocation9 + $0x68] sm:$0xf]  ;;  %v2103_v17 = vld [vmem:[#allocation9 + $0x50] sm:$0xf]  ;;  %v2705_v19 = vor.u32 %v2217_v13, %v2061_v14  ;;  %v2091_v24 = vld [vmem:[#allocation9 + $0x38] sm:$0xf] }
  0x33   :  { %695 = vmatpush.bf16.msra.mxu3 %v2657_v6  ;;  %422 = vmatpush.bf16.msra.mxu2 %v2008_v39  ;;  %v2708_v20 = vor.u32 %v2228_v18, %v2103_v17  ;;  %v2225_v25 = vld [vmem:[#allocation9 + $0x40] sm:$0xf0]  ;;  %v2186_v26 = vld [vmem:[#allocation4 + $0x8] sm:$0xff]  ;;  %v2079_v27 = vld [vmem:[#allocation9 + $0x20] sm:$0xf]  ;;  %s1914_s20 = sshll.u32 %s3330_s5, 4  ;;  %s1915_s20 = int_to_ptr.hbm [resolvable:$true] %s1914_s20 }
  0x34   :  { %v2222_v28 = vld [vmem:[#allocation9 + $0x28] sm:$0xf0]  ;;  %v2067_v31 = vld [vmem:[#allocation9 + $0x8] sm:$0xf]  ;;  %v2219_v32 = vld [vmem:[#allocation9 + $0x10] sm:$0xf0] }
  0x35   :  { %327 = vmatpush.bf16.msra.mxu0 %v1964_v15  ;;  %375 = vmatpush.bf16.msra.mxu1 %v1980_v30  ;;  %v2699_v15 = vor.u32 %v2231_v11, %v2115_v9  ;;  %v2722_v30 = vor.u32 %v2222_v28, %v2079_v27  ;;  %v2728_v35 = vor.u32 %v2219_v32, %v2067_v31  ;;  %v2187_v36 = vld [vmem:[#allocation4 + $0x10] sm:$0xff]  ;;  %v2189_v37 = vld [vmem:[#allocation4 + $0x20] sm:$0xff]  ;;  %v2190_v45 = vld [vmem:[#allocation4 + $0x28] sm:$0xff] }
  0x36   :  { %696 = vmatmul.bf16.vlgmr.msra.gmra.mxu3 %v2589_v29  ;;  %v2780_v38 = vld [vmem:[#allocation10] sm:$0x7]  ;;  %v2191_v61 = vld [vmem:[#allocation4 + $0x30] sm:$0xff] }
  0x37   :  { %702 = vmatpush.bf16.msrb.mxu3 %v2659_v10  ;;  %423 = vmatpush.bf16.msra.mxu2 %v1996_v50  ;;  %v2783_v40 = vperm.slane %v2780_v38, 0  ;;  %v2788_v56 = vperm.slane %v2780_v38, 1 }
  0x38   :  { %328 = vmatmul.bf16.vlgmr.msra.gmra.mxu0 %v2665_v22 }
  0x39   :  { %855 = vmatpush.bf16.msrb.mxu0 %v2659_v10  ;;  %376 = vmatpush.bf16.msra.mxu1 %v1968_v42 }
  0x3b   :  { %703 = vmatpush.bf16.msrb.mxu3 %v2663_v21  ;;  %424 = vmatpush.bf16.msra.mxu2 %v1984_v60 }
  0x3c   :  { %377 = vmatmul.bf16.vlgmr.msra.gmra.mxu1 %v2665_v22 }
  0x3d   :  { %856 = vmatpush.bf16.msrb.mxu0 %v2663_v21  ;;  %869 = vmatpush.bf16.msrb.mxu1 %v2677_v49 }
  0x3f   :  { %704 = vmatpush.bf16.msrb.mxu3 %v2670_v33  ;;  %425 = vmatpush.bf16.msra.mxu2 %v1972_v8 }
  0x41   :  { %857 = vmatpush.bf16.msrb.mxu0 %v2670_v33  ;;  %870 = vmatpush.bf16.msrb.mxu1 %v2684_v59 }
  0x42   :  { %426 = vmatmul.bf16.vlgmr.msra.gmra.mxu2 %v2665_v22  ;;  %v2715_v22 = vor.u32 %v2225_v25, %v2091_v24 }
  0x43   :  { %705 = vmatpush.bf16.msrb.mxu3 %v2675_v44  ;;  %995 = vmatpush.bf16.msrb.mxu2 %v2636_v3 }
  0x45   :  { %858 = vmatpush.bf16.msrb.mxu0 %v2675_v44  ;;  %871 = vmatpush.bf16.msrb.mxu1 %v2692_v5 }
  0x47   :  { %706 = vmatpush.bf16.msrb.mxu3 %v2681_v53  ;;  %996 = vmatpush.bf16.msrb.mxu2 %v2639_v7 }
  0x48   :  { %333 = vmatmul.bf16.gmra.mxu0 %v2186_v26 }
  0x49   :  { %859 = vmatpush.bf16.msrb.mxu0 %v2681_v53  ;;  %872 = vmatpush.bf16.msrb.mxu1 %v2699_v15 }
  0x4b   :  { %707 = vmatpush.bf16.msrb.mxu3 %v2689_v63  ;;  %997 = vmatpush.bf16.msrb.mxu2 %v2642_v16 }
  0x4c   :  { %382 = vmatmul.bf16.gmra.mxu1 %v2186_v26 }
  0x4d   :  { %860 = vmatpush.bf16.msrb.mxu0 %v2689_v63  ;;  %873 = vmatpush.bf16.msrb.mxu1 %v2708_v20 }
  0x4f   :  { %708 = vmatpush.bf16.msrb.mxu3 %v2696_v12  ;;  %998 = vmatpush.bf16.msrb.mxu2 %v2645_v23 }
  0x51   :  { %861 = vmatpush.bf16.msrb.mxu0 %v2696_v12  ;;  %874 = vmatpush.bf16.msrb.mxu1 %v2715_v22 }
  0x52   :  { %431 = vmatmul.bf16.gmra.mxu2 %v2186_v26  ;;  %v2192_v26 = vld [vmem:[#allocation4 + $0x38] sm:$0xff] }
  0x53   :  { %709 = vmatpush.bf16.msrb.mxu3 %v2705_v19  ;;  %999 = vmatpush.bf16.msrb.mxu2 %v2648_v34 }
  0x55   :  { %862 = vmatpush.bf16.msrb.mxu0 %v2705_v19  ;;  %875 = vmatpush.bf16.msrb.mxu1 %v2722_v30 }
  0x56   :  { %710 = vmatmul.bf16.vlgmr.msrb.gmra.mxu3 %v2589_v29 }
  0x57   :  { %716 = vmatpush.bf16.msra.mxu3 %v2677_v49  ;;  %1000 = vmatpush.bf16.msrb.mxu2 %v2651_v43 }
  0x58   :  { %338 = vmatmul.bf16.gmra.mxu0 %v2187_v36 }
  0x59   :  { %1023 = vmatpush.bf16.msra.mxu0 %v2677_v49  ;;  %876 = vmatpush.bf16.msrb.mxu1 %v2728_v35 }
  0x5b   :  { %717 = vmatpush.bf16.msra.mxu3 %v2684_v59  ;;  %1001 = vmatpush.bf16.msrb.mxu2 %v2654_v55 }
  0x5c   :  { %387 = vmatmul.bf16.gmra.mxu1 %v2187_v36 }
  0x5d   :  { %1024 = vmatpush.bf16.msra.mxu0 %v2684_v59  ;;  %1149 = vmatpush.bf16.msra.mxu1 %v2636_v3 }
  0x5f   :  { %718 = vmatpush.bf16.msra.mxu3 %v2692_v5  ;;  %1002 = vmatpush.bf16.msrb.mxu2 %v2657_v6 }
  0x61   :  { %1025 = vmatpush.bf16.msra.mxu0 %v2692_v5  ;;  %1150 = vmatpush.bf16.msra.mxu1 %v2639_v7 }
  0x62   :  { %436 = vmatmul.bf16.gmra.mxu2 %v2187_v36 }
  0x63   :  { %719 = vmatpush.bf16.msra.mxu3 %v2699_v15  ;;  %1163 = vmatpush.bf16.msra.mxu2 %v2659_v10 }
  0x65   :  { %1026 = vmatpush.bf16.msra.mxu0 %v2699_v15  ;;  %1151 = vmatpush.bf16.msra.mxu1 %v2642_v16 }
  0x67   :  { %720 = vmatpush.bf16.msra.mxu3 %v2708_v20  ;;  %1164 = vmatpush.bf16.msra.mxu2 %v2663_v21 }
  0x69   :  { %1027 = vmatpush.bf16.msra.mxu0 %v2708_v20  ;;  %1152 = vmatpush.bf16.msra.mxu1 %v2645_v23 }
  0x6b   :  { %721 = vmatpush.bf16.msra.mxu3 %v2715_v22  ;;  %1165 = vmatpush.bf16.msra.mxu2 %v2670_v33 }
  0x6d   :  { %1028 = vmatpush.bf16.msra.mxu0 %v2715_v22  ;;  %1153 = vmatpush.bf16.msra.mxu1 %v2648_v34 }
  0x6f   :  { %722 = vmatpush.bf16.msra.mxu3 %v2722_v30  ;;  %1166 = vmatpush.bf16.msra.mxu2 %v2675_v44 }
  0x71   :  { %1029 = vmatpush.bf16.msra.mxu0 %v2722_v30  ;;  %1154 = vmatpush.bf16.msra.mxu1 %v2651_v43 }
  0x73   :  { %723 = vmatpush.bf16.msra.mxu3 %v2728_v35  ;;  %1167 = vmatpush.bf16.msra.mxu2 %v2681_v53 }
  0x75   :  { %1030 = vmatpush.bf16.msra.mxu0 %v2728_v35  ;;  %1155 = vmatpush.bf16.msra.mxu1 %v2654_v55 }
  0x76   :  { %724 = vmatmul.bf16.vlgmr.msra.gmra.mxu3 %v2589_v29  ;;  %v2188_v29 = vld [vmem:[#allocation4 + $0x18] sm:$0xff] }
  0x77   :  { %841 = vmatpush.bf16.msrb.mxu3 %v2636_v3  ;;  %1168 = vmatpush.bf16.msra.mxu2 %v2689_v63 }
  0x78   :  { %343 = vmatmul.bf16.gmra.mxu0 %v2188_v29  ;;  %392 = vmatmul.bf16.gmra.mxu1 %v2188_v29 }
  0x79   :  { %1156 = vmatpush.bf16.msra.mxu1 %v2657_v6  ;;  %441 = vmatmul.bf16.gmra.mxu2 %v2188_v29 }
  0x7b   :  { %842 = vmatpush.bf16.msrb.mxu3 %v2639_v7  ;;  %1169 = vmatpush.bf16.msra.mxu2 %v2696_v12 }
  0x7f   :  { %843 = vmatpush.bf16.msrb.mxu3 %v2642_v16  ;;  %1170 = vmatpush.bf16.msra.mxu2 %v2705_v19 }
  0x83   :  { %844 = vmatpush.bf16.msrb.mxu3 %v2645_v23 }
  0x87   :  { %845 = vmatpush.bf16.msrb.mxu3 %v2648_v34 }
  0x88   :  { %348 = vmatmul.bf16.gmra.mxu0 %v2189_v37  ;;  %397 = vmatmul.bf16.gmra.mxu1 %v2189_v37 }
  0x89   :  { %446 = vmatmul.bf16.gmra.mxu2 %v2189_v37 }
  0x8b   :  { %846 = vmatpush.bf16.msrb.mxu3 %v2651_v43 }
  0x8f   :  { %847 = vmatpush.bf16.msrb.mxu3 %v2654_v55 }
  0x93   :  { %848 = vmatpush.bf16.msrb.mxu3 %v2657_v6 }
  0x97   :  { %1009 = vmatpush.bf16.msra.mxu3 %v2659_v10 }
  0x98   :  { %353 = vmatmul.bf16.gmra.mxu0 %v2190_v45  ;;  %402 = vmatmul.bf16.gmra.mxu1 %v2190_v45 }
  0x99   :  { %451 = vmatmul.bf16.gmra.mxu2 %v2190_v45 }
  0x9b   :  { %1010 = vmatpush.bf16.msra.mxu3 %v2663_v21 }
  0x9f   :  { %1011 = vmatpush.bf16.msra.mxu3 %v2670_v33 }
  0xa3   :  { %1012 = vmatpush.bf16.msra.mxu3 %v2675_v44 }
  0xa7   :  { %1013 = vmatpush.bf16.msra.mxu3 %v2681_v53 }
  0xa8   :  { %358 = vmatmul.bf16.gmra.mxu0 %v2191_v61  ;;  %407 = vmatmul.bf16.gmra.mxu1 %v2191_v61 }
  0xa9   :  { %456 = vmatmul.bf16.gmra.mxu2 %v2191_v61 }
  0xab   :  { %1014 = vmatpush.bf16.msra.mxu3 %v2689_v63 }
  0xaf   :  { %1015 = vmatpush.bf16.msra.mxu3 %v2696_v12 }
  0xb3   :  { %1016 = vmatpush.bf16.msra.mxu3 %v2705_v19 }
  0xb5   :  { %v329_v39 = vpop.f32.mrf.mxu0 }
  0xb6   :  { %v330_v42 = vadd.f32 %v329_v39, %v2783_v40 }
  0xb8   :  { %363 = vmatmul.bf16.gmra.mxu0 %v2192_v26  ;;  %412 = vmatmul.bf16.gmra.mxu1 %v2192_v26 }
  0xb9   :  { %v697_v41 = vpop.f32.mrf.mxu3  ;;  %v378_v54 = vpop.f32.mrf.mxu1  ;;  %461 = vmatmul.bf16.gmra.mxu2 %v2192_v26 }
  0xba   :  { %v730_v46 = vadd.f32 %v697_v41, %v330_v42  ;;  %v379_v60 = vadd.f32 %v378_v54, %v2788_v56 }
  0xbc   :  { %v2153_v48 = vmul.f32 -1.442695, %v730_v46 }
  0xbd   :  { %v331_v47 = vpop.f32.mrf.mxu0 }
  0xbe   :  { %v332_v50 = vadd.f32 %v331_v47, %v2783_v40  ;;  %2292 = vpow2.f32 %v2153_v48  ;;  %v2803_v48 = vperm.slane %v2780_v38, 2 }
  0xc1   :  { %v699_v51 = vpop.f32.mrf.mxu3  ;;  %v380_v2 = vpop.f32.mrf.mxu1 }
  0xc2   :  { %v731_v52 = vadd.f32 %v699_v51, %v332_v50  ;;  %v381_v9 = vadd.f32 %v380_v2, %v2788_v56  ;;  %v2808_v50 = vld [vmem:[%s3329_s4] ss:$0 sm:$0xff] }
  0xc4   :  { %v2154_v57 = vmul.f32 -1.442695, %v731_v52  ;;  %v2293_v58 = vpop.eup %2292 }
  0xc5   :  { %v738_v62 = vadd.f32 1.0, %v2293_v58  ;;  %v427_v52 = vpop.f32.mrf.mxu2 }
  0xc6   :  { %2294 = vpow2.f32 %v2154_v57 }
  0xc7   :  { %2296 = vrcp.f32 %v738_v62  ;;  %vm745_vm0 = vweird.f32 %v738_v62  ;;  %v751_v39 = vand.u32 2147483648, %v738_v62  ;;  %v749_v45 = vand.u32 2147483647, %v738_v62 }
  0xc9   :  { %v752_v54 = vor.u32 1.1754944e-38, %v751_v39  ;;  %vm750_vm3 = vcmp.eq.f32.partialorder %v749_v45, 8.507059e+37 }
  0xcc   :  { %v2295_v8 = vpop.eup %2294 }
  0xcd   :  { %v739_v11 = vadd.f32 1.0, %v2295_v8  ;;  %v2297_v14 = vpop.eup %2296 }
  0xce   :  { %v741_v25 = vmul.f32 %v2297_v14, %v738_v62  ;;  %vm746_vm1 = vweird.f32 %v2297_v14  ;;  %v428_v62 = vadd.f32 %v427_v52, %v2803_v48 }
  0xcf   :  { %vm2798_vm2 = vmor %vm745_vm0, %vm746_vm1  ;;  %vm760_vm4 = vweird.f32 %v739_v11  ;;  %v766_v2 = vand.u32 2147483648, %v739_v11 }
  0xd0   :  { %v742_v28 = vsub.f32 1.0, %v741_v25 }
  0xd2   :  { %v743_v29 = vmul.f32 %v2297_v14, %v742_v28  ;;  %v429_v28 = vpop.f32.mrf.mxu2 }
  0xd3   :  { %v430_v45 = vadd.f32 %v429_v28, %v2803_v48 }
  0xd4   :  { %v744_v42 = vadd.f32 %v2297_v14, %v743_v29 }
  0xd6   :  { %v748_v57 = vsel %vm2798_vm2, %v2297_v14, %v744_v42 }
  0xd9   :  { %v711_v0 = vpop.f32.mrf.mxu3 }
  0xda   :  { %v770_v1 = vadd.f32 %v711_v0, %v379_v60 }
  0xdc   :  { %v2155_v4 = vmul.f32 -1.442695, %v770_v1  ;;  %v753_v1 = vsel %vm750_vm3, %v752_v54, %v748_v57 }
  0xde   :  { %2298 = vpow2.f32 %v2155_v4 }
  0xdf   :  { %2300 = vrcp.f32 %v739_v11 }
  0xe1   :  { %v713_v13 = vpop.f32.mrf.mxu3 }
  0xe2   :  { %v771_v17 = vadd.f32 %v713_v13, %v381_v9  ;;  %v764_v9 = vand.u32 2147483647, %v739_v11 }
  0xe4   :  { %v2299_v18 = vpop.eup %2298  ;;  %v2156_v24 = vmul.f32 -1.442695, %v771_v17  ;;  %vm765_vm7 = vcmp.eq.f32.partialorder %v764_v9, 8.507059e+37 }
  0xe5   :  { %v2792_v27 = vadd.f32 1.0, %v2299_v18  ;;  %v2301_v31 = vpop.eup %2300 }
  0xe6   :  { %2302 = vpow2.f32 %v2156_v24  ;;  %v756_v37 = vmul.f32 %v2301_v31, %v739_v11  ;;  %vm761_vm5 = vweird.f32 %v2301_v31  ;;  %v767_v24 = vor.u32 1.1754944e-38, %v766_v2 }
  0xe7   :  { %2304 = vrcp.f32 %v2792_v27  ;;  %vm2816_vm6 = vmor %vm760_vm4, %vm761_vm5  ;;  %vm785_vm8 = vweird.f32 %v2792_v27  ;;  %v789_v39 = vand.u32 2147483647, %v2792_v27 }
  0xe8   :  { %v757_v46 = vsub.f32 1.0, %v756_v37 }
  0xe9   :  { %vm790_vm11 = vcmp.eq.f32.partialorder %v789_v39, 8.507059e+37 }
  0xea   :  { %v758_v58 = vmul.f32 %v2301_v31, %v757_v46 }
  0xec   :  { %v2303_v32 = vpop.eup %2302  ;;  %v759_v8 = vadd.f32 %v2301_v31, %v758_v58 }
  0xed   :  { %v2795_v36 = vadd.f32 1.0, %v2303_v32  ;;  %v2305_v41 = vpop.eup %2304  ;;  %v791_v32 = vand.u32 2147483648, %v2792_v27 }
  0xee   :  { %v781_v51 = vmul.f32 %v2305_v41, %v2792_v27  ;;  %v763_v25 = vsel %vm2816_vm6, %v2301_v31, %v759_v8  ;;  %vm786_vm9 = vweird.f32 %v2305_v41 }
  0xef   :  { %2306 = vrcp.f32 %v2795_v36  ;;  %v768_v42 = vsel %vm765_vm7, %v767_v24, %v763_v25  ;;  %vm787_vm10 = vmor %vm785_vm8, %vm786_vm9  ;;  %vm800_vm13 = vweird.f32 %v2795_v36  ;;  %v804_v27 = vand.u32 2147483647, %v2795_v36 }
  0xf0   :  { %v782_v0 = vsub.f32 1.0, %v781_v51  ;;  %v792_v51 = vor.u32 1.1754944e-38, %v791_v32 }
  0xf1   :  { %vm805_vm15 = vcmp.eq.f32.partialorder %v804_v27, 8.507059e+37 }
  0xf2   :  { %v783_v18 = vmul.f32 %v2305_v41, %v782_v0  ;;  %v2830_v0 = vpop.f32.mrf.mxu0 }
  0xf4   :  { %v784_v37 = vadd.f32 %v2305_v41, %v783_v18 }
  0xf5   :  { %v2307_v61 = vpop.eup %2306 }
  0xf6   :  { %v796_v13 = vmul.f32 %v2307_v61, %v2795_v36  ;;  %v788_v54 = vsel %vm787_vm10, %v2305_v41, %v784_v37  ;;  %vm801_vm12 = vweird.f32 %v2307_v61 }
  0xf7   :  { %vm802_vm14 = vmor %vm800_vm13, %vm801_vm12 }
  0xf8   :  { %v797_v26 = vsub.f32 1.0, %v796_v13 }
  0xf9   :  { %v725_v60 = vpop.f32.mrf.mxu3 }
  0xfa   :  { %v810_v38 = vadd.f32 %v2808_v50, %v725_v60  ;;  %v798_v31 = vmul.f32 %v2307_v61, %v797_v26  ;;  %v806_v60 = vand.u32 2147483648, %v2795_v36 }
  0xfc   :  { %v812_v4 = vmul.f32 %v810_v38, %v753_v1  ;;  %v799_v58 = vadd.f32 %v2307_v61, %v798_v31 }
  0xfe   :  { %v814_v17 = vadd.f32 %v812_v4, %v428_v62  ;;  %v793_v62 = vsel %vm790_vm11, %v792_v51, %v788_v54  ;;  %v803_v1 = vsel %vm802_vm14, %v2307_v61, %v799_v58  ;;  %v807_v4 = vor.u32 1.1754944e-38, %v806_v60  ;;  %v2842_v61 = vpop.f32.mrf.mxu0 }
 0x100   :  { %2308 = vtanh.f32 %v814_v17  ;;  %v808_v9 = vsel %vm805_vm15, %v807_v4, %v803_v1 }
 0x101   :  { %v727_v11 = vpop.f32.mrf.mxu3 }
 0x102   :  { %v811_v29 = vadd.f32 %v2808_v50, %v727_v11  ;;  %v383_v11 = vpop.f32.mrf.mxu1 }
 0x104   :  { %v813_v46 = vmul.f32 %v811_v29, %v768_v42 }
 0x106   :  { %v2309_v47 = vpop.eup %2308  ;;  %v815_v52 = vadd.f32 %v813_v46, %v430_v45  ;;  %v2847_v28 = vpop.f32.mrf.mxu0 }
 0x107   :  { %v818_v57 = vsub.f32 0.0, %v2309_v47 }
 0x108   :  { %2310 = vtanh.f32 %v815_v52 }
 0x109   :  { %v820_v38 = vmul.f32 %v818_v57, %v793_v62 }
 0x10a   :  { %v385_v29 = vpop.f32.mrf.mxu1 }
 0x10b   :  { %v2832_v41 = vadd.f32 %v2309_v47, %v820_v38 }
 0x10d   :  { %v824_v17 = vpack.c.bf16 %v2832_v41, %v2832_v41 }
 0x10e   :  { %v2311_v2 = vpop.eup %2310  ;;  %v2858_v32 = vpop.f32.mrf.mxu0 }
 0x10f   :  { %v819_v8 = vsub.f32 0.0, %v2311_v2  ;;  %v837_v24 = vunpack.c.l.b16 %v824_v17 }
 0x111   :  { %v821_v13 = vmul.f32 %v819_v8, %v808_v9  ;;  %v384_v8 = vadd.f32 %v383_v11, %v2788_v56 }
 0x112   :  { %v2874_v39 = vpop.f32.mrf.mxu1 }
 0x113   :  { %v2834_v14 = vadd.f32 %v2311_v2, %v821_v13 }
 0x115   :  { %v2244_v36 = vpack.c.bf16 %v2834_v14, %v2832_v41  ;;  %v825_v18 = vpack.c.bf16 %v2834_v14, %v2834_v14 }
 0x116   :  { %v2866_v37 = vpop.f32.mrf.mxu0 }
 0x117   :  { %2245 = vst [vmem:[#allocation12] sm:$0xff] %v2244_v36   ;;  %v838_v25 = vunpack.c.l.b16 %v825_v18  ;;  %v335_v18 = vadd.f32 %v2830_v0, %v2783_v40 }
 0x119   :  { %v839_v26 = vpack.c.b16 %v838_v25, %v837_v24  ;;  %v386_v25 = vadd.f32 %v385_v29, %v2788_v56 }
 0x11a   :  { %v2878_v45 = vpop.f32.mrf.mxu1 }
 0x11b   :  { %849 = vmatmul.bf16.vlgmr.msrb.gmra.mxu3 %v839_v26  ;;  %863 = vmatmul.bf16.vlgmr.msrb.gmra.mxu0 %v839_v26 }
 0x11c   :  { %877 = vmatmul.bf16.vlgmr.msrb.gmra.mxu1 %v839_v26  ;;  %1177 = vmatpush.bf16.msrb.mxu3 %v2677_v49 }
 0x11d   :  { %1303 = vmatpush.bf16.msrb.mxu0 %v2636_v3  ;;  %1317 = vmatpush.bf16.msrb.mxu1 %v2659_v10 }
 0x11e   :  { %v2876_v42 = vpop.f32.mrf.mxu0 }
 0x120   :  { %1178 = vmatpush.bf16.msrb.mxu3 %v2684_v59 }
 0x121   :  { %1304 = vmatpush.bf16.msrb.mxu0 %v2639_v7  ;;  %1318 = vmatpush.bf16.msrb.mxu1 %v2663_v21 }
 0x122   :  { %v2882_v31 = vpop.f32.mrf.mxu1 }
 0x124   :  { %1179 = vmatpush.bf16.msrb.mxu3 %v2692_v5 }
 0x125   :  { %1305 = vmatpush.bf16.msrb.mxu0 %v2642_v16  ;;  %1319 = vmatpush.bf16.msrb.mxu1 %v2670_v33 }
 0x126   :  { %v2880_v46 = vpop.f32.mrf.mxu0 }
 0x127   :  { %3335 = vst [vmem:[#allocation17_spill] sm:$0xff] %v2880_v46 }
 0x128   :  { %1180 = vmatpush.bf16.msrb.mxu3 %v2699_v15 }
 0x129   :  { %1306 = vmatpush.bf16.msrb.mxu0 %v2645_v23  ;;  %1320 = vmatpush.bf16.msrb.mxu1 %v2675_v44 }
 0x12a   :  { %v2886_v51 = vpop.f32.mrf.mxu1 }
 0x12b   :  { %3337 = vst [vmem:[#allocation19_spill] sm:$0xff] %v2886_v51 }
 0x12c   :  { %1181 = vmatpush.bf16.msrb.mxu3 %v2708_v20 }
 0x12d   :  { %1307 = vmatpush.bf16.msrb.mxu0 %v2648_v34  ;;  %1321 = vmatpush.bf16.msrb.mxu1 %v2681_v53 }
 0x12e   :  { %v2884_v47 = vpop.f32.mrf.mxu0 }
 0x12f   :  { %3336 = vst [vmem:[#allocation18_spill] sm:$0xff] %v2884_v47 }
 0x130   :  { %1182 = vmatpush.bf16.msrb.mxu3 %v2715_v22 }
 0x131   :  { %1308 = vmatpush.bf16.msrb.mxu0 %v2651_v43  ;;  %1322 = vmatpush.bf16.msrb.mxu1 %v2689_v63 }
 0x132   :  { %v2890_v54 = vpop.f32.mrf.mxu1 }
 0x133   :  { %3339 = vst [vmem:[#allocation21_spill] sm:$0xff] %v2890_v54 }
 0x134   :  { %1183 = vmatpush.bf16.msrb.mxu3 %v2722_v30 }
 0x135   :  { %1309 = vmatpush.bf16.msrb.mxu0 %v2654_v55  ;;  %1323 = vmatpush.bf16.msrb.mxu1 %v2696_v12 }
 0x136   :  { %v2888_v52 = vpop.f32.mrf.mxu0 }
 0x137   :  { %3338 = vst [vmem:[#allocation20_spill] sm:$0xff] %v2888_v52 }
 0x138   :  { %1184 = vmatpush.bf16.msrb.mxu3 %v2728_v35 }
 0x139   :  { %1310 = vmatpush.bf16.msrb.mxu0 %v2657_v6  ;;  %1324 = vmatpush.bf16.msrb.mxu1 %v2705_v19 }
 0x13a   :  { %v2894_v58 = vpop.f32.mrf.mxu1 }
 0x13b   :  { %3341 = vst [vmem:[#allocation23_spill] sm:$0xff] %v2894_v58 }
 0x13e   :  { %v2892_v57 = vpop.f32.mrf.mxu0 }
 0x13f   :  { %3340 = vst [vmem:[#allocation22_spill] sm:$0xff] %v2892_v57 }
 0x142   :  { %v2898_v62 = vpop.f32.mrf.mxu1 }
 0x143   :  { %3343 = vst [vmem:[#allocation25_spill] sm:$0xff] %v2898_v62 }
 0x146   :  { %v2896_v60 = vpop.f32.mrf.mxu0 }
 0x147   :  { %3342 = vst [vmem:[#allocation24_spill] sm:$0xff] %v2896_v60 }
 0x14a   :  { %v2902_v38 = vpop.f32.mrf.mxu1 }
 0x14b   :  { %3345 = vst [vmem:[#allocation27_spill] sm:$0xff] %v2902_v38 }
 0x14e   :  { %v2900_v27 = vpop.f32.mrf.mxu0 }
 0x14f   :  { %3344 = vst [vmem:[#allocation26_spill] sm:$0xff] %v2900_v27 }
 0x152   :  { %v2906_v2 = vpop.f32.mrf.mxu1 }
 0x153   :  { %3347 = vst [vmem:[#allocation29_spill] sm:$0xff] %v2906_v2 }
 0x156   :  { %v2904_v1 = vpop.f32.mrf.mxu0 }
 0x157   :  { %3346 = vst [vmem:[#allocation28_spill] sm:$0xff] %v2904_v1 }
 0x15a   :  { %v2911_v9 = vpop.f32.mrf.mxu1 }
 0x15b   :  { %3349 = vst [vmem:[#allocation31_spill] sm:$0xff] %v2911_v9 }
 0x15e   :  { %v2908_v4 = vpop.f32.mrf.mxu0 }
 0x15f   :  { %3348 = vst [vmem:[#allocation30_spill] sm:$0xff] %v2908_v4  ;;  %v337_v4 = vadd.f32 %v2842_v61, %v2783_v40 }
 0x162   :  { %v2916_v60 = vpop.f32.mrf.mxu1 }
 0x163   :  { %3350 = vst [vmem:[#allocation32_spill] sm:$0xff] %v2916_v60 }
 0x198   :  { %v864_v13 = vpop.f32.mrf.mxu0 }
 0x199   :  { %v923_v17 = vadd.f32 %v864_v13, %v384_v8 }
 0x19b   :  { %v2159_v36 = vmul.f32 -1.442695, %v923_v17 }
 0x19d   :  { %2312 = vpow2.f32 %v2159_v36  ;;  %v2922_v36 = vpop.f32.mrf.mxu1 }
 0x19e   :  { %v850_v24 = vpop.f32.mrf.mxu3  ;;  %3351 = vst [vmem:[#allocation33_spill] sm:$0xff] %v2922_v36 }
 0x19f   :  { %v883_v26 = vadd.f32 %v850_v24, %v335_v18 }
 0x1a0   :  { %v866_v1 = vpop.f32.mrf.mxu0 }
 0x1a1   :  { %v2157_v27 = vmul.f32 -1.442695, %v883_v26  ;;  %v924_v2 = vadd.f32 %v866_v1, %v386_v25 }
 0x1a3   :  { %2314 = vpow2.f32 %v2157_v27  ;;  %v2160_v11 = vmul.f32 -1.442695, %v924_v2  ;;  %v2313_v8 = vpop.eup %2312 }
 0x1a4   :  { %v2920_v9 = vadd.f32 1.0, %v2313_v8 }
 0x1a5   :  { %2316 = vpow2.f32 %v2160_v11  ;;  %v878_v8 = vpop.f32.mrf.mxu1 }
 0x1a6   :  { %v852_v13 = vpop.f32.mrf.mxu3  ;;  %v963_v60 = vadd.f32 %v2808_v50, %v878_v8  ;;  %vm938_vm9 = vweird.f32 %v2920_v9 }
 0x1a7   :  { %v884_v17 = vadd.f32 %v852_v13, %v337_v4 }
 0x1a9   :  { %v2315_v0 = vpop.eup %2314  ;;  %v2158_v29 = vmul.f32 -1.442695, %v884_v17 }
 0x1aa   :  { %v891_v18 = vadd.f32 1.0, %v2315_v0 }
 0x1ab   :  { %2318 = vpow2.f32 %v2158_v29  ;;  %v2317_v27 = vpop.eup %2316  ;;  %v432_v29 = vpop.f32.mrf.mxu2 }
 0x1ac   :  { %2320 = vrcp.f32 %v891_v18  ;;  %v2925_v2 = vadd.f32 1.0, %v2317_v27  ;;  %v904_v13 = vand.u32 2147483648, %v891_v18  ;;  %v902_v0 = vand.u32 2147483647, %v891_v18 }
 0x1ad   :  { %2322 = vrcp.f32 %v2920_v9  ;;  %vm898_vm1 = vweird.f32 %v891_v18  ;;  %v880_v51 = vpop.f32.mrf.mxu1 }
 0x1ae   :  { %v905_v57 = vor.u32 1.1754944e-38, %v904_v13  ;;  %vm903_vm3 = vcmp.eq.f32.partialorder %v902_v0, 8.507059e+37  ;;  %vm953_vm13 = vweird.f32 %v2925_v2 }
 0x1b1   :  { %v2319_v1 = vpop.eup %2318 }
 0x1b2   :  { %v2321_v61 = vpop.eup %2320  ;;  %v892_v24 = vadd.f32 1.0, %v2319_v1 }
 0x1b3   :  { %v2927_v25 = vpop.eup %2322  ;;  %v894_v4 = vmul.f32 %v2321_v61, %v891_v18  ;;  %vm899_vm0 = vweird.f32 %v2321_v61 }
 0x1b4   :  { %2324 = vrcp.f32 %v892_v24  ;;  %v934_v11 = vmul.f32 %v2927_v25, %v2920_v9  ;;  %vm900_vm2 = vmor %vm898_vm1, %vm899_vm0  ;;  %v919_v18 = vand.u32 2147483648, %v892_v24  ;;  %v917_v8 = vand.u32 2147483647, %v892_v24 }
 0x1b5   :  { %2326 = vrcp.f32 %v2925_v2  ;;  %v895_v26 = vsub.f32 1.0, %v894_v4  ;;  %v433_v4 = vadd.f32 %v432_v29, %v2803_v48  ;;  %vm913_vm5 = vweird.f32 %v892_v24 }
 0x1b6   :  { %v935_v1 = vsub.f32 1.0, %v934_v11  ;;  %vm939_vm6 = vweird.f32 %v2927_v25  ;;  %vm918_vm8 = vcmp.eq.f32.partialorder %v917_v8, 8.507059e+37  ;;  %v957_v8 = vand.u32 2147483647, %v2925_v2 }
 0x1b7   :  { %v896_v17 = vmul.f32 %v2321_v61, %v895_v26  ;;  %vm940_vm10 = vmor %vm938_vm9, %vm939_vm6 }
 0x1b8   :  { %v936_v54 = vmul.f32 %v2927_v25, %v935_v1  ;;  %vm958_vm15 = vcmp.eq.f32.partialorder %v957_v8, 8.507059e+37 }
 0x1b9   :  { %v897_v27 = vadd.f32 %v2321_v61, %v896_v17 }
 0x1ba   :  { %v2325_v36 = vpop.eup %2324 }
 0x1bb   :  { %v2327_v38 = vpop.eup %2326  ;;  %v909_v52 = vmul.f32 %v2325_v36, %v892_v24  ;;  %v901_v62 = vsel %vm900_vm2, %v2321_v61, %v897_v27  ;;  %vm914_vm4 = vweird.f32 %v2325_v36 }
 0x1bc   :  { %v906_v58 = vsel %vm903_vm3, %v905_v57, %v901_v62  ;;  %v949_v17 = vmul.f32 %v2327_v38, %v2925_v2  ;;  %v937_v57 = vadd.f32 %v2927_v25, %v936_v54  ;;  %vm915_vm7 = vmor %vm913_vm5, %vm914_vm4  ;;  %v964_v62 = vadd.f32 %v2808_v50, %v880_v51 }
 0x1bd   :  { %v965_v47 = vmul.f32 %v963_v60, %v906_v58  ;;  %v910_v26 = vsub.f32 1.0, %v909_v52  ;;  %v434_v58 = vpop.f32.mrf.mxu2  ;;  %v920_v52 = vor.u32 1.1754944e-38, %v919_v18  ;;  %v944_v60 = vand.u32 2147483648, %v2920_v9 }
 0x1be   :  { %v950_v61 = vsub.f32 1.0, %v949_v17  ;;  %v435_v24 = vadd.f32 %v434_v58, %v2803_v48  ;;  %v941_v54 = vsel %vm940_vm10, %v2927_v25, %v937_v57  ;;  %vm954_vm12 = vweird.f32 %v2327_v38 }
 0x1bf   :  { %v967_v46 = vadd.f32 %v965_v47, %v433_v4  ;;  %v911_v11 = vmul.f32 %v2325_v36, %v910_v26  ;;  %v945_v4 = vor.u32 1.1754944e-38, %v944_v60  ;;  %vm955_vm14 = vmor %vm953_vm13, %vm954_vm12 }
 0x1c0   :  { %v951_v27 = vmul.f32 %v2327_v38, %v950_v61 }
 0x1c1   :  { %2328 = vtanh.f32 %v967_v46  ;;  %v912_v13 = vadd.f32 %v2325_v36, %v911_v11  ;;  %v942_v46 = vand.u32 2147483647, %v2920_v9  ;;  %v959_v9 = vand.u32 2147483648, %v2925_v2 }
 0x1c2   :  { %v952_v18 = vadd.f32 %v2327_v38, %v951_v27 }
 0x1c3   :  { %v916_v47 = vsel %vm915_vm7, %v2325_v36, %v912_v13  ;;  %vm943_vm11 = vcmp.eq.f32.partialorder %v942_v46, 8.507059e+37  ;;  %v960_v61 = vor.u32 1.1754944e-38, %v959_v9  ;;  %v389_v9 = vadd.f32 %v2874_v39, %v2788_v56 }
 0x1c4   :  { %v921_v0 = vsel %vm918_vm8, %v920_v52, %v916_v47  ;;  %v946_v36 = vsel %vm943_vm11, %v945_v4, %v941_v54  ;;  %v956_v25 = vsel %vm955_vm14, %v2327_v38, %v952_v18  ;;  %v340_v18 = vadd.f32 %v2847_v28, %v2783_v40 }
 0x1c5   :  { %v966_v29 = vmul.f32 %v964_v62, %v921_v0  ;;  %v961_v57 = vsel %vm958_vm15, %v960_v61, %v956_v25 }
 0x1c7   :  { %v2329_v1 = vpop.eup %2328  ;;  %v968_v26 = vadd.f32 %v966_v29, %v435_v24 }
 0x1c8   :  { %v971_v51 = vsub.f32 %v2832_v41, %v2329_v1 }
 0x1c9   :  { %2330 = vtanh.f32 %v968_v26 }
 0x1ca   :  { %v973_v17 = vmul.f32 %v971_v51, %v946_v36 }
 0x1cc   :  { %v2947_v11 = vadd.f32 %v2329_v1, %v973_v17 }
 0x1ce   :  { %v977_v60 = vpack.c.bf16 %v2947_v11, %v2947_v11 }
 0x1cf   :  { %v2331_v13 = vpop.eup %2330 }
 0x1d0   :  { %v972_v41 = vsub.f32 %v2834_v14, %v2331_v13  ;;  %v991_v38 = vunpack.c.l.b16 %v977_v60  ;;  %v2968_v14 = vpop.f32.mrf.mxu2  ;;  %v391_v60 = vadd.f32 %v2878_v45, %v2788_v56 }
 0x1d2   :  { %v974_v58 = vmul.f32 %v972_v41, %v961_v57 }
 0x1d4   :  { %v2951_v52 = vadd.f32 %v2331_v13, %v974_v58  ;;  %v342_v58 = vadd.f32 %v2858_v32, %v2783_v40 }
 0x1d6   :  { %v2249_v62 = vpack.c.bf16 %v2951_v52, %v2947_v11  ;;  %v978_v2 = vpack.c.bf16 %v2951_v52, %v2951_v52 }
 0x1d8   :  { %2250 = vst [vmem:[#allocation12 + $0x8] sm:$0xff] %v2249_v62   ;;  %v992_v47 = vunpack.c.l.b16 %v978_v2  ;;  %v2979_v0 = vpop.f32.mrf.mxu2 }
 0x1da   :  { %v993_v46 = vpack.c.b16 %v992_v47, %v991_v38 }
 0x1dc   :  { %1003 = vmatmul.bf16.vlgmr.msrb.gmra.mxu2 %v993_v46  ;;  %1017 = vmatmul.bf16.vlgmr.msra.gmra.mxu3 %v993_v46 }
 0x1dd   :  { %1031 = vmatmul.bf16.vlgmr.msra.gmra.mxu0 %v993_v46  ;;  %1331 = vmatpush.bf16.msrb.mxu2 %v2677_v49 }
 0x1de   :  { %1457 = vmatpush.bf16.msra.mxu3 %v2636_v3  ;;  %1471 = vmatpush.bf16.msra.mxu0 %v2659_v10 }
 0x1e0   :  { %v2987_v24 = vpop.f32.mrf.mxu2 }
 0x1e1   :  { %1332 = vmatpush.bf16.msrb.mxu2 %v2684_v59 }
 0x1e2   :  { %1458 = vmatpush.bf16.msra.mxu3 %v2639_v7  ;;  %1472 = vmatpush.bf16.msra.mxu0 %v2663_v21 }
 0x1e5   :  { %1333 = vmatpush.bf16.msrb.mxu2 %v2692_v5 }
 0x1e6   :  { %1459 = vmatpush.bf16.msra.mxu3 %v2642_v16  ;;  %1473 = vmatpush.bf16.msra.mxu0 %v2670_v33 }
 0x1e8   :  { %v2989_v29 = vpop.f32.mrf.mxu2 }
 0x1e9   :  { %1334 = vmatpush.bf16.msrb.mxu2 %v2699_v15 }
 0x1ea   :  { %1460 = vmatpush.bf16.msra.mxu3 %v2645_v23  ;;  %1474 = vmatpush.bf16.msra.mxu0 %v2675_v44 }
 0x1ed   :  { %1335 = vmatpush.bf16.msrb.mxu2 %v2708_v20 }
 0x1ee   :  { %1461 = vmatpush.bf16.msra.mxu3 %v2648_v34  ;;  %1475 = vmatpush.bf16.msra.mxu0 %v2681_v53 }
 0x1f0   :  { %v2991_v27 = vpop.f32.mrf.mxu2 }
 0x1f1   :  { %1336 = vmatpush.bf16.msrb.mxu2 %v2715_v22 }
 0x1f2   :  { %1462 = vmatpush.bf16.msra.mxu3 %v2651_v43  ;;  %1476 = vmatpush.bf16.msra.mxu0 %v2689_v63 }
 0x1f5   :  { %1337 = vmatpush.bf16.msrb.mxu2 %v2722_v30 }
 0x1f6   :  { %1463 = vmatpush.bf16.msra.mxu3 %v2654_v55  ;;  %1477 = vmatpush.bf16.msra.mxu0 %v2696_v12 }
 0x1f8   :  { %v2993_v54 = vpop.f32.mrf.mxu2 }
 0x1f9   :  { %1338 = vmatpush.bf16.msrb.mxu2 %v2728_v35 }
 0x1fa   :  { %1464 = vmatpush.bf16.msra.mxu3 %v2657_v6  ;;  %1478 = vmatpush.bf16.msra.mxu0 %v2705_v19 }
 0x200   :  { %v2995_v1 = vpop.f32.mrf.mxu2 }
 0x201   :  { %3352 = vst [vmem:[#allocation34_spill] sm:$0xff] %v2995_v1 }
 0x208   :  { %v2997_v4 = vpop.f32.mrf.mxu2 }
 0x209   :  { %3353 = vst [vmem:[#allocation35_spill] sm:$0xff] %v2997_v4 }
 0x210   :  { %v2999_v26 = vpop.f32.mrf.mxu2 }
 0x211   :  { %3354 = vst [vmem:[#allocation36_spill] sm:$0xff] %v2999_v26 }
 0x218   :  { %v3001_v51 = vpop.f32.mrf.mxu2 }
 0x219   :  { %3355 = vst [vmem:[#allocation37_spill] sm:$0xff] %v3001_v51 }
 0x220   :  { %v3003_v36 = vpop.f32.mrf.mxu2 }
 0x221   :  { %3356 = vst [vmem:[#allocation38_spill] sm:$0xff] %v3003_v36 }
 0x228   :  { %v3005_v17 = vpop.f32.mrf.mxu2 }
 0x229   :  { %3357 = vst [vmem:[#allocation39_spill] sm:$0xff] %v3005_v17 }
 0x25f   :  { %v1004_v8 = vpop.f32.mrf.mxu2  ;;  %v1018_v25 = vpop.f32.mrf.mxu3 }
 0x260   :  { %v1037_v13 = vadd.f32 %v1004_v8, %v340_v18  ;;  %v1077_v61 = vadd.f32 %v1018_v25, %v389_v9 }
 0x262   :  { %v2161_v41 = vmul.f32 -1.442695, %v1037_v13  ;;  %v2163_v57 = vmul.f32 -1.442695, %v1077_v61 }
 0x264   :  { %2332 = vpow2.f32 %v2161_v41 }
 0x265   :  { %2334 = vpow2.f32 %v2163_v57 }
 0x267   :  { %v1006_v62 = vpop.f32.mrf.mxu2  ;;  %v1020_v2 = vpop.f32.mrf.mxu3 }
 0x268   :  { %v1038_v28 = vadd.f32 %v1006_v62, %v342_v58  ;;  %v1078_v38 = vadd.f32 %v1020_v2, %v391_v60  ;;  %v1032_v58 = vpop.f32.mrf.mxu0 }
 0x26a   :  { %v2333_v47 = vpop.eup %2332  ;;  %v2162_v39 = vmul.f32 -1.442695, %v1038_v28  ;;  %v2164_v18 = vmul.f32 -1.442695, %v1078_v38 }
 0x26b   :  { %v2335_v46 = vpop.eup %2334  ;;  %v1045_v17 = vadd.f32 1.0, %v2333_v47 }
 0x26c   :  { %v3015_v9 = vadd.f32 1.0, %v2335_v46  ;;  %2336 = vpow2.f32 %v2162_v39 }
 0x26d   :  { %2338 = vrcp.f32 %v1045_v17  ;;  %v1058_v60 = vand.u32 2147483648, %v1045_v17  ;;  %v1056_v28 = vand.u32 2147483647, %v1045_v17  ;;  %vm1052_vm1 = vweird.f32 %v1045_v17 }
 0x26e   :  { %2340 = vrcp.f32 %v3015_v9  ;;  %vm1092_vm9 = vweird.f32 %v3015_v9 }
 0x26f   :  { %2342 = vpow2.f32 %v2164_v18  ;;  %v1059_v39 = vor.u32 1.1754944e-38, %v1058_v60  ;;  %v1117_v18 = vadd.f32 %v2808_v50, %v1032_v58  ;;  %vm1057_vm3 = vcmp.eq.f32.partialorder %v1056_v28, 8.507059e+37 }
 0x270   :  { %v1034_v58 = vpop.f32.mrf.mxu0 }
 0x272   :  { %v2337_v32 = vpop.eup %2336 }
 0x273   :  { %v2339_v8 = vpop.eup %2338  ;;  %v1046_v25 = vadd.f32 1.0, %v2337_v32 }
 0x274   :  { %v3018_v45 = vpop.eup %2340  ;;  %v1048_v13 = vmul.f32 %v2339_v8, %v1045_v17  ;;  %vm1053_vm0 = vweird.f32 %v2339_v8 }
 0x275   :  { %v2343_v61 = vpop.eup %2342  ;;  %2344 = vrcp.f32 %v1046_v25  ;;  %v1088_v62 = vmul.f32 %v3018_v45, %v3015_v9  ;;  %vm1054_vm2 = vmor %vm1052_vm1, %vm1053_vm0  ;;  %vm1067_vm5 = vweird.f32 %v1046_v25  ;;  %vm1093_vm6 = vweird.f32 %v3018_v45 }
 0x276   :  { %v1049_v41 = vsub.f32 1.0, %v1048_v13  ;;  %v3020_v57 = vadd.f32 1.0, %v2343_v61  ;;  %vm1094_vm10 = vmor %vm1092_vm9, %vm1093_vm6 }
 0x277   :  { %v1089_v46 = vsub.f32 1.0, %v1088_v62  ;;  %v1071_v62 = vand.u32 2147483647, %v1046_v25 }
 0x278   :  { %v1050_v2 = vmul.f32 %v2339_v8, %v1049_v41  ;;  %2346 = vrcp.f32 %v3020_v57  ;;  %v438_v41 = vadd.f32 %v2968_v14, %v2803_v48  ;;  %vm1107_vm13 = vweird.f32 %v3020_v57 }
 0x279   :  { %v1090_v4 = vmul.f32 %v3018_v45, %v1089_v46  ;;  %v1118_v46 = vadd.f32 %v2808_v50, %v1034_v58  ;;  %vm1072_vm8 = vcmp.eq.f32.partialorder %v1071_v62, 8.507059e+37 }
 0x27a   :  { %v1051_v38 = vadd.f32 %v2339_v8, %v1050_v2  ;;  %v1073_v2 = vand.u32 2147483648, %v1046_v25 }
 0x27b   :  { %v2345_v47 = vpop.eup %2344  ;;  %v1091_v28 = vadd.f32 %v3018_v45, %v1090_v4 }
 0x27c   :  { %v1055_v32 = vsel %vm1054_vm2, %v2339_v8, %v1051_v38  ;;  %v1063_v13 = vmul.f32 %v2345_v47, %v1046_v25  ;;  %vm1068_vm4 = vweird.f32 %v2345_v47  ;;  %v1074_v14 = vor.u32 1.1754944e-38, %v1073_v2 }
 0x27d   :  { %v1060_v61 = vsel %vm1057_vm3, %v1059_v39, %v1055_v32  ;;  %vm1069_vm7 = vmor %vm1067_vm5, %vm1068_vm4  ;;  %v1098_v39 = vand.u32 2147483648, %v3015_v9  ;;  %v1095_v25 = vsel %vm1094_vm10, %v3018_v45, %v1091_v28 }
 0x27e   :  { %v2347_v36 = vpop.eup %2346  ;;  %v1119_v51 = vmul.f32 %v1117_v18, %v1060_v61  ;;  %v1064_v26 = vsub.f32 1.0, %v1063_v13 }
 0x27f   :  { %v1103_v17 = vmul.f32 %v2347_v36, %v3020_v57  ;;  %v1099_v61 = vor.u32 1.1754944e-38, %v1098_v39  ;;  %vm1108_vm12 = vweird.f32 %v2347_v36 }
 0x280   :  { %v1121_v1 = vadd.f32 %v1119_v51, %v438_v41  ;;  %v1065_v60 = vmul.f32 %v2345_v47, %v1064_v26  ;;  %v1096_v26 = vand.u32 2147483647, %v3015_v9  ;;  %vm1109_vm14 = vmor %vm1107_vm13, %vm1108_vm12 }
 0x281   :  { %v1104_v38 = vsub.f32 1.0, %v1103_v17 }
 0x282   :  { %v1066_v8 = vadd.f32 %v2345_v47, %v1065_v60  ;;  %2348 = vtanh.f32 %v1121_v1  ;;  %v440_v1 = vadd.f32 %v2979_v0, %v2803_v48  ;;  %vm1097_vm11 = vcmp.eq.f32.partialorder %v1096_v26, 8.507059e+37 }
 0x283   :  { %v1105_v32 = vmul.f32 %v2347_v36, %v1104_v38  ;;  %v1100_v2 = vsel %vm1097_vm11, %v1099_v61, %v1095_v25  ;;  %v1113_v60 = vand.u32 2147483648, %v3020_v57  ;;  %v1111_v0 = vand.u32 2147483647, %v3020_v57 }
 0x284   :  { %v1070_v18 = vsel %vm1069_vm7, %v2345_v47, %v1066_v8  ;;  %v394_v25 = vadd.f32 %v2882_v31, %v2788_v56 }
 0x285   :  { %v1075_v51 = vsel %vm1072_vm8, %v1074_v14, %v1070_v18  ;;  %v1106_v17 = vadd.f32 %v2347_v36, %v1105_v32  ;;  %v1114_v8 = vor.u32 1.1754944e-38, %v1113_v60  ;;  %vm1112_vm15 = vcmp.eq.f32.partialorder %v1111_v0, 8.507059e+37 }
 0x286   :  { %v1120_v4 = vmul.f32 %v1118_v46, %v1075_v51 }
 0x287   :  { %v1110_v45 = vsel %vm1109_vm14, %v2347_v36, %v1106_v17 }
 0x288   :  { %v2349_v13 = vpop.eup %2348  ;;  %v1122_v41 = vadd.f32 %v1120_v4, %v440_v1  ;;  %v1115_v28 = vsel %vm1112_vm15, %v1114_v8, %v1110_v45 }
 0x289   :  { %v1125_v47 = vsub.f32 %v2947_v11, %v2349_v13 }
 0x28a   :  { %2350 = vtanh.f32 %v1122_v41 }
 0x28b   :  { %v1127_v9 = vmul.f32 %v1125_v47, %v1100_v2 }
 0x28d   :  { %v3043_v62 = vadd.f32 %v2349_v13, %v1127_v9  ;;  %v347_v13 = vadd.f32 %v2876_v42, %v2783_v40 }
 0x28f   :  { %v1131_v39 = vpack.c.bf16 %v3043_v62, %v3043_v62 }
 0x290   :  { %v2351_v58 = vpop.eup %2350 }
 0x291   :  { %v1126_v11 = vsub.f32 %v2951_v52, %v2351_v58  ;;  %v1145_v36 = vunpack.c.l.b16 %v1131_v39  ;;  %v345_v52 = vadd.f32 %v2866_v37, %v2783_v40  ;;  %v3358_v37 = vld [vmem:[#allocation19_spill] sm:$0xff] }
 0x292   :  { %v396_v0 = vadd.f32 %v3358_v37, %v2788_v56 }
 0x293   :  { %v1128_v14 = vmul.f32 %v1126_v11, %v1115_v28 }
 0x295   :  { %v3046_v38 = vadd.f32 %v2351_v58, %v1128_v14 }
 0x297   :  { %v1132_v46 = vpack.c.bf16 %v3046_v38, %v3046_v38  ;;  %v2254_v57 = vpack.c.bf16 %v3046_v38, %v3043_v62 }
 0x299   :  { %2255 = vst [vmem:[#allocation12 + $0x10] sm:$0xff] %v2254_v57   ;;  %v1146_v18 = vunpack.c.l.b16 %v1132_v46 }
 0x29b   :  { %v1147_v26 = vpack.c.b16 %v1146_v18, %v1145_v36 }
 0x29d   :  { %1157 = vmatmul.bf16.vlgmr.msra.gmra.mxu1 %v1147_v26  ;;  %1171 = vmatmul.bf16.vlgmr.msra.gmra.mxu2 %v1147_v26 }
 0x29e   :  { %1185 = vmatmul.bf16.vlgmr.msrb.gmra.mxu3 %v1147_v26  ;;  %1485 = vmatpush.bf16.msra.mxu1 %v2677_v49 }
 0x29f   :  { %1611 = vmatpush.bf16.msra.mxu2 %v2636_v3  ;;  %1625 = vmatpush.bf16.msrb.mxu3 %v2659_v10 }
 0x2a2   :  { %1486 = vmatpush.bf16.msra.mxu1 %v2684_v59 }
 0x2a3   :  { %1612 = vmatpush.bf16.msra.mxu2 %v2639_v7  ;;  %1626 = vmatpush.bf16.msrb.mxu3 %v2663_v21 }
 0x2a6   :  { %1487 = vmatpush.bf16.msra.mxu1 %v2692_v5 }
 0x2a7   :  { %1613 = vmatpush.bf16.msra.mxu2 %v2642_v16  ;;  %1627 = vmatpush.bf16.msrb.mxu3 %v2670_v33 }
 0x2aa   :  { %1488 = vmatpush.bf16.msra.mxu1 %v2699_v15 }
 0x2ab   :  { %1614 = vmatpush.bf16.msra.mxu2 %v2645_v23  ;;  %1628 = vmatpush.bf16.msrb.mxu3 %v2675_v44 }
 0x2ae   :  { %1489 = vmatpush.bf16.msra.mxu1 %v2708_v20 }
 0x2af   :  { %1615 = vmatpush.bf16.msra.mxu2 %v2648_v34  ;;  %1629 = vmatpush.bf16.msrb.mxu3 %v2681_v53 }
 0x2b2   :  { %1490 = vmatpush.bf16.msra.mxu1 %v2715_v22 }
 0x2b3   :  { %1616 = vmatpush.bf16.msra.mxu2 %v2651_v43  ;;  %1630 = vmatpush.bf16.msrb.mxu3 %v2689_v63 }
 0x2b6   :  { %1491 = vmatpush.bf16.msra.mxu1 %v2722_v30 }
 0x2b7   :  { %1617 = vmatpush.bf16.msra.mxu2 %v2654_v55  ;;  %1631 = vmatpush.bf16.msrb.mxu3 %v2696_v12 }
 0x2ba   :  { %1492 = vmatpush.bf16.msra.mxu1 %v2728_v35 }
 0x2bb   :  { %1618 = vmatpush.bf16.msra.mxu2 %v2657_v6  ;;  %1632 = vmatpush.bf16.msrb.mxu3 %v2705_v19 }
 0x31a   :  { %v1158_v51 = vpop.f32.mrf.mxu1 }
 0x31b   :  { %v1191_v1 = vadd.f32 %v1158_v51, %v345_v52 }
 0x31d   :  { %v2165_v4 = vmul.f32 -1.442695, %v1191_v1 }
 0x31f   :  { %2352 = vpow2.f32 %v2165_v4 }
 0x320   :  { %v1172_v32 = vpop.f32.mrf.mxu2 }
 0x321   :  { %v1231_v61 = vadd.f32 %v1172_v32, %v394_v25  ;;  %v1186_v57 = vpop.f32.mrf.mxu3 }
 0x322   :  { %v1160_v41 = vpop.f32.mrf.mxu1 }
 0x323   :  { %v2167_v47 = vmul.f32 -1.442695, %v1231_v61  ;;  %v1192_v2 = vadd.f32 %v1160_v41, %v347_v13 }
 0x325   :  { %v2353_v17 = vpop.eup %2352  ;;  %2354 = vpow2.f32 %v2167_v47  ;;  %v2166_v9 = vmul.f32 -1.442695, %v1192_v2  ;;  %v1271_v47 = vadd.f32 %v2808_v50, %v1186_v57 }
 0x326   :  { %v1199_v60 = vadd.f32 1.0, %v2353_v17 }
 0x327   :  { %2356 = vpow2.f32 %v2166_v9  ;;  %v443_v9 = vadd.f32 %v2987_v24, %v2803_v48 }
 0x328   :  { %2358 = vrcp.f32 %v1199_v60  ;;  %v1174_v45 = vpop.f32.mrf.mxu2  ;;  %v1212_v36 = vand.u32 2147483648, %v1199_v60  ;;  %v1210_v52 = vand.u32 2147483647, %v1199_v60  ;;  %vm1206_vm1 = vweird.f32 %v1199_v60 }
 0x329   :  { %v1232_v31 = vadd.f32 %v1174_v45, %v396_v0 }
 0x32a   :  { %v1213_v32 = vor.u32 1.1754944e-38, %v1212_v36  ;;  %vm1211_vm3 = vcmp.eq.f32.partialorder %v1210_v52, 8.507059e+37 }
 0x32b   :  { %v2355_v58 = vpop.eup %2354  ;;  %v2168_v8 = vmul.f32 -1.442695, %v1232_v31 }
 0x32c   :  { %v3086_v11 = vadd.f32 1.0, %v2355_v58 }
 0x32d   :  { %v2357_v42 = vpop.eup %2356  ;;  %2360 = vpow2.f32 %v2168_v8  ;;  %v1188_v8 = vpop.f32.mrf.mxu3 }
 0x32e   :  { %v2359_v28 = vpop.eup %2358  ;;  %2362 = vrcp.f32 %v3086_v11  ;;  %v1200_v39 = vadd.f32 1.0, %v2357_v42  ;;  %v1252_v36 = vand.u32 2147483648, %v3086_v11  ;;  %vm1246_vm8 = vweird.f32 %v3086_v11 }
 0x32f   :  { %v1202_v14 = vmul.f32 %v2359_v28, %v1199_v60  ;;  %vm1207_vm0 = vweird.f32 %v2359_v28  ;;  %v1250_v52 = vand.u32 2147483647, %v3086_v11 }
 0x330   :  { %2364 = vrcp.f32 %v1200_v39  ;;  %vm1208_vm2 = vmor %vm1206_vm1, %vm1207_vm0  ;;  %v1227_v60 = vand.u32 2147483648, %v1200_v39  ;;  %vm1221_vm6 = vweird.f32 %v1200_v39 }
 0x331   :  { %v1203_v46 = vsub.f32 1.0, %v1202_v14  ;;  %v1225_v14 = vand.u32 2147483647, %v1200_v39  ;;  %vm1251_vm11 = vcmp.eq.f32.partialorder %v1250_v52, 8.507059e+37 }
 0x333   :  { %v2361_v18 = vpop.eup %2360  ;;  %v1204_v26 = vmul.f32 %v2359_v28, %v1203_v46  ;;  %vm1226_vm9 = vcmp.eq.f32.partialorder %v1225_v14, 8.507059e+37 }
 0x334   :  { %v2363_v51 = vpop.eup %2362  ;;  %v3089_v1 = vadd.f32 1.0, %v2361_v18  ;;  %v1228_v18 = vor.u32 1.1754944e-38, %v1227_v60 }
 0x335   :  { %v1242_v4 = vmul.f32 %v2363_v51, %v3086_v11  ;;  %v1205_v25 = vadd.f32 %v2359_v28, %v1204_v26  ;;  %vm1247_vm5 = vweird.f32 %v2363_v51  ;;  %v1272_v26 = vadd.f32 %v2808_v50, %v1188_v8 }
 0x336   :  { %2366 = vrcp.f32 %v3089_v1  ;;  %v2365_v13 = vpop.eup %2364  ;;  %vm1248_vm10 = vmor %vm1246_vm8, %vm1247_vm5  ;;  %vm1261_vm13 = vweird.f32 %v3089_v1 }
 0x337   :  { %v1243_v61 = vsub.f32 1.0, %v1242_v4  ;;  %v1209_v41 = vsel %vm1208_vm2, %v2359_v28, %v1205_v25  ;;  %v1217_v17 = vmul.f32 %v2365_v13, %v1200_v39  ;;  %vm1222_vm4 = vweird.f32 %v2365_v13 }
 0x338   :  { %v1214_v2 = vsel %vm1211_vm3, %v1213_v32, %v1209_v41  ;;  %vm1223_vm7 = vmor %vm1221_vm6, %vm1222_vm4  ;;  %v445_v32 = vadd.f32 %v2989_v29, %v2803_v48  ;;  %v1265_v29 = vand.u32 2147483647, %v3089_v1 }
 0x339   :  { %v1273_v37 = vmul.f32 %v1271_v47, %v1214_v2  ;;  %v1244_v0 = vmul.f32 %v2363_v51, %v1243_v61  ;;  %v1218_v45 = vsub.f32 1.0, %v1217_v17  ;;  %v1253_v47 = vor.u32 1.1754944e-38, %v1252_v36 }
 0x33a   :  { %vm1266_vm15 = vcmp.eq.f32.partialorder %v1265_v29, 8.507059e+37 }
 0x33b   :  { %v1275_v31 = vadd.f32 %v1273_v37, %v443_v9  ;;  %v1219_v42 = vmul.f32 %v2365_v13, %v1218_v45  ;;  %v1245_v46 = vadd.f32 %v2363_v51, %v1244_v0  ;;  %v1267_v0 = vand.u32 2147483648, %v3089_v1 }
 0x33c   :  { %v2367_v58 = vpop.eup %2366 }
 0x33d   :  { %2368 = vtanh.f32 %v1275_v31  ;;  %v1257_v28 = vmul.f32 %v2367_v58, %v3089_v1  ;;  %v1220_v57 = vadd.f32 %v2365_v13, %v1219_v42  ;;  %v1249_v61 = vsel %vm1248_vm10, %v2363_v51, %v1245_v46 }
 0x33e   :  { %v1254_v9 = vsel %vm1251_vm11, %v1253_v47, %v1249_v61  ;;  %vm1262_vm12 = vweird.f32 %v2367_v58  ;;  %v1268_v31 = vor.u32 1.1754944e-38, %v1267_v0 }
 0x33f   :  { %v1258_v24 = vsub.f32 1.0, %v1257_v28  ;;  %v1224_v4 = vsel %vm1223_vm7, %v2365_v13, %v1220_v57  ;;  %vm1263_vm14 = vmor %vm1261_vm13, %vm1262_vm12 }
 0x340   :  { %v1229_v25 = vsel %vm1226_vm9, %v1228_v18, %v1224_v4 }
 0x341   :  { %v1274_v39 = vmul.f32 %v1272_v26, %v1229_v25  ;;  %v1259_v2 = vmul.f32 %v2367_v58, %v1258_v24 }
 0x343   :  { %v2369_v41 = vpop.eup %2368  ;;  %v1276_v50 = vadd.f32 %v1274_v39, %v445_v32  ;;  %v1260_v11 = vadd.f32 %v2367_v58, %v1259_v2 }
 0x344   :  { %v1279_v17 = vsub.f32 %v3043_v62, %v2369_v41 }
 0x345   :  { %2370 = vtanh.f32 %v1276_v50  ;;  %v1264_v51 = vsel %vm1263_vm14, %v2367_v58, %v1260_v11 }
 0x346   :  { %v1281_v37 = vmul.f32 %v1279_v17, %v1254_v9  ;;  %v1269_v60 = vsel %vm1266_vm15, %v1268_v31, %v1264_v51 }
 0x348   :  { %v3104_v13 = vadd.f32 %v2369_v41, %v1281_v37 }
 0x34a   :  { %v1285_v14 = vpack.c.bf16 %v3104_v13, %v3104_v13 }
 0x34b   :  { %v2371_v45 = vpop.eup %2370 }
 0x34c   :  { %v1280_v62 = vsub.f32 %v3046_v38, %v2371_v45  ;;  %v1299_v58 = vunpack.c.l.b16 %v1285_v14 }
 0x34e   :  { %v1282_v8 = vmul.f32 %v1280_v62, %v1269_v60 }
 0x350   :  { %v3110_v42 = vadd.f32 %v2371_v45, %v1282_v8  ;;  %v3163_v8 = vld [vmem:[%s3329_s4] ss:$0 sm:$0xff]  ;;  %s2590_s4 = smov [#allocation12]  }
 0x351   :  { %s1912_s17 = sshll.u32 %s2590_s4, 4  ;;  %s1913_s17 = int_to_ptr.vmem [resolvable:$true] %s1912_s17 }
 0x352   :  { %v2259_v28 = vpack.c.bf16 %v3110_v42, %v3104_v13  ;;  %v1286_v1 = vpack.c.bf16 %v3110_v42, %v3110_v42 }
 0x354   :  { %2260 = vst [vmem:[#allocation12 + $0x18] sm:$0xff] %v2259_v28   ;;  %v1300_v46 = vunpack.c.l.b16 %v1286_v1 }
 0x356   :  { %v1301_v57 = vpack.c.b16 %v1300_v46, %v1299_v58  ;;  %v448_v46 = vadd.f32 %v2991_v27, %v2803_v48 }
 0x358   :  { %1311 = vmatmul.bf16.vlgmr.msrb.gmra.mxu0 %v1301_v57  ;;  %1325 = vmatmul.bf16.vlgmr.msrb.gmra.mxu1 %v1301_v57 }
 0x359   :  { %1339 = vmatmul.bf16.vlgmr.msrb.gmra.mxu2 %v1301_v57  ;;  %1639 = vmatpush.bf16.msrb.mxu0 %v2677_v49 }
 0x35a   :  { %1765 = vmatpush.bf16.msrb.mxu1 %v2636_v3  ;;  %1779 = vmatpush.bf16.msrb.mxu2 %v2659_v10  ;;  %v3359_v3 = vld [vmem:[#allocation17_spill] sm:$0xff] }
 0x35d   :  { %1640 = vmatpush.bf16.msrb.mxu0 %v2684_v59 }
 0x35e   :  { %1766 = vmatpush.bf16.msrb.mxu1 %v2639_v7  ;;  %1780 = vmatpush.bf16.msrb.mxu2 %v2663_v21  ;;  %v350_v7 = vadd.f32 %v3359_v3, %v2783_v40 }
 0x361   :  { %1641 = vmatpush.bf16.msrb.mxu0 %v2692_v5 }
 0x362   :  { %1767 = vmatpush.bf16.msrb.mxu1 %v2642_v16  ;;  %1781 = vmatpush.bf16.msrb.mxu2 %v2670_v33  ;;  %v3360_v16 = vld [vmem:[#allocation21_spill] sm:$0xff] }
 0x365   :  { %1642 = vmatpush.bf16.msrb.mxu0 %v2699_v15 }
 0x366   :  { %1768 = vmatpush.bf16.msrb.mxu1 %v2645_v23  ;;  %1782 = vmatpush.bf16.msrb.mxu2 %v2675_v44  ;;  %v399_v23 = vadd.f32 %v3360_v16, %v2788_v56  ;;  %v3361_v44 = vld [vmem:[#allocation18_spill] sm:$0xff] }
 0x369   :  { %1643 = vmatpush.bf16.msrb.mxu0 %v2708_v20 }
 0x36a   :  { %1769 = vmatpush.bf16.msrb.mxu1 %v2648_v34  ;;  %1783 = vmatpush.bf16.msrb.mxu2 %v2681_v53  ;;  %v352_v53 = vadd.f32 %v3361_v44, %v2783_v40 }
 0x36d   :  { %1644 = vmatpush.bf16.msrb.mxu0 %v2715_v22 }
 0x36e   :  { %1770 = vmatpush.bf16.msrb.mxu1 %v2651_v43  ;;  %1784 = vmatpush.bf16.msrb.mxu2 %v2689_v63 }
 0x371   :  { %1645 = vmatpush.bf16.msrb.mxu0 %v2722_v30 }
 0x372   :  { %1771 = vmatpush.bf16.msrb.mxu1 %v2654_v55  ;;  %1785 = vmatpush.bf16.msrb.mxu2 %v2696_v12 }
 0x375   :  { %1646 = vmatpush.bf16.msrb.mxu0 %v2728_v35 }
 0x376   :  { %1772 = vmatpush.bf16.msrb.mxu1 %v2657_v6  ;;  %1786 = vmatpush.bf16.msrb.mxu2 %v2705_v19  ;;  %v3362_v6 = vld [vmem:[#allocation23_spill] sm:$0xff] }
 0x377   :  { %v401_v63 = vadd.f32 %v3362_v6, %v2788_v56 }
 0x3d5   :  { %v1312_v34 = vpop.f32.mrf.mxu0  ;;  %v1326_v43 = vpop.f32.mrf.mxu1 }
 0x3d6   :  { %v1345_v10 = vadd.f32 %v1312_v34, %v350_v7  ;;  %v1385_v21 = vadd.f32 %v1326_v43, %v399_v23 }
 0x3d8   :  { %v2169_v33 = vmul.f32 -1.442695, %v1345_v10  ;;  %v2171_v55 = vmul.f32 -1.442695, %v1385_v21 }
 0x3da   :  { %2372 = vpow2.f32 %v2169_v33 }
 0x3db   :  { %2374 = vpow2.f32 %v2171_v55 }
 0x3dc   :  { %v1340_v37 = vpop.f32.mrf.mxu2 }
 0x3dd   :  { %v1314_v12 = vpop.f32.mrf.mxu0  ;;  %v1328_v19 = vpop.f32.mrf.mxu1  ;;  %v1425_v14 = vadd.f32 %v3163_v8, %v1340_v37 }
 0x3de   :  { %v1346_v38 = vadd.f32 %v1314_v12, %v352_v53  ;;  %v1386_v36 = vadd.f32 %v1328_v19, %v401_v63 }
 0x3e0   :  { %v2373_v24 = vpop.eup %2372  ;;  %v2170_v18 = vmul.f32 -1.442695, %v1346_v38  ;;  %v2172_v4 = vmul.f32 -1.442695, %v1386_v36  ;;  %v450_v38 = vadd.f32 %v2993_v54, %v2803_v48 }
 0x3e1   :  { %v2375_v26 = vpop.eup %2374  ;;  %v1353_v52 = vadd.f32 1.0, %v2373_v24 }
 0x3e2   :  { %v3150_v25 = vadd.f32 1.0, %v2375_v26  ;;  %2376 = vpow2.f32 %v2170_v18 }
 0x3e3   :  { %2378 = vrcp.f32 %v1353_v52  ;;  %v1366_v11 = vand.u32 2147483648, %v1353_v52  ;;  %v1364_v29 = vand.u32 2147483647, %v1353_v52  ;;  %vm1360_vm1 = vweird.f32 %v1353_v52 }
 0x3e4   :  { %2380 = vrcp.f32 %v3150_v25  ;;  %v1342_v21 = vpop.f32.mrf.mxu2  ;;  %v1406_v53 = vand.u32 2147483648, %v3150_v25  ;;  %vm1400_vm9 = vweird.f32 %v3150_v25  ;;  %v1404_v12 = vand.u32 2147483647, %v3150_v25 }
 0x3e5   :  { %2382 = vpow2.f32 %v2172_v4  ;;  %v1367_v62 = vor.u32 1.1754944e-38, %v1366_v11  ;;  %vm1365_vm3 = vcmp.eq.f32.partialorder %v1364_v29, 8.507059e+37  ;;  %v1426_v63 = vadd.f32 %v3163_v8, %v1342_v21 }
 0x3e6   :  { %vm1405_vm11 = vcmp.eq.f32.partialorder %v1404_v12, 8.507059e+37 }
 0x3e8   :  { %v2377_v32 = vpop.eup %2376 }
 0x3e9   :  { %v2379_v61 = vpop.eup %2378  ;;  %v1354_v39 = vadd.f32 1.0, %v2377_v32 }
 0x3ea   :  { %v3153_v41 = vpop.eup %2380  ;;  %v1356_v47 = vmul.f32 %v2379_v61, %v1353_v52  ;;  %vm1361_vm0 = vweird.f32 %v2379_v61  ;;  %v1407_v52 = vor.u32 1.1754944e-38, %v1406_v53 }
 0x3eb   :  { %v2383_v2 = vpop.eup %2382  ;;  %2384 = vrcp.f32 %v1354_v39  ;;  %v1396_v9 = vmul.f32 %v3153_v41, %v3150_v25  ;;  %vm1362_vm2 = vmor %vm1360_vm1, %vm1361_vm0  ;;  %v1381_v23 = vand.u32 2147483648, %v1354_v39  ;;  %v1379_v10 = vand.u32 2147483647, %v1354_v39 }
 0x3ec   :  { %v1357_v17 = vsub.f32 1.0, %v1356_v47  ;;  %v3155_v50 = vadd.f32 1.0, %v2383_v2  ;;  %vm1375_vm5 = vweird.f32 %v1354_v39  ;;  %vm1401_vm6 = vweird.f32 %v3153_v41 }
 0x3ed   :  { %v1397_v31 = vsub.f32 1.0, %v1396_v9  ;;  %v1382_v44 = vor.u32 1.1754944e-38, %v1381_v23  ;;  %vm1380_vm8 = vcmp.eq.f32.partialorder %v1379_v10, 8.507059e+37  ;;  %vm1402_vm10 = vmor %vm1400_vm9, %vm1401_vm6 }
 0x3ee   :  { %v1358_v0 = vmul.f32 %v2379_v61, %v1357_v17  ;;  %2386 = vrcp.f32 %v3155_v50  ;;  %v1421_v25 = vand.u32 2147483648, %v3155_v50  ;;  %vm1415_vm13 = vweird.f32 %v3155_v50 }
 0x3ef   :  { %v1398_v7 = vmul.f32 %v3153_v41, %v1397_v31  ;;  %v1419_v54 = vand.u32 2147483647, %v3155_v50 }
 0x3f0   :  { %v1359_v51 = vadd.f32 %v2379_v61, %v1358_v0  ;;  %v1422_v9 = vor.u32 1.1754944e-38, %v1421_v25 }
 0x3f1   :  { %v2385_v45 = vpop.eup %2384  ;;  %v1399_v55 = vadd.f32 %v3153_v41, %v1398_v7  ;;  %vm1420_vm15 = vcmp.eq.f32.partialorder %v1419_v54, 8.507059e+37 }
 0x3f2   :  { %v1363_v60 = vsel %vm1362_vm2, %v2379_v61, %v1359_v51  ;;  %v1371_v28 = vmul.f32 %v2385_v45, %v1354_v39  ;;  %vm1376_vm4 = vweird.f32 %v2385_v45 }
 0x3f3   :  { %v1368_v1 = vsel %vm1365_vm3, %v1367_v62, %v1363_v60  ;;  %vm1377_vm7 = vmor %vm1375_vm5, %vm1376_vm4  ;;  %v1403_v24 = vsel %vm1402_vm10, %v3153_v41, %v1399_v55 }
 0x3f4   :  { %v2387_v58 = vpop.eup %2386  ;;  %v1427_v57 = vmul.f32 %v1425_v14, %v1368_v1  ;;  %v1372_v3 = vsub.f32 1.0, %v1371_v28  ;;  %v1408_v61 = vsel %vm1405_vm11, %v1407_v52, %v1403_v24 }
 0x3f5   :  { %v1411_v16 = vmul.f32 %v2387_v58, %v3155_v50  ;;  %vm1416_vm12 = vweird.f32 %v2387_v58 }
 0x3f6   :  { %v1429_v34 = vadd.f32 %v1427_v57, %v448_v46  ;;  %v1373_v43 = vmul.f32 %v2385_v45, %v1372_v3  ;;  %vm1417_vm14 = vmor %vm1415_vm13, %vm1416_vm12  ;;  %v3366_v57 = vld [vmem:[#allocation22_spill] sm:$0xff] }
 0x3f7   :  { %v1412_v27 = vsub.f32 1.0, %v1411_v16  ;;  %v357_v3 = vadd.f32 %v3366_v57, %v2783_v40 }
 0x3f8   :  { %2388 = vtanh.f32 %v1429_v34  ;;  %v1374_v33 = vadd.f32 %v2385_v45, %v1373_v43 }
 0x3f9   :  { %v1413_v18 = vmul.f32 %v2387_v58, %v1412_v27 }
 0x3fa   :  { %v1378_v6 = vsel %vm1377_vm7, %v2385_v45, %v1374_v33 }
 0x3fb   :  { %v1383_v19 = vsel %vm1380_vm8, %v1382_v44, %v1378_v6  ;;  %v1414_v47 = vadd.f32 %v2387_v58, %v1413_v18 }
 0x3fc   :  { %v1428_v36 = vmul.f32 %v1426_v63, %v1383_v19 }
 0x3fd   :  { %v1418_v41 = vsel %vm1417_vm14, %v2387_v58, %v1414_v47 }
 0x3fe   :  { %v2389_v26 = vpop.eup %2388  ;;  %v1430_v4 = vadd.f32 %v1428_v36, %v450_v38  ;;  %v1423_v37 = vsel %vm1420_vm15, %v1422_v9, %v1418_v41  ;;  %v3367_v41 = vld [vmem:[#allocation34_spill] sm:$0xff] }
 0x3ff   :  { %v1433_v32 = vsub.f32 %v3104_v13, %v2389_v26 }
 0x400   :  { %2390 = vtanh.f32 %v1430_v4 }
 0x401   :  { %v1435_v39 = vmul.f32 %v1433_v32, %v1408_v61 }
 0x403   :  { %v3181_v2 = vadd.f32 %v2389_v26, %v1435_v39 }
 0x405   :  { %v1439_v29 = vpack.c.bf16 %v3181_v2, %v3181_v2 }
 0x406   :  { %v2391_v17 = vpop.eup %2390 }
 0x407   :  { %v1434_v13 = vsub.f32 %v3110_v42, %v2391_v17  ;;  %v1453_v45 = vunpack.c.l.b16 %v1439_v29  ;;  %v3363_v42 = vld [vmem:[#allocation25_spill] sm:$0xff] }
 0x408   :  { %v404_v60 = vadd.f32 %v3363_v42, %v2788_v56 }
 0x409   :  { %v1436_v11 = vmul.f32 %v1434_v13, %v1423_v37 }
 0x40b   :  { %v3186_v0 = vadd.f32 %v2391_v17, %v1436_v11  ;;  %v453_v17 = vadd.f32 %v3367_v41, %v2803_v48  ;;  %v3372_v41 = vld [vmem:[#allocation31_spill] sm:$0xff] }
 0x40d   :  { %v2264_v51 = vpack.c.bf16 %v3186_v0, %v3181_v2  ;;  %v1440_v50 = vpack.c.bf16 %v3186_v0, %v3186_v0 }
 0x40f   :  { %2265 = vst [vmem:[#allocation12 + $0x20] sm:$0xff] %v2264_v51   ;;  %v1454_v31 = vunpack.c.l.b16 %v1440_v50 }
 0x411   :  { %v1455_v62 = vpack.c.b16 %v1454_v31, %v1453_v45 }
 0x413   :  { %1465 = vmatmul.bf16.vlgmr.msra.gmra.mxu3 %v1455_v62  ;;  %1479 = vmatmul.bf16.vlgmr.msra.gmra.mxu0 %v1455_v62 }
 0x414   :  { %1493 = vmatmul.bf16.vlgmr.msra.gmra.mxu1 %v1455_v62  ;;  %1793 = vmatpush.bf16.msra.mxu3 %v2677_v49 }
 0x418   :  { %1794 = vmatpush.bf16.msra.mxu3 %v2684_v59  ;;  %v3364_v59 = vld [vmem:[#allocation20_spill] sm:$0xff] }
 0x419   :  { %v355_v1 = vadd.f32 %v3364_v59, %v2783_v40 }
 0x41c   :  { %1795 = vmatpush.bf16.msra.mxu3 %v2692_v5 }
 0x420   :  { %1796 = vmatpush.bf16.msra.mxu3 %v2699_v15  ;;  %v3365_v15 = vld [vmem:[#allocation27_spill] sm:$0xff] }
 0x421   :  { %v406_v58 = vadd.f32 %v3365_v15, %v2788_v56  ;;  %v3368_v15 = vld [vmem:[#allocation35_spill] sm:$0xff] }
 0x424   :  { %1797 = vmatpush.bf16.msra.mxu3 %v2708_v20 }
 0x428   :  { %1798 = vmatpush.bf16.msra.mxu3 %v2715_v22 }
 0x42c   :  { %1799 = vmatpush.bf16.msra.mxu3 %v2722_v30 }
 0x430   :  { %1800 = vmatpush.bf16.msra.mxu3 %v2728_v35 }
 0x490   :  { %v1480_v14 = vpop.f32.mrf.mxu0 }
 0x491   :  { %v1539_v28 = vadd.f32 %v1480_v14, %v404_v60  ;;  %v1494_v38 = vpop.f32.mrf.mxu1 }
 0x492   :  { %v1579_v39 = vadd.f32 %v3163_v8, %v1494_v38 }
 0x493   :  { %v2175_v49 = vmul.f32 -1.442695, %v1539_v28 }
 0x495   :  { %2392 = vpow2.f32 %v2175_v49 }
 0x496   :  { %v1466_v5 = vpop.f32.mrf.mxu3 }
 0x497   :  { %v1499_v20 = vadd.f32 %v1466_v5, %v355_v1 }
 0x498   :  { %v1482_v22 = vpop.f32.mrf.mxu0 }
 0x499   :  { %v2173_v46 = vmul.f32 -1.442695, %v1499_v20  ;;  %v1540_v30 = vadd.f32 %v1482_v22, %v406_v58  ;;  %v1496_v31 = vpop.f32.mrf.mxu1  ;;  %v455_v58 = vadd.f32 %v3368_v15, %v2803_v48 }
 0x49a   :  { %v1580_v49 = vadd.f32 %v3163_v8, %v1496_v31 }
 0x49b   :  { %2394 = vpow2.f32 %v2173_v46  ;;  %v2176_v35 = vmul.f32 -1.442695, %v1540_v30  ;;  %v2393_v7 = vpop.eup %2392 }
 0x49c   :  { %v3210_v43 = vadd.f32 1.0, %v2393_v7 }
 0x49d   :  { %2396 = vpow2.f32 %v2176_v35 }
 0x49e   :  { %v1468_v16 = vpop.f32.mrf.mxu3  ;;  %v1560_v28 = vand.u32 2147483648, %v3210_v43  ;;  %vm1554_vm9 = vweird.f32 %v3210_v43  ;;  %v1558_v1 = vand.u32 2147483647, %v3210_v43 }
 0x49f   :  { %v1500_v23 = vadd.f32 %v1468_v16, %v357_v3 }
 0x4a0   :  { %v1561_v35 = vor.u32 1.1754944e-38, %v1560_v28  ;;  %vm1559_vm11 = vcmp.eq.f32.partialorder %v1558_v1, 8.507059e+37 }
 0x4a1   :  { %v2395_v34 = vpop.eup %2394  ;;  %v2174_v10 = vmul.f32 -1.442695, %v1500_v23 }
 0x4a2   :  { %v1507_v21 = vadd.f32 1.0, %v2395_v34 }
 0x4a3   :  { %2398 = vpow2.f32 %v2174_v10  ;;  %v2397_v33 = vpop.eup %2396 }
 0x4a4   :  { %2400 = vrcp.f32 %v1507_v21  ;;  %v3213_v27 = vadd.f32 1.0, %v2397_v33  ;;  %v1520_v36 = vand.u32 2147483648, %v1507_v21  ;;  %v1518_v18 = vand.u32 2147483647, %v1507_v21 }
 0x4a5   :  { %2402 = vrcp.f32 %v3210_v43  ;;  %vm1514_vm1 = vweird.f32 %v1507_v21 }
 0x4a6   :  { %v1521_v32 = vor.u32 1.1754944e-38, %v1520_v36  ;;  %vm1519_vm3 = vcmp.eq.f32.partialorder %v1518_v18, 8.507059e+37  ;;  %v1575_v34 = vand.u32 2147483648, %v3213_v27  ;;  %vm1569_vm13 = vweird.f32 %v3213_v27  ;;  %v3370_v18 = vld [vmem:[#allocation29_spill] sm:$0xff] }
 0x4a9   :  { %v2399_v55 = vpop.eup %2398 }
 0x4aa   :  { %v2401_v44 = vpop.eup %2400  ;;  %v1508_v53 = vadd.f32 1.0, %v2399_v55  ;;  %v1576_v55 = vor.u32 1.1754944e-38, %v1575_v34 }
 0x4ab   :  { %v2403_v6 = vpop.eup %2402  ;;  %v1510_v63 = vmul.f32 %v2401_v44, %v1507_v21  ;;  %vm1515_vm0 = vweird.f32 %v2401_v44 }
 0x4ac   :  { %2404 = vrcp.f32 %v1508_v53  ;;  %v1550_v19 = vmul.f32 %v2403_v6, %v3210_v43  ;;  %vm1516_vm2 = vmor %vm1514_vm1, %vm1515_vm0  ;;  %v1535_v29 = vand.u32 2147483648, %v1508_v53  ;;  %v1533_v45 = vand.u32 2147483647, %v1508_v53 }
 0x4ad   :  { %v1511_v12 = vsub.f32 1.0, %v1510_v63  ;;  %2406 = vrcp.f32 %v3213_v27  ;;  %vm1529_vm5 = vweird.f32 %v1508_v53  ;;  %vm1555_vm6 = vweird.f32 %v2403_v6 }
 0x4ae   :  { %v1551_v4 = vsub.f32 1.0, %v1550_v19  ;;  %v1536_v14 = vor.u32 1.1754944e-38, %v1535_v29  ;;  %vm1534_vm8 = vcmp.eq.f32.partialorder %v1533_v45, 8.507059e+37  ;;  %vm1556_vm10 = vmor %vm1554_vm9, %vm1555_vm6  ;;  %v1573_v43 = vand.u32 2147483647, %v3213_v27 }
 0x4af   :  { %v1512_v24 = vmul.f32 %v2401_v44, %v1511_v12 }
 0x4b0   :  { %v1552_v37 = vmul.f32 %v2403_v6, %v1551_v4  ;;  %vm1574_vm15 = vcmp.eq.f32.partialorder %v1573_v43, 8.507059e+37 }
 0x4b1   :  { %v1513_v26 = vadd.f32 %v2401_v44, %v1512_v24 }
 0x4b2   :  { %v2405_v52 = vpop.eup %2404  ;;  %v1553_v42 = vadd.f32 %v2403_v6, %v1552_v37 }
 0x4b3   :  { %v2407_v61 = vpop.eup %2406  ;;  %v1517_v47 = vsel %vm1516_vm2, %v2401_v44, %v1513_v26  ;;  %v1525_v25 = vmul.f32 %v2405_v52, %v1508_v53  ;;  %vm1530_vm4 = vweird.f32 %v2405_v52  ;;  %v409_v26 = vadd.f32 %v3370_v18, %v2788_v56 }
 0x4b4   :  { %v1522_v54 = vsel %vm1519_vm3, %v1521_v32, %v1517_v47  ;;  %v1565_v11 = vmul.f32 %v2407_v61, %v3213_v27  ;;  %vm1531_vm7 = vmor %vm1529_vm5, %vm1530_vm4  ;;  %v1557_v22 = vsel %vm1556_vm10, %v2403_v6, %v1553_v42  ;;  %vm1570_vm12 = vweird.f32 %v2407_v61 }
 0x4b5   :  { %v1581_v9 = vmul.f32 %v1579_v39, %v1522_v54  ;;  %v1526_v13 = vsub.f32 1.0, %v1525_v25  ;;  %v1562_v7 = vsel %vm1559_vm11, %v1561_v35, %v1557_v22  ;;  %vm1571_vm14 = vmor %vm1569_vm13, %vm1570_vm12  ;;  %v3371_v25 = vld [vmem:[#allocation26_spill] sm:$0xff] }
 0x4b6   :  { %v1566_v60 = vsub.f32 1.0, %v1565_v11  ;;  %v362_v54 = vadd.f32 %v3371_v25, %v2783_v40 }
 0x4b7   :  { %v1583_v51 = vadd.f32 %v1581_v9, %v453_v17  ;;  %v1527_v50 = vmul.f32 %v2405_v52, %v1526_v13  ;;  %v411_v17 = vadd.f32 %v3372_v41, %v2788_v56 }
 0x4b8   :  { %v1567_v46 = vmul.f32 %v2407_v61, %v1566_v60 }
 0x4b9   :  { %v1528_v62 = vadd.f32 %v2405_v52, %v1527_v50  ;;  %2408 = vtanh.f32 %v1583_v51 }
 0x4ba   :  { %v1568_v16 = vadd.f32 %v2407_v61, %v1567_v46 }
 0x4bb   :  { %v1532_v59 = vsel %vm1531_vm7, %v2405_v52, %v1528_v62 }
 0x4bc   :  { %v1537_v5 = vsel %vm1534_vm8, %v1536_v14, %v1532_v59  ;;  %v1572_v21 = vsel %vm1571_vm14, %v2407_v61, %v1568_v16 }
 0x4bd   :  { %v1582_v20 = vmul.f32 %v1580_v49, %v1537_v5  ;;  %v1577_v44 = vsel %vm1574_vm15, %v1576_v55, %v1572_v21  ;;  %v3373_v21 = vld [vmem:[#allocation36_spill] sm:$0xff] }
 0x4bf   :  { %v2409_v30 = vpop.eup %2408  ;;  %v1584_v57 = vadd.f32 %v1582_v20, %v455_v58 }
 0x4c0   :  { %v1587_v3 = vsub.f32 %v3181_v2, %v2409_v30 }
 0x4c1   :  { %2410 = vtanh.f32 %v1584_v57 }
 0x4c2   :  { %v1589_v23 = vmul.f32 %v1587_v3, %v1562_v7 }
 0x4c4   :  { %v3231_v10 = vadd.f32 %v2409_v30, %v1589_v23 }
 0x4c6   :  { %v1593_v63 = vpack.c.bf16 %v3231_v10, %v3231_v10 }
 0x4c7   :  { %v2411_v33 = vpop.eup %2410 }
 0x4c8   :  { %v1588_v2 = vsub.f32 %v3186_v0, %v2411_v33  ;;  %v1607_v19 = vunpack.c.l.b16 %v1593_v63  ;;  %v3369_v0 = vld [vmem:[#allocation24_spill] sm:$0xff] }
 0x4c9   :  { %v360_v24 = vadd.f32 %v3369_v0, %v2783_v40 }
 0x4ca   :  { %v1590_v53 = vmul.f32 %v1588_v2, %v1577_v44 }
 0x4cc   :  { %v3234_v6 = vadd.f32 %v2411_v33, %v1590_v53  ;;  %v458_v33 = vadd.f32 %v3373_v21, %v2803_v48 }
 0x4ce   :  { %v1594_v12 = vpack.c.bf16 %v3234_v6, %v3234_v6  ;;  %v2269_v27 = vpack.c.bf16 %v3234_v6, %v3231_v10 }
 0x4d0   :  { %2270 = vst [vmem:[#allocation12 + $0x28] sm:$0xff] %v2269_v27   ;;  %v1608_v38 = vunpack.c.l.b16 %v1594_v12 }
 0x4d2   :  { %v1609_v36 = vpack.c.b16 %v1608_v38, %v1607_v19 }
 0x4d4   :  { %1619 = vmatmul.bf16.vlgmr.msra.gmra.mxu2 %v1609_v36  ;;  %1633 = vmatmul.bf16.vlgmr.msrb.gmra.mxu3 %v1609_v36 }
 0x4d5   :  { %1647 = vmatmul.bf16.vlgmr.msrb.gmra.mxu0 %v1609_v36 }
 0x552   :  { %v1648_v15 = vpop.f32.mrf.mxu0 }
 0x553   :  { %v1733_v7 = vadd.f32 %v3163_v8, %v1648_v15 }
 0x557   :  { %v1620_v52 = vpop.f32.mrf.mxu2  ;;  %v1634_v4 = vpop.f32.mrf.mxu3 }
 0x558   :  { %v1653_v32 = vadd.f32 %v1620_v52, %v360_v24  ;;  %v1693_v61 = vadd.f32 %v1634_v4, %v409_v26 }
 0x55a   :  { %v2177_v39 = vmul.f32 -1.442695, %v1653_v32  ;;  %v2179_v47 = vmul.f32 -1.442695, %v1693_v61  ;;  %v1650_v38 = vpop.f32.mrf.mxu0 }
 0x55b   :  { %v1734_v52 = vadd.f32 %v3163_v8, %v1650_v38 }
 0x55c   :  { %2412 = vpow2.f32 %v2177_v39  ;;  %v3374_v39 = vld [vmem:[#allocation37_spill] sm:$0xff] }
 0x55d   :  { %2414 = vpow2.f32 %v2179_v47  ;;  %v460_v47 = vadd.f32 %v3374_v39, %v2803_v48 }
 0x55f   :  { %v1622_v9 = vpop.f32.mrf.mxu2  ;;  %v1636_v13 = vpop.f32.mrf.mxu3 }
 0x560   :  { %v1654_v37 = vadd.f32 %v1622_v9, %v362_v54  ;;  %v1694_v11 = vadd.f32 %v1636_v13, %v411_v17 }
 0x562   :  { %v2413_v29 = vpop.eup %2412  ;;  %v2178_v51 = vmul.f32 -1.442695, %v1654_v37  ;;  %v2180_v31 = vmul.f32 -1.442695, %v1694_v11 }
 0x563   :  { %v2415_v50 = vpop.eup %2414  ;;  %v1661_v45 = vadd.f32 1.0, %v2413_v29 }
 0x564   :  { %v3250_v62 = vadd.f32 1.0, %v2415_v50  ;;  %2416 = vpow2.f32 %v2178_v51 }
 0x565   :  { %2418 = vrcp.f32 %v1661_v45  ;;  %v1674_v58 = vand.u32 2147483648, %v1661_v45  ;;  %v1672_v46 = vand.u32 2147483647, %v1661_v45  ;;  %vm1668_vm1 = vweird.f32 %v1661_v45 }
 0x566   :  { %2420 = vrcp.f32 %v3250_v62  ;;  %v1714_v26 = vand.u32 2147483648, %v3250_v62  ;;  %vm1708_vm9 = vweird.f32 %v3250_v62  ;;  %v1712_v32 = vand.u32 2147483647, %v3250_v62 }
 0x567   :  { %2422 = vpow2.f32 %v2180_v31  ;;  %v1675_v57 = vor.u32 1.1754944e-38, %v1674_v58  ;;  %vm1673_vm3 = vcmp.eq.f32.partialorder %v1672_v46, 8.507059e+37 }
 0x568   :  { %v1715_v9 = vor.u32 1.1754944e-38, %v1714_v26  ;;  %vm1713_vm11 = vcmp.eq.f32.partialorder %v1712_v32, 8.507059e+37 }
 0x56a   :  { %v2417_v42 = vpop.eup %2416 }
 0x56b   :  { %v2419_v60 = vpop.eup %2418  ;;  %v1662_v14 = vadd.f32 1.0, %v2417_v42 }
 0x56c   :  { %v3253_v28 = vpop.eup %2420  ;;  %v1664_v49 = vmul.f32 %v2419_v60, %v1661_v45  ;;  %vm1669_vm0 = vweird.f32 %v2419_v60 }
 0x56d   :  { %v2423_v59 = vpop.eup %2422  ;;  %2424 = vrcp.f32 %v1662_v14  ;;  %v1704_v20 = vmul.f32 %v3253_v28, %v3250_v62  ;;  %vm1670_vm2 = vmor %vm1668_vm1, %vm1669_vm0  ;;  %v1689_v53 = vand.u32 2147483648, %v1662_v14  ;;  %v1687_v19 = vand.u32 2147483647, %v1662_v14 }
 0x56e   :  { %v1665_v1 = vsub.f32 1.0, %v1664_v49  ;;  %v3255_v5 = vadd.f32 1.0, %v2423_v59  ;;  %vm1683_vm5 = vweird.f32 %v1662_v14  ;;  %vm1709_vm6 = vweird.f32 %v3253_v28 }
 0x56f   :  { %v1705_v3 = vsub.f32 1.0, %v1704_v20  ;;  %v1690_v24 = vor.u32 1.1754944e-38, %v1689_v53  ;;  %vm1688_vm8 = vcmp.eq.f32.partialorder %v1687_v19, 8.507059e+37  ;;  %vm1710_vm10 = vmor %vm1708_vm9, %vm1709_vm6  ;;  %v3378_v53 = vld [vmem:[#allocation33_spill] sm:$0xff] }
 0x570   :  { %v1666_v22 = vmul.f32 %v2419_v60, %v1665_v1  ;;  %2426 = vrcp.f32 %v3255_v5  ;;  %v1729_v50 = vand.u32 2147483648, %v3255_v5  ;;  %vm1723_vm13 = vweird.f32 %v3255_v5 }
 0x571   :  { %v1706_v44 = vmul.f32 %v3253_v28, %v1705_v3  ;;  %v1727_v45 = vand.u32 2147483647, %v3255_v5 }
 0x572   :  { %v1667_v30 = vadd.f32 %v2419_v60, %v1666_v22 }
 0x573   :  { %v2425_v35 = vpop.eup %2424  ;;  %v1707_v0 = vadd.f32 %v3253_v28, %v1706_v44  ;;  %vm1728_vm15 = vcmp.eq.f32.partialorder %v1727_v45, 8.507059e+37 }
 0x574   :  { %v1671_v16 = vsel %vm1670_vm2, %v2419_v60, %v1667_v30  ;;  %v1679_v23 = vmul.f32 %v2425_v35, %v1662_v14  ;;  %vm1684_vm4 = vweird.f32 %v2425_v35  ;;  %v1730_v60 = vor.u32 1.1754944e-38, %v1729_v50 }
 0x575   :  { %v1676_v34 = vsel %vm1673_vm3, %v1675_v57, %v1671_v16  ;;  %vm1685_vm7 = vmor %vm1683_vm5, %vm1684_vm4  ;;  %v1711_v54 = vsel %vm1710_vm10, %v3253_v28, %v1707_v0  ;;  %v3376_v57 = vld [vmem:[#allocation32_spill] sm:$0xff]  ;;  %v3377_v16 = vld [vmem:[#allocation30_spill] sm:$0xff] }
 0x576   :  { %v2427_v43 = vpop.eup %2426  ;;  %v1735_v55 = vmul.f32 %v1733_v7, %v1676_v34  ;;  %v1680_v2 = vsub.f32 1.0, %v1679_v23  ;;  %v1716_v11 = vsel %vm1713_vm11, %v1715_v9, %v1711_v54  ;;  %v414_v3 = vadd.f32 %v3376_v57, %v2788_v56 }
 0x577   :  { %v1719_v63 = vmul.f32 %v2427_v43, %v3255_v5  ;;  %vm1724_vm12 = vweird.f32 %v2427_v43  ;;  %v367_v23 = vadd.f32 %v3377_v16, %v2783_v40 }
 0x578   :  { %v1737_v12 = vadd.f32 %v1735_v55, %v458_v33  ;;  %v1681_v27 = vmul.f32 %v2425_v35, %v1680_v2  ;;  %vm1725_vm14 = vmor %vm1723_vm13, %vm1724_vm12 }
 0x579   :  { %v1720_v18 = vsub.f32 1.0, %v1719_v63  ;;  %v416_v63 = vadd.f32 %v3378_v53, %v2788_v56 }
 0x57a   :  { %2428 = vtanh.f32 %v1737_v12  ;;  %v1682_v36 = vadd.f32 %v2425_v35, %v1681_v27 }
 0x57b   :  { %v1721_v41 = vmul.f32 %v2427_v43, %v1720_v18 }
 0x57c   :  { %v1686_v4 = vsel %vm1685_vm7, %v2425_v35, %v1682_v36 }
 0x57d   :  { %v1691_v61 = vsel %vm1688_vm8, %v1690_v24, %v1686_v4  ;;  %v1722_v51 = vadd.f32 %v2427_v43, %v1721_v41 }
 0x57e   :  { %v1736_v25 = vmul.f32 %v1734_v52, %v1691_v61 }
 0x57f   :  { %v1726_v62 = vsel %vm1725_vm14, %v2427_v43, %v1722_v51  ;;  %v3379_v51 = vld [vmem:[#allocation38_spill] sm:$0xff] }
 0x580   :  { %v2429_v17 = vpop.eup %2428  ;;  %v1738_v13 = vadd.f32 %v1736_v25, %v460_v47  ;;  %v1731_v14 = vsel %vm1728_vm15, %v1730_v60, %v1726_v62  ;;  %v463_v50 = vadd.f32 %v3379_v51, %v2803_v48 }
 0x581   :  { %v1741_v37 = vsub.f32 %v3231_v10, %v2429_v17 }
 0x582   :  { %2430 = vtanh.f32 %v1738_v13 }
 0x583   :  { %v1743_v29 = vmul.f32 %v1741_v37, %v1716_v11 }
 0x585   :  { %v3278_v31 = vadd.f32 %v2429_v17, %v1743_v29 }
 0x587   :  { %v1747_v59 = vpack.c.bf16 %v3278_v31, %v3278_v31 }
 0x588   :  { %v2431_v42 = vpop.eup %2430 }
 0x589   :  { %v1742_v10 = vsub.f32 %v3234_v6, %v2431_v42  ;;  %v1761_v15 = vunpack.c.l.b16 %v1747_v59  ;;  %v3375_v6 = vld [vmem:[#allocation28_spill] sm:$0xff] }
 0x58a   :  { %v365_v22 = vadd.f32 %v3375_v6, %v2783_v40 }
 0x58b   :  { %v1744_v28 = vmul.f32 %v1742_v10, %v1731_v14 }
 0x58d   :  { %v3281_v49 = vadd.f32 %v2431_v42, %v1744_v28 }
 0x58f   :  { %v1748_v1 = vpack.c.bf16 %v3281_v49, %v3281_v49  ;;  %v2274_v5 = vpack.c.bf16 %v3281_v49, %v3278_v31 }
 0x591   :  { %2275 = vst [vmem:[#allocation12 + $0x30] sm:$0xff] %v2274_v5   ;;  %v1762_v58 = vunpack.c.l.b16 %v1748_v1 }
 0x593   :  { %v1763_v20 = vpack.c.b16 %v1762_v58, %v1761_v15 }
 0x595   :  { %1773 = vmatmul.bf16.vlgmr.msrb.gmra.mxu1 %v1763_v20  ;;  %1787 = vmatmul.bf16.vlgmr.msrb.gmra.mxu2 %v1763_v20 }
 0x596   :  { %1801 = vmatmul.bf16.vlgmr.msra.gmra.mxu3 %v1763_v20 }
 0x612   :  { %v1774_v46 = vpop.f32.mrf.mxu1 }
 0x613   :  { %v1807_v30 = vadd.f32 %v1774_v46, %v365_v22 }
 0x615   :  { %v2181_v35 = vmul.f32 -1.442695, %v1807_v30 }
 0x617   :  { %2432 = vpow2.f32 %v2181_v35 }
 0x618   :  { %v1788_v7 = vpop.f32.mrf.mxu2 }
 0x619   :  { %v1847_v34 = vadd.f32 %v1788_v7, %v414_v3  ;;  %v1802_v52 = vpop.f32.mrf.mxu3  ;;  %v3380_v3 = vld [vmem:[#allocation39_spill] sm:$0xff] }
 0x61a   :  { %v1776_v43 = vpop.f32.mrf.mxu1  ;;  %v1887_v37 = vadd.f32 %v3163_v8, %v1802_v52  ;;  %v465_v7 = vadd.f32 %v3380_v3, %v2803_v48 }
 0x61b   :  { %v2183_v21 = vmul.f32 -1.442695, %v1847_v34  ;;  %v1808_v33 = vadd.f32 %v1776_v43, %v367_v23 }
 0x61d   :  { %v2433_v55 = vpop.eup %2432  ;;  %2434 = vpow2.f32 %v2183_v21  ;;  %v2182_v2 = vmul.f32 -1.442695, %v1808_v33 }
 0x61e   :  { %v1815_v44 = vadd.f32 1.0, %v2433_v55 }
 0x61f   :  { %2436 = vpow2.f32 %v2182_v2 }
 0x620   :  { %2438 = vrcp.f32 %v1815_v44  ;;  %v1790_v12 = vpop.f32.mrf.mxu2  ;;  %v1828_v4 = vand.u32 2147483648, %v1815_v44  ;;  %v1826_v61 = vand.u32 2147483647, %v1815_v44  ;;  %vm1822_vm1 = vweird.f32 %v1815_v44 }
 0x621   :  { %v1848_v27 = vadd.f32 %v1790_v12, %v416_v63  ;;  %v1804_v28 = vpop.f32.mrf.mxu3 }
 0x622   :  { %v1829_v41 = vor.u32 1.1754944e-38, %v1828_v4  ;;  %vm1827_vm3 = vcmp.eq.f32.partialorder %v1826_v61, 8.507059e+37  ;;  %v1888_v46 = vadd.f32 %v3163_v8, %v1804_v28 }
 0x623   :  { %v2435_v19 = vpop.eup %2434  ;;  %v2184_v38 = vmul.f32 -1.442695, %v1848_v27 }
 0x624   :  { %v3297_v36 = vadd.f32 1.0, %v2435_v19 }
 0x625   :  { %v2437_v40 = vpop.eup %2436  ;;  %2440 = vpow2.f32 %v2184_v38 }
 0x626   :  { %v2439_v0 = vpop.eup %2438  ;;  %2442 = vrcp.f32 %v3297_v36  ;;  %v1816_v18 = vadd.f32 1.0, %v2437_v40  ;;  %v1868_v20 = vand.u32 2147483648, %v3297_v36  ;;  %vm1862_vm8 = vweird.f32 %v3297_v36 }
 0x627   :  { %v1818_v24 = vmul.f32 %v2439_v0, %v1815_v44  ;;  %vm1823_vm0 = vweird.f32 %v2439_v0  ;;  %v1866_v30 = vand.u32 2147483647, %v3297_v36 }
 0x628   :  { %2444 = vrcp.f32 %v1816_v18  ;;  %vm1824_vm2 = vmor %vm1822_vm1, %vm1823_vm0  ;;  %v1843_v10 = vand.u32 2147483648, %v1816_v18  ;;  %v1841_v1 = vand.u32 2147483647, %v1816_v18  ;;  %vm1837_vm6 = vweird.f32 %v1816_v18 }
 0x629   :  { %v1819_v26 = vsub.f32 1.0, %v1818_v24  ;;  %v1869_v43 = vor.u32 1.1754944e-38, %v1868_v20  ;;  %vm1867_vm11 = vcmp.eq.f32.partialorder %v1866_v30, 8.507059e+37 }
 0x62a   :  { %v1844_v22 = vor.u32 1.1754944e-38, %v1843_v10  ;;  %vm1842_vm9 = vcmp.eq.f32.partialorder %v1841_v1, 8.507059e+37 }
 0x62b   :  { %v2441_v56 = vpop.eup %2440  ;;  %v1820_v32 = vmul.f32 %v2439_v0, %v1819_v26 }
 0x62c   :  { %v2443_v39 = vpop.eup %2442  ;;  %v3300_v47 = vadd.f32 1.0, %v2441_v56 }
 0x62d   :  { %v1858_v25 = vmul.f32 %v2443_v39, %v3297_v36  ;;  %v1821_v54 = vadd.f32 %v2439_v0, %v1820_v32  ;;  %vm1863_vm5 = vweird.f32 %v2443_v39 }
 0x62e   :  { %2446 = vrcp.f32 %v3300_v47  ;;  %v2445_v17 = vpop.eup %2444  ;;  %vm1864_vm10 = vmor %vm1862_vm8, %vm1863_vm5  ;;  %v1883_v63 = vand.u32 2147483648, %v3300_v47  ;;  %vm1877_vm13 = vweird.f32 %v3300_v47  ;;  %v1881_v48 = vand.u32 2147483647, %v3300_v47 }
 0x62f   :  { %v1859_v9 = vsub.f32 1.0, %v1858_v25  ;;  %v1825_v13 = vsel %vm1824_vm2, %v2439_v0, %v1821_v54  ;;  %v1833_v29 = vmul.f32 %v2445_v17, %v1816_v18  ;;  %vm1838_vm4 = vweird.f32 %v2445_v17 }
 0x630   :  { %v1830_v11 = vsel %vm1827_vm3, %v1829_v41, %v1825_v13  ;;  %vm1839_vm7 = vmor %vm1837_vm6, %vm1838_vm4  ;;  %v1884_v19 = vor.u32 1.1754944e-38, %v1883_v63  ;;  %vm1882_vm15 = vcmp.eq.f32.partialorder %v1881_v48, 8.507059e+37 }
 0x631   :  { %v1889_v45 = vmul.f32 %v1887_v37, %v1830_v11  ;;  %v1860_v62 = vmul.f32 %v2443_v39, %v1859_v9  ;;  %v1834_v42 = vsub.f32 1.0, %v1833_v29 }
 0x633   :  { %v1891_v60 = vadd.f32 %v1889_v45, %v463_v50  ;;  %v1835_v59 = vmul.f32 %v2445_v17, %v1834_v42  ;;  %v1861_v15 = vadd.f32 %v2443_v39, %v1860_v62 }
 0x634   :  { %v2447_v14 = vpop.eup %2446 }
 0x635   :  { %2448 = vtanh.f32 %v1891_v60  ;;  %v1873_v5 = vmul.f32 %v2447_v14, %v3300_v47  ;;  %v1836_v58 = vadd.f32 %v2445_v17, %v1835_v59  ;;  %v1865_v16 = vsel %vm1864_vm10, %v2443_v39, %v1861_v15 }
 0x636   :  { %v1870_v55 = vsel %vm1867_vm11, %v1869_v43, %v1865_v16  ;;  %vm1878_vm12 = vweird.f32 %v2447_v14 }
 0x637   :  { %v1874_v6 = vsub.f32 1.0, %v1873_v5  ;;  %v1840_v35 = vsel %vm1839_vm7, %v2445_v17, %v1836_v58  ;;  %vm1879_vm14 = vmor %vm1877_vm13, %vm1878_vm12 }
 0x638   :  { %v1845_v57 = vsel %vm1842_vm9, %v1844_v22, %v1840_v35 }
 0x639   :  { %v1890_v23 = vmul.f32 %v1888_v46, %v1845_v57  ;;  %v1875_v21 = vmul.f32 %v2447_v14, %v1874_v6 }
 0x63b   :  { %v2449_v34 = vpop.eup %2448  ;;  %v1892_v8 = vadd.f32 %v1890_v23, %v465_v7  ;;  %v1876_v44 = vadd.f32 %v2447_v14, %v1875_v21 }
 0x63c   :  { %v1895_v33 = vsub.f32 %v3278_v31, %v2449_v34 }
 0x63d   :  { %2450 = vtanh.f32 %v1892_v8  ;;  %v1880_v12 = vsel %vm1879_vm14, %v2447_v14, %v1876_v44 }
 0x63e   :  { %v1897_v2 = vmul.f32 %v1895_v33, %v1870_v55  ;;  %v1885_v38 = vsel %vm1882_vm15, %v1884_v19, %v1880_v12 }
 0x640   :  { %v1899_v53 = vadd.f32 %v2449_v34, %v1897_v2 }
 0x643   :  { %v2451_v27 = vpop.eup %2450 }
 0x644   :  { %v1896_v31 = vsub.f32 %v3281_v49, %v2451_v27 }
 0x646   :  { %v1898_v36 = vmul.f32 %v1896_v31, %v1885_v38 }
 0x648   :  { %v1900_v40 = vadd.f32 %v2451_v27, %v1898_v36 }
 0x64a   :  { %v2279_v0 = vpack.c.bf16 %v1900_v40, %v1899_v53 }
 0x64c   :  { %2280 = vst [vmem:[#allocation12 + $0x38] sm:$0xff] %v2279_v0  }
 0x64d   :  { %1920 = dma.vmem_to_hbm [thread:$0]  %s1913_s17, 1024, %s1915_s20, [#allocation6], %s2585_s30, %s2585_s30, %s2586_s6  }
 0x64e   :  { %2579 = dma.done.wait [#allocation6], 1024  }
 0x64f   :  { %2580 = vsyncadd [#allocation6], 4294966272 }
 0x650   :  { %1925 = vsyncpa [#allocation5], 1 }
 0x651   :  { %1926 = vsyncpa [#allocation8], 1 }
 0x652   :  { %1927 = vsyncpa [#allocation11], 1 }
 0x653   :  { %1928 = vsyncpa [#allocation6], 1 }

// kernel: tpu_custom_call.1
= control target key start
LH: loop header
LB: loop body
LE: loop exit
PB: predicated region body
PF: predicated region fallthrough
CT: control target
= control target key end

     0   :  { %10 = vsyncpa [#allocation5], 0  ;;  %s3325_s0 = inlined_call_operand.hbm [shape: bf16[8,16,128], index: 0, kind: input, shape index: {}]   ;;  %s3326_s1 = inlined_call_operand.hbm [shape: bf16[128,384], index: 1, kind: input, shape index: {}]   ;;  %s3327_s2 = inlined_call_operand.hbm [shape: bf16[128,384], index: 2, kind: input, shape index: {}]   ;;  %s3328_s3 = inlined_call_operand.hbm [shape: f32[1,384], index: 3, kind: input, shape index: {}]   ;;  %s3329_s4 = inlined_call_operand.vmem [shape: f32[1,128], index: 4, kind: input, shape index: {}]   ;;  %s3330_s5 = inlined_call_operand.hbm [shape: bf16[8,16,128], index: 5, kind: output, shape index: {}]  }
   0x1   :  { %11 = vsyncpa [#allocation8], 0 }
   0x2   :  { %12 = vsyncpa [#allocation11], 0  ;;  %s31_s20 = sshll.u32 %s3326_s1, 4  ;;  %s32_s20 = int_to_ptr.hbm [resolvable:$true] %s31_s20 }
   0x3   :  { %13 = vsyncpa [#allocation6], 0  ;;  %s2581_s21 = smov [#allocation7]   ;;  %s18_s25 = sshll.u32 %s3325_s0, 4  ;;  %s19_s25 = int_to_ptr.hbm [resolvable:$true] %s18_s25 }
   0x4   :  { %s33_s22 = sshll.u32 %s2581_s21, 4  ;;  %s2582_s26 = smov 192   ;;  %s34_s22 = int_to_ptr.vmem [resolvable:$true] %s33_s22 }
   0x5   :  { %s2583_s27 = smov 12   ;;  %s2584_s28 = smov [#allocation4]  }
   0x6   :  { %39 = dma.hbm_to_vmem [thread:$0]  %s32_s20, 3072, %s34_s22, [#allocation8], %s2582_s26, %s2582_s26, %s2583_s27  }
   0x7   :  { %s20_s29 = sshll.u32 %s2584_s28, 4  ;;  %s2585_s30 = smov 64   ;;  %s21_s29 = int_to_ptr.vmem [resolvable:$true] %s20_s29 }
   0x8   :  { %s2586_s6 = smov 4   ;;  %s44_s8 = sshll.u32 %s3327_s2, 4  ;;  %s45_s8 = int_to_ptr.hbm [resolvable:$true] %s44_s8 }
   0x9   :  { %26 = dma.hbm_to_vmem [thread:$0]  %s19_s25, 1024, %s21_s29, [#allocation5], %s2585_s30, %s2585_s30, %s2586_s6  }
   0xa   :  { %s2587_s9 = smov [#allocation9]   ;;  %s58_s12 = sshll.u32 %s3328_s3, 4  ;;  %s59_s12 = int_to_ptr.hbm [resolvable:$true] %s58_s12 }
   0xb   :  { %s46_s0 = sshll.u32 %s2587_s9, 4  ;;  %s2588_s13 = smov [#allocation10]   ;;  %s47_s0 = int_to_ptr.vmem [resolvable:$true] %s46_s0 }
   0xc   :  { %52 = dma.hbm_to_vmem [thread:$0]  %s45_s8, 3072, %s47_s0, [#allocation8], %s2582_s26, %s2582_s26, %s2583_s27  }
   0xd   :  { %s60_s14 = sshll.u32 %s2588_s13, 4  ;;  %s61_s14 = int_to_ptr.vmem [resolvable:$true] %s60_s14 }
   0xe   :  { %63 = dma.hbm_to_vmem [thread:$0]  %s59_s12, 48, %s61_s14, [#allocation11]  }
   0xf   :  { %2573 = dma.done.wait [#allocation5], 1024  }
  0x10   :  { %2574 = vsyncadd [#allocation5], 4294966272 }
  0x11   :  { %2575 = dma.done.wait [#allocation8], 6144  }
  0x12   :  { %2576 = vsyncadd [#allocation8], 4294961152 }
  0x13   :  { %2577 = dma.done.wait [#allocation11], 48  }
  0x14   :  { %2578 = vsyncadd [#allocation11], 4294967248  ;;  %v2143_v0 = vld [vmem:[#allocation9 + $0xa8] sm:$0xf]  ;;  %v2239_v1 = vld [vmem:[#allocation9 + $0xb0] sm:$0xf0] }
  0x15   :  { %v2131_v2 = vld [vmem:[#allocation9 + $0x90] sm:$0xf]  ;;  %v2636_v3 = vor.u32 %v2239_v1, %v2143_v0  ;;  %v2236_v4 = vld [vmem:[#allocation9 + $0x98] sm:$0xf0]  ;;  %v2047_v5 = vld [vmem:[#allocation7 + $0xa8] sm:$0xf] }
  0x16   :  { %v2215_v6 = vld [vmem:[#allocation7 + $0xb0] sm:$0xf0]  ;;  %v2639_v7 = vor.u32 %v2236_v4, %v2131_v2  ;;  %v2035_v9 = vld [vmem:[#allocation7 + $0x90] sm:$0xf]  ;;  %v2212_v10 = vld [vmem:[#allocation7 + $0x98] sm:$0xf0] }
  0x17   :  { %688 = vmatpush.bf16.msra.mxu3 %v2636_v3  ;;  %v2048_v8 = vor.u32 %v2215_v6, %v2047_v5  ;;  %v2119_v11 = vld [vmem:[#allocation9 + $0x78] sm:$0xf]  ;;  %v2233_v12 = vld [vmem:[#allocation9 + $0x80] sm:$0xf0]  ;;  %v2036_v13 = vor.u32 %v2212_v10, %v2035_v9  ;;  %v2107_v17 = vld [vmem:[#allocation9 + $0x60] sm:$0xf] }
  0x18   :  { %v2023_v14 = vld [vmem:[#allocation7 + $0x78] sm:$0xf]  ;;  %v2209_v15 = vld [vmem:[#allocation7 + $0x80] sm:$0xf0]  ;;  %v2642_v16 = vor.u32 %v2233_v12, %v2119_v11  ;;  %v2230_v18 = vld [vmem:[#allocation9 + $0x68] sm:$0xf0] }
  0x19   :  { %320 = vmatpush.bf16.msra.mxu0 %v2048_v8  ;;  %v2024_v19 = vor.u32 %v2209_v15, %v2023_v14  ;;  %v2011_v20 = vld [vmem:[#allocation7 + $0x60] sm:$0xf]  ;;  %v2206_v21 = vld [vmem:[#allocation7 + $0x68] sm:$0xf0]  ;;  %v2645_v23 = vor.u32 %v2230_v18, %v2107_v17  ;;  %v2049_v24 = vld [vmem:[#allocation7 + $0xb4] sm:$0xf0] }
  0x1a   :  { %v2214_v22 = vld [vmem:[#allocation7 + $0xac] sm:$0xf]  ;;  %v2095_v25 = vld [vmem:[#allocation9 + $0x48] sm:$0xf]  ;;  %v2227_v26 = vld [vmem:[#allocation9 + $0x50] sm:$0xf0]  ;;  %v2012_v28 = vor.u32 %v2206_v21, %v2011_v20 }
  0x1b   :  { %689 = vmatpush.bf16.msra.mxu3 %v2639_v7  ;;  %v2052_v27 = vor.u32 %v2214_v22, %v2049_v24  ;;  %v2211_v29 = vld [vmem:[#allocation7 + $0x94] sm:$0xf]  ;;  %v2037_v30 = vld [vmem:[#allocation7 + $0x9c] sm:$0xf0]  ;;  %v1999_v31 = vld [vmem:[#allocation7 + $0x48] sm:$0xf]  ;;  %v2648_v34 = vor.u32 %v2227_v26, %v2095_v25 }
  0x1c   :  { %v2203_v32 = vld [vmem:[#allocation7 + $0x50] sm:$0xf0]  ;;  %v2040_v33 = vor.u32 %v2211_v29, %v2037_v30  ;;  %v2208_v35 = vld [vmem:[#allocation7 + $0x7c] sm:$0xf]  ;;  %v2025_v36 = vld [vmem:[#allocation7 + $0x84] sm:$0xf0] }
  0x1d   :  { %321 = vmatpush.bf16.msra.mxu0 %v2036_v13  ;;  %369 = vmatpush.bf16.msra.mxu1 %v2052_v27  ;;  %v2083_v37 = vld [vmem:[#allocation9 + $0x30] sm:$0xf]  ;;  %v2224_v38 = vld [vmem:[#allocation9 + $0x38] sm:$0xf0]  ;;  %v2000_v39 = vor.u32 %v2203_v32, %v1999_v31  ;;  %v2028_v42 = vor.u32 %v2208_v35, %v2025_v36  ;;  %v2071_v44 = vld [vmem:[#allocation9 + $0x18] sm:$0xf] }
  0x1e   :  { %v1987_v40 = vld [vmem:[#allocation7 + $0x30] sm:$0xf]  ;;  %v2200_v41 = vld [vmem:[#allocation7 + $0x38] sm:$0xf0]  ;;  %v2651_v43 = vor.u32 %v2224_v38, %v2083_v37  ;;  %v2205_v45 = vld [vmem:[#allocation7 + $0x64] sm:$0xf] }
  0x1f   :  { %690 = vmatpush.bf16.msra.mxu3 %v2642_v16  ;;  %v2013_v46 = vld [vmem:[#allocation7 + $0x6c] sm:$0xf0]  ;;  %v2221_v47 = vld [vmem:[#allocation9 + $0x20] sm:$0xf0]  ;;  %v2216_v49 = vld [vmem:[#allocation7 + $0xb8] sm:$0xf0]  ;;  %v1988_v50 = vor.u32 %v2200_v41, %v1987_v40 }
  0x20   :  { %v2055_v48 = vld [vmem:[#allocation7 + $0xb0] sm:$0xf]  ;;  %v1975_v52 = vld [vmem:[#allocation7 + $0x18] sm:$0xf]  ;;  %v2197_v53 = vld [vmem:[#allocation7 + $0x20] sm:$0xf0]  ;;  %v2016_v54 = vor.u32 %v2205_v45, %v2013_v46  ;;  %v2654_v55 = vor.u32 %v2221_v47, %v2071_v44 }
  0x21   :  { %322 = vmatpush.bf16.msra.mxu0 %v2024_v19  ;;  %370 = vmatpush.bf16.msra.mxu1 %v2040_v33  ;;  %v2056_v51 = vor.u32 %v2216_v49, %v2055_v48  ;;  %v2059_v56 = vld [vmem:[#allocation9] sm:$0xf]  ;;  %v2202_v57 = vld [vmem:[#allocation7 + $0x4c] sm:$0xf]  ;;  %v2001_v58 = vld [vmem:[#allocation7 + $0x54] sm:$0xf0]  ;;  %v1976_v0 = vor.u32 %v2197_v53, %v1975_v52 }
  0x22   :  { %v2218_v59 = vld [vmem:[#allocation9 + $0x8] sm:$0xf0]  ;;  %v2043_v60 = vld [vmem:[#allocation7 + $0x98] sm:$0xf]  ;;  %v2213_v61 = vld [vmem:[#allocation7 + $0xa0] sm:$0xf0]  ;;  %v2004_v5 = vor.u32 %v2202_v57, %v2001_v58 }
  0x23   :  { %691 = vmatpush.bf16.msra.mxu3 %v2645_v23  ;;  %418 = vmatpush.bf16.msra.mxu2 %v2056_v51  ;;  %v2238_v62 = vld [vmem:[#allocation9 + $0xac] sm:$0xf]  ;;  %v2145_v63 = vld [vmem:[#allocation9 + $0xb4] sm:$0xf0]  ;;  %v2044_v1 = vor.u32 %v2213_v61, %v2043_v60  ;;  %v1963_v2 = vld [vmem:[#allocation7] sm:$0xf]  ;;  %v2657_v6 = vor.u32 %v2218_v59, %v2059_v56 }
  0x24   :  { %v2194_v4 = vld [vmem:[#allocation7 + $0x8] sm:$0xf0]  ;;  %v2199_v8 = vld [vmem:[#allocation7 + $0x34] sm:$0xf]  ;;  %v1989_v9 = vld [vmem:[#allocation7 + $0x3c] sm:$0xf0]  ;;  %v2659_v10 = vor.u32 %v2238_v62, %v2145_v63 }
  0x25   :  { %323 = vmatpush.bf16.msra.mxu0 %v2012_v28  ;;  %371 = vmatpush.bf16.msra.mxu1 %v2028_v42  ;;  %v2031_v11 = vld [vmem:[#allocation7 + $0x80] sm:$0xf]  ;;  %v2210_v12 = vld [vmem:[#allocation7 + $0x88] sm:$0xf0]  ;;  %v2235_v13 = vld [vmem:[#allocation9 + $0x94] sm:$0xf]  ;;  %v1964_v15 = vor.u32 %v2194_v4, %v1963_v2  ;;  %v1992_v18 = vor.u32 %v2199_v8, %v1989_v9 }
  0x26   :  { %v2133_v14 = vld [vmem:[#allocation9 + $0x9c] sm:$0xf0]  ;;  %v2032_v17 = vor.u32 %v2210_v12, %v2031_v11  ;;  %v2196_v19 = vld [vmem:[#allocation7 + $0x1c] sm:$0xf]  ;;  %v1977_v20 = vld [vmem:[#allocation7 + $0x24] sm:$0xf0] }
  0x27   :  { %692 = vmatpush.bf16.msra.mxu3 %v2648_v34  ;;  %419 = vmatpush.bf16.msra.mxu2 %v2044_v1  ;;  %v2663_v21 = vor.u32 %v2235_v13, %v2133_v14  ;;  %v2665_v22 = vld [vmem:[#allocation4] sm:$0xff]  ;;  %v2019_v24 = vld [vmem:[#allocation7 + $0x68] sm:$0xf]  ;;  %v2207_v25 = vld [vmem:[#allocation7 + $0x70] sm:$0xf0]  ;;  %v2589_v29 = vmov 0.0|0.0   ;;  %v1980_v30 = vor.u32 %v2196_v19, %v1977_v20 }
  0x28   :  { %v2232_v26 = vld [vmem:[#allocation9 + $0x7c] sm:$0xf]  ;;  %v2121_v27 = vld [vmem:[#allocation9 + $0x84] sm:$0xf0]  ;;  %v2020_v28 = vor.u32 %v2207_v25, %v2019_v24  ;;  %v2193_v31 = vld [vmem:[#allocation7 + $0x4] sm:$0xf] }
  0x29   :  { %324 = vmatpush.bf16.msra.mxu0 %v2000_v39  ;;  %372 = vmatpush.bf16.msra.mxu1 %v2016_v54  ;;  %v1965_v32 = vld [vmem:[#allocation7 + $0xc] sm:$0xf0]  ;;  %v2670_v33 = vor.u32 %v2232_v26, %v2121_v27  ;;  %v2204_v36 = vld [vmem:[#allocation7 + $0x58] sm:$0xf0]  ;;  %v2229_v37 = vld [vmem:[#allocation9 + $0x64] sm:$0xf] }
  0x2a   :  { %v2007_v35 = vld [vmem:[#allocation7 + $0x50] sm:$0xf]  ;;  %v2240_v41 = vld [vmem:[#allocation9 + $0xb8] sm:$0xf0]  ;;  %v1968_v42 = vor.u32 %v2193_v31, %v1965_v32  ;;  %v1995_v45 = vld [vmem:[#allocation7 + $0x38] sm:$0xf] }
  0x2b   :  { %693 = vmatpush.bf16.msra.mxu3 %v2651_v43  ;;  %420 = vmatpush.bf16.msra.mxu2 %v2032_v17  ;;  %v2109_v38 = vld [vmem:[#allocation9 + $0x6c] sm:$0xf0]  ;;  %v2008_v39 = vor.u32 %v2204_v36, %v2007_v35  ;;  %v2201_v46 = vld [vmem:[#allocation7 + $0x40] sm:$0xf0]  ;;  %v2226_v47 = vld [vmem:[#allocation9 + $0x4c] sm:$0xf] }
  0x2c   :  { %v2151_v40 = vld [vmem:[#allocation9 + $0xb0] sm:$0xf]  ;;  %v2675_v44 = vor.u32 %v2229_v37, %v2109_v38  ;;  %v2097_v48 = vld [vmem:[#allocation9 + $0x54] sm:$0xf0]  ;;  %v2237_v52 = vld [vmem:[#allocation9 + $0xa0] sm:$0xf0] }
  0x2d   :  { %325 = vmatpush.bf16.msra.mxu0 %v1988_v50  ;;  %373 = vmatpush.bf16.msra.mxu1 %v2004_v5  ;;  %v2677_v49 = vor.u32 %v2240_v41, %v2151_v40  ;;  %v1996_v50 = vor.u32 %v2201_v46, %v1995_v45  ;;  %v2139_v51 = vld [vmem:[#allocation9 + $0x98] sm:$0xf]  ;;  %v2681_v53 = vor.u32 %v2226_v47, %v2097_v48  ;;  %v1983_v54 = vld [vmem:[#allocation7 + $0x20] sm:$0xf]  ;;  %v2198_v56 = vld [vmem:[#allocation7 + $0x28] sm:$0xf0] }
  0x2e   :  { %v2223_v57 = vld [vmem:[#allocation9 + $0x34] sm:$0xf]  ;;  %v2085_v58 = vld [vmem:[#allocation9 + $0x3c] sm:$0xf0]  ;;  %v2684_v59 = vor.u32 %v2237_v52, %v2139_v51  ;;  %v1984_v60 = vor.u32 %v2198_v56, %v1983_v54  ;;  %v2234_v62 = vld [vmem:[#allocation9 + $0x88] sm:$0xf0] }
  0x2f   :  { %694 = vmatpush.bf16.msra.mxu3 %v2654_v55  ;;  %421 = vmatpush.bf16.msra.mxu2 %v2020_v28  ;;  %v2127_v61 = vld [vmem:[#allocation9 + $0x80] sm:$0xf]  ;;  %v2689_v63 = vor.u32 %v2223_v57, %v2085_v58  ;;  %v2195_v1 = vld [vmem:[#allocation7 + $0x10] sm:$0xf0]  ;;  %v2220_v2 = vld [vmem:[#allocation9 + $0x1c] sm:$0xf] }
  0x30   :  { %v2073_v4 = vld [vmem:[#allocation9 + $0x24] sm:$0xf0]  ;;  %v2692_v5 = vor.u32 %v2234_v62, %v2127_v61  ;;  %v2231_v11 = vld [vmem:[#allocation9 + $0x70] sm:$0xf0]  ;;  %v2217_v13 = vld [vmem:[#allocation9 + $0x4] sm:$0xf] }
  0x31   :  { %326 = vmatpush.bf16.msra.mxu0 %v1976_v0  ;;  %374 = vmatpush.bf16.msra.mxu1 %v1992_v18  ;;  %v1971_v0 = vld [vmem:[#allocation7 + $0x8] sm:$0xf]  ;;  %v2696_v12 = vor.u32 %v2220_v2, %v2073_v4  ;;  %v2061_v14 = vld [vmem:[#allocation9 + $0xc] sm:$0xf0]  ;;  %v2228_v18 = vld [vmem:[#allocation9 + $0x58] sm:$0xf0] }
  0x32   :  { %v1972_v8 = vor.u32 %v2195_v1, %v1971_v0  ;;  %v2115_v9 = vld [vmem:[#allocation9 + $0x68] sm:$0xf]  ;;  %v2103_v17 = vld [vmem:[#allocation9 + $0x50] sm:$0xf]  ;;  %v2705_v19 = vor.u32 %v2217_v13, %v2061_v14  ;;  %v2091_v24 = vld [vmem:[#allocation9 + $0x38] sm:$0xf] }
  0x33   :  { %695 = vmatpush.bf16.msra.mxu3 %v2657_v6  ;;  %422 = vmatpush.bf16.msra.mxu2 %v2008_v39  ;;  %v2708_v20 = vor.u32 %v2228_v18, %v2103_v17  ;;  %v2225_v25 = vld [vmem:[#allocation9 + $0x40] sm:$0xf0]  ;;  %v2186_v26 = vld [vmem:[#allocation4 + $0x8] sm:$0xff]  ;;  %v2079_v27 = vld [vmem:[#allocation9 + $0x20] sm:$0xf]  ;;  %s1914_s20 = sshll.u32 %s3330_s5, 4  ;;  %s1915_s20 = int_to_ptr.hbm [resolvable:$true] %s1914_s20 }
  0x34   :  { %v2222_v28 = vld [vmem:[#allocation9 + $0x28] sm:$0xf0]  ;;  %v2067_v31 = vld [vmem:[#allocation9 + $0x8] sm:$0xf]  ;;  %v2219_v32 = vld [vmem:[#allocation9 + $0x10] sm:$0xf0] }
  0x35   :  { %327 = vmatpush.bf16.msra.mxu0 %v1964_v15  ;;  %375 = vmatpush.bf16.msra.mxu1 %v1980_v30  ;;  %v2699_v15 = vor.u32 %v2231_v11, %v2115_v9  ;;  %v2722_v30 = vor.u32 %v2222_v28, %v2079_v27  ;;  %v2728_v35 = vor.u32 %v2219_v32, %v2067_v31  ;;  %v2187_v36 = vld [vmem:[#allocation4 + $0x10] sm:$0xff]  ;;  %v2189_v37 = vld [vmem:[#allocation4 + $0x20] sm:$0xff]  ;;  %v2190_v45 = vld [vmem:[#allocation4 + $0x28] sm:$0xff] }
  0x36   :  { %696 = vmatmul.bf16.vlgmr.msra.gmra.mxu3 %v2589_v29  ;;  %v2780_v38 = vld [vmem:[#allocation10] sm:$0x7]  ;;  %v2191_v61 = vld [vmem:[#allocation4 + $0x30] sm:$0xff] }
  0x37   :  { %702 = vmatpush.bf16.msrb.mxu3 %v2659_v10  ;;  %423 = vmatpush.bf16.msra.mxu2 %v1996_v50  ;;  %v2783_v40 = vperm.slane %v2780_v38, 0  ;;  %v2788_v56 = vperm.slane %v2780_v38, 1 }
  0x38   :  { %328 = vmatmul.bf16.vlgmr.msra.gmra.mxu0 %v2665_v22 }
  0x39   :  { %855 = vmatpush.bf16.msrb.mxu0 %v2659_v10  ;;  %376 = vmatpush.bf16.msra.mxu1 %v1968_v42 }
  0x3b   :  { %703 = vmatpush.bf16.msrb.mxu3 %v2663_v21  ;;  %424 = vmatpush.bf16.msra.mxu2 %v1984_v60 }
  0x3c   :  { %377 = vmatmul.bf16.vlgmr.msra.gmra.mxu1 %v2665_v22 }
  0x3d   :  { %856 = vmatpush.bf16.msrb.mxu0 %v2663_v21  ;;  %869 = vmatpush.bf16.msrb.mxu1 %v2677_v49 }
  0x3f   :  { %704 = vmatpush.bf16.msrb.mxu3 %v2670_v33  ;;  %425 = vmatpush.bf16.msra.mxu2 %v1972_v8 }
  0x41   :  { %857 = vmatpush.bf16.msrb.mxu0 %v2670_v33  ;;  %870 = vmatpush.bf16.msrb.mxu1 %v2684_v59 }
  0x42   :  { %426 = vmatmul.bf16.vlgmr.msra.gmra.mxu2 %v2665_v22  ;;  %v2715_v22 = vor.u32 %v2225_v25, %v2091_v24 }
  0x43   :  { %705 = vmatpush.bf16.msrb.mxu3 %v2675_v44  ;;  %995 = vmatpush.bf16.msrb.mxu2 %v2636_v3 }
  0x45   :  { %858 = vmatpush.bf16.msrb.mxu0 %v2675_v44  ;;  %871 = vmatpush.bf16.msrb.mxu1 %v2692_v5 }
  0x47   :  { %706 = vmatpush.bf16.msrb.mxu3 %v2681_v53  ;;  %996 = vmatpush.bf16.msrb.mxu2 %v2639_v7 }
  0x48   :  { %333 = vmatmul.bf16.gmra.mxu0 %v2186_v26 }
  0x49   :  { %859 = vmatpush.bf16.msrb.mxu0 %v2681_v53  ;;  %872 = vmatpush.bf16.msrb.mxu1 %v2699_v15 }
  0x4b   :  { %707 = vmatpush.bf16.msrb.mxu3 %v2689_v63  ;;  %997 = vmatpush.bf16.msrb.mxu2 %v2642_v16 }
  0x4c   :  { %382 = vmatmul.bf16.gmra.mxu1 %v2186_v26 }
  0x4d   :  { %860 = vmatpush.bf16.msrb.mxu0 %v2689_v63  ;;  %873 = vmatpush.bf16.msrb.mxu1 %v2708_v20 }
  0x4f   :  { %708 = vmatpush.bf16.msrb.mxu3 %v2696_v12  ;;  %998 = vmatpush.bf16.msrb.mxu2 %v2645_v23 }
  0x51   :  { %861 = vmatpush.bf16.msrb.mxu0 %v2696_v12  ;;  %874 = vmatpush.bf16.msrb.mxu1 %v2715_v22 }
  0x52   :  { %431 = vmatmul.bf16.gmra.mxu2 %v2186_v26  ;;  %v2192_v26 = vld [vmem:[#allocation4 + $0x38] sm:$0xff] }
  0x53   :  { %709 = vmatpush.bf16.msrb.mxu3 %v2705_v19  ;;  %999 = vmatpush.bf16.msrb.mxu2 %v2648_v34 }
  0x55   :  { %862 = vmatpush.bf16.msrb.mxu0 %v2705_v19  ;;  %875 = vmatpush.bf16.msrb.mxu1 %v2722_v30 }
  0x56   :  { %710 = vmatmul.bf16.vlgmr.msrb.gmra.mxu3 %v2589_v29 }
  0x57   :  { %716 = vmatpush.bf16.msra.mxu3 %v2677_v49  ;;  %1000 = vmatpush.bf16.msrb.mxu2 %v2651_v43 }
  0x58   :  { %338 = vmatmul.bf16.gmra.mxu0 %v2187_v36 }
  0x59   :  { %1023 = vmatpush.bf16.msra.mxu0 %v2677_v49  ;;  %876 = vmatpush.bf16.msrb.mxu1 %v2728_v35 }
  0x5b   :  { %717 = vmatpush.bf16.msra.mxu3 %v2684_v59  ;;  %1001 = vmatpush.bf16.msrb.mxu2 %v2654_v55 }
  0x5c   :  { %387 = vmatmul.bf16.gmra.mxu1 %v2187_v36 }
  0x5d   :  { %1024 = vmatpush.bf16.msra.mxu0 %v2684_v59  ;;  %1149 = vmatpush.bf16.msra.mxu1 %v2636_v3 }
  0x5f   :  { %718 = vmatpush.bf16.msra.mxu3 %v2692_v5  ;;  %1002 = vmatpush.bf16.msrb.mxu2 %v2657_v6 }
  0x61   :  { %1025 = vmatpush.bf16.msra.mxu0 %v2692_v5  ;;  %1150 = vmatpush.bf16.msra.mxu1 %v2639_v7 }
  0x62   :  { %436 = vmatmul.bf16.gmra.mxu2 %v2187_v36 }
  0x63   :  { %719 = vmatpush.bf16.msra.mxu3 %v2699_v15  ;;  %1163 = vmatpush.bf16.msra.mxu2 %v2659_v10 }
  0x65   :  { %1026 = vmatpush.bf16.msra.mxu0 %v2699_v15  ;;  %1151 = vmatpush.bf16.msra.mxu1 %v2642_v16 }
  0x67   :  { %720 = vmatpush.bf16.msra.mxu3 %v2708_v20  ;;  %1164 = vmatpush.bf16.msra.mxu2 %v2663_v21 }
  0x69   :  { %1027 = vmatpush.bf16.msra.mxu0 %v2708_v20  ;;  %1152 = vmatpush.bf16.msra.mxu1 %v2645_v23 }
  0x6b   :  { %721 = vmatpush.bf16.msra.mxu3 %v2715_v22  ;;  %1165 = vmatpush.bf16.msra.mxu2 %v2670_v33 }
  0x6d   :  { %1028 = vmatpush.bf16.msra.mxu0 %v2715_v22  ;;  %1153 = vmatpush.bf16.msra.mxu1 %v2648_v34 }
  0x6f   :  { %722 = vmatpush.bf16.msra.mxu3 %v2722_v30  ;;  %1166 = vmatpush.bf16.msra.mxu2 %v2675_v44 }
  0x71   :  { %1029 = vmatpush.bf16.msra.mxu0 %v2722_v30  ;;  %1154 = vmatpush.bf16.msra.mxu1 %v2651_v43 }
  0x73   :  { %723 = vmatpush.bf16.msra.mxu3 %v2728_v35  ;;  %1167 = vmatpush.bf16.msra.mxu2 %v2681_v53 }
  0x75   :  { %1030 = vmatpush.bf16.msra.mxu0 %v2728_v35  ;;  %1155 = vmatpush.bf16.msra.mxu1 %v2654_v55 }
  0x76   :  { %724 = vmatmul.bf16.vlgmr.msra.gmra.mxu3 %v2589_v29  ;;  %v2188_v29 = vld [vmem:[#allocation4 + $0x18] sm:$0xff] }
  0x77   :  { %841 = vmatpush.bf16.msrb.mxu3 %v2636_v3  ;;  %1168 = vmatpush.bf16.msra.mxu2 %v2689_v63 }
  0x78   :  { %343 = vmatmul.bf16.gmra.mxu0 %v2188_v29  ;;  %392 = vmatmul.bf16.gmra.mxu1 %v2188_v29 }
  0x79   :  { %1156 = vmatpush.bf16.msra.mxu1 %v2657_v6  ;;  %441 = vmatmul.bf16.gmra.mxu2 %v2188_v29 }
  0x7b   :  { %842 = vmatpush.bf16.msrb.mxu3 %v2639_v7  ;;  %1169 = vmatpush.bf16.msra.mxu2 %v2696_v12 }
  0x7f   :  { %843 = vmatpush.bf16.msrb.mxu3 %v2642_v16  ;;  %1170 = vmatpush.bf16.msra.mxu2 %v2705_v19 }
  0x83   :  { %844 = vmatpush.bf16.msrb.mxu3 %v2645_v23 }
  0x87   :  { %845 = vmatpush.bf16.msrb.mxu3 %v2648_v34 }
  0x88   :  { %348 = vmatmul.bf16.gmra.mxu0 %v2189_v37  ;;  %397 = vmatmul.bf16.gmra.mxu1 %v2189_v37 }
  0x89   :  { %446 = vmatmul.bf16.gmra.mxu2 %v2189_v37 }
  0x8b   :  { %846 = vmatpush.bf16.msrb.mxu3 %v2651_v43 }
  0x8f   :  { %847 = vmatpush.bf16.msrb.mxu3 %v2654_v55 }
  0x93   :  { %848 = vmatpush.bf16.msrb.mxu3 %v2657_v6 }
  0x97   :  { %1009 = vmatpush.bf16.msra.mxu3 %v2659_v10 }
  0x98   :  { %353 = vmatmul.bf16.gmra.mxu0 %v2190_v45  ;;  %402 = vmatmul.bf16.gmra.mxu1 %v2190_v45 }
  0x99   :  { %451 = vmatmul.bf16.gmra.mxu2 %v2190_v45 }
  0x9b   :  { %1010 = vmatpush.bf16.msra.mxu3 %v2663_v21 }
  0x9f   :  { %1011 = vmatpush.bf16.msra.mxu3 %v2670_v33 }
  0xa3   :  { %1012 = vmatpush.bf16.msra.mxu3 %v2675_v44 }
  0xa7   :  { %1013 = vmatpush.bf16.msra.mxu3 %v2681_v53 }
  0xa8   :  { %358 = vmatmul.bf16.gmra.mxu0 %v2191_v61  ;;  %407 = vmatmul.bf16.gmra.mxu1 %v2191_v61 }
  0xa9   :  { %456 = vmatmul.bf16.gmra.mxu2 %v2191_v61 }
  0xab   :  { %1014 = vmatpush.bf16.msra.mxu3 %v2689_v63 }
  0xaf   :  { %1015 = vmatpush.bf16.msra.mxu3 %v2696_v12 }
  0xb3   :  { %1016 = vmatpush.bf16.msra.mxu3 %v2705_v19 }
  0xb5   :  { %v329_v39 = vpop.f32.mrf.mxu0 }
  0xb6   :  { %v330_v42 = vadd.f32 %v329_v39, %v2783_v40 }
  0xb8   :  { %363 = vmatmul.bf16.gmra.mxu0 %v2192_v26  ;;  %412 = vmatmul.bf16.gmra.mxu1 %v2192_v26 }
  0xb9   :  { %v697_v41 = vpop.f32.mrf.mxu3  ;;  %v378_v54 = vpop.f32.mrf.mxu1  ;;  %461 = vmatmul.bf16.gmra.mxu2 %v2192_v26 }
  0xba   :  { %v730_v46 = vadd.f32 %v697_v41, %v330_v42  ;;  %v379_v60 = vadd.f32 %v378_v54, %v2788_v56 }
  0xbc   :  { %v2153_v48 = vmul.f32 -1.442695, %v730_v46 }
  0xbd   :  { %v331_v47 = vpop.f32.mrf.mxu0 }
  0xbe   :  { %v332_v50 = vadd.f32 %v331_v47, %v2783_v40  ;;  %2292 = vpow2.f32 %v2153_v48  ;;  %v2803_v48 = vperm.slane %v2780_v38, 2 }
  0xc1   :  { %v699_v51 = vpop.f32.mrf.mxu3  ;;  %v380_v2 = vpop.f32.mrf.mxu1 }
  0xc2   :  { %v731_v52 = vadd.f32 %v699_v51, %v332_v50  ;;  %v381_v9 = vadd.f32 %v380_v2, %v2788_v56  ;;  %v2808_v50 = vld [vmem:[%s3329_s4] ss:$0 sm:$0xff] }
  0xc4   :  { %v2154_v57 = vmul.f32 -1.442695, %v731_v52  ;;  %v2293_v58 = vpop.eup %2292 }
  0xc5   :  { %v738_v62 = vadd.f32 1.0, %v2293_v58  ;;  %v427_v52 = vpop.f32.mrf.mxu2 }
  0xc6   :  { %2294 = vpow2.f32 %v2154_v57 }
  0xc7   :  { %2296 = vrcp.f32 %v738_v62  ;;  %vm745_vm0 = vweird.f32 %v738_v62  ;;  %v751_v39 = vand.u32 2147483648, %v738_v62  ;;  %v749_v45 = vand.u32 2147483647, %v738_v62 }
  0xc9   :  { %v752_v54 = vor.u32 1.1754944e-38, %v751_v39  ;;  %vm750_vm3 = vcmp.eq.f32.partialorder %v749_v45, 8.507059e+37 }
  0xcc   :  { %v2295_v8 = vpop.eup %2294 }
  0xcd   :  { %v739_v11 = vadd.f32 1.0, %v2295_v8  ;;  %v2297_v14 = vpop.eup %2296 }
  0xce   :  { %v741_v25 = vmul.f32 %v2297_v14, %v738_v62  ;;  %vm746_vm1 = vweird.f32 %v2297_v14  ;;  %v428_v62 = vadd.f32 %v427_v52, %v2803_v48 }
  0xcf   :  { %vm2798_vm2 = vmor %vm745_vm0, %vm746_vm1  ;;  %vm760_vm4 = vweird.f32 %v739_v11  ;;  %v766_v2 = vand.u32 2147483648, %v739_v11 }
  0xd0   :  { %v742_v28 = vsub.f32 1.0, %v741_v25 }
  0xd2   :  { %v743_v29 = vmul.f32 %v2297_v14, %v742_v28  ;;  %v429_v28 = vpop.f32.mrf.mxu2 }
  0xd3   :  { %v430_v45 = vadd.f32 %v429_v28, %v2803_v48 }
  0xd4   :  { %v744_v42 = vadd.f32 %v2297_v14, %v743_v29 }
  0xd6   :  { %v748_v57 = vsel %vm2798_vm2, %v2297_v14, %v744_v42 }
  0xd9   :  { %v711_v0 = vpop.f32.mrf.mxu3 }
  0xda   :  { %v770_v1 = vadd.f32 %v711_v0, %v379_v60 }
  0xdc   :  { %v2155_v4 = vmul.f32 -1.442695, %v770_v1  ;;  %v753_v1 = vsel %vm750_vm3, %v752_v54, %v748_v57 }
  0xde   :  { %2298 = vpow2.f32 %v2155_v4 }
  0xdf   :  { %2300 = vrcp.f32 %v739_v11 }
  0xe1   :  { %v713_v13 = vpop.f32.mrf.mxu3 }
  0xe2   :  { %v771_v17 = vadd.f32 %v713_v13, %v381_v9  ;;  %v764_v9 = vand.u32 2147483647, %v739_v11 }
  0xe4   :  { %v2299_v18 = vpop.eup %2298  ;;  %v2156_v24 = vmul.f32 -1.442695, %v771_v17  ;;  %vm765_vm7 = vcmp.eq.f32.partialorder %v764_v9, 8.507059e+37 }
  0xe5   :  { %v2792_v27 = vadd.f32 1.0, %v2299_v18  ;;  %v2301_v31 = vpop.eup %2300 }
  0xe6   :  { %2302 = vpow2.f32 %v2156_v24  ;;  %v756_v37 = vmul.f32 %v2301_v31, %v739_v11  ;;  %vm761_vm5 = vweird.f32 %v2301_v31  ;;  %v767_v24 = vor.u32 1.1754944e-38, %v766_v2 }
  0xe7   :  { %2304 = vrcp.f32 %v2792_v27  ;;  %vm2816_vm6 = vmor %vm760_vm4, %vm761_vm5  ;;  %vm785_vm8 = vweird.f32 %v2792_v27  ;;  %v789_v39 = vand.u32 2147483647, %v2792_v27 }
  0xe8   :  { %v757_v46 = vsub.f32 1.0, %v756_v37 }
  0xe9   :  { %vm790_vm11 = vcmp.eq.f32.partialorder %v789_v39, 8.507059e+37 }
  0xea   :  { %v758_v58 = vmul.f32 %v2301_v31, %v757_v46 }
  0xec   :  { %v2303_v32 = vpop.eup %2302  ;;  %v759_v8 = vadd.f32 %v2301_v31, %v758_v58 }
  0xed   :  { %v2795_v36 = vadd.f32 1.0, %v2303_v32  ;;  %v2305_v41 = vpop.eup %2304  ;;  %v791_v32 = vand.u32 2147483648, %v2792_v27 }
  0xee   :  { %v781_v51 = vmul.f32 %v2305_v41, %v2792_v27  ;;  %v763_v25 = vsel %vm2816_vm6, %v2301_v31, %v759_v8  ;;  %vm786_vm9 = vweird.f32 %v2305_v41 }
  0xef   :  { %2306 = vrcp.f32 %v2795_v36  ;;  %v768_v42 = vsel %vm765_vm7, %v767_v24, %v763_v25  ;;  %vm787_vm10 = vmor %vm785_vm8, %vm786_vm9  ;;  %vm800_vm13 = vweird.f32 %v2795_v36  ;;  %v804_v27 = vand.u32 2147483647, %v2795_v36 }
  0xf0   :  { %v782_v0 = vsub.f32 1.0, %v781_v51  ;;  %v792_v51 = vor.u32 1.1754944e-38, %v791_v32 }
  0xf1   :  { %vm805_vm15 = vcmp.eq.f32.partialorder %v804_v27, 8.507059e+37 }
  0xf2   :  { %v783_v18 = vmul.f32 %v2305_v41, %v782_v0  ;;  %v2830_v0 = vpop.f32.mrf.mxu0 }
  0xf4   :  { %v784_v37 = vadd.f32 %v2305_v41, %v783_v18 }
  0xf5   :  { %v2307_v61 = vpop.eup %2306 }
  0xf6   :  { %v796_v13 = vmul.f32 %v2307_v61, %v2795_v36  ;;  %v788_v54 = vsel %vm787_vm10, %v2305_v41, %v784_v37  ;;  %vm801_vm12 = vweird.f32 %v2307_v61 }
  0xf7   :  { %vm802_vm14 = vmor %vm800_vm13, %vm801_vm12 }
  0xf8   :  { %v797_v26 = vsub.f32 1.0, %v796_v13 }
  0xf9   :  { %v725_v60 = vpop.f32.mrf.mxu3 }
  0xfa   :  { %v810_v38 = vadd.f32 %v2808_v50, %v725_v60  ;;  %v798_v31 = vmul.f32 %v2307_v61, %v797_v26  ;;  %v806_v60 = vand.u32 2147483648, %v2795_v36 }
  0xfc   :  { %v812_v4 = vmul.f32 %v810_v38, %v753_v1  ;;  %v799_v58 = vadd.f32 %v2307_v61, %v798_v31 }
  0xfe   :  { %v814_v17 = vadd.f32 %v812_v4, %v428_v62  ;;  %v793_v62 = vsel %vm790_vm11, %v792_v51, %v788_v54  ;;  %v803_v1 = vsel %vm802_vm14, %v2307_v61, %v799_v58  ;;  %v807_v4 = vor.u32 1.1754944e-38, %v806_v60  ;;  %v2842_v61 = vpop.f32.mrf.mxu0 }
 0x100   :  { %2308 = vtanh.f32 %v814_v17  ;;  %v808_v9 = vsel %vm805_vm15, %v807_v4, %v803_v1 }
 0x101   :  { %v727_v11 = vpop.f32.mrf.mxu3 }
 0x102   :  { %v811_v29 = vadd.f32 %v2808_v50, %v727_v11  ;;  %v383_v11 = vpop.f32.mrf.mxu1 }
 0x104   :  { %v813_v46 = vmul.f32 %v811_v29, %v768_v42 }
 0x106   :  { %v2309_v47 = vpop.eup %2308  ;;  %v815_v52 = vadd.f32 %v813_v46, %v430_v45  ;;  %v2847_v28 = vpop.f32.mrf.mxu0 }
 0x107   :  { %v818_v57 = vsub.f32 0.0, %v2309_v47 }
 0x108   :  { %2310 = vtanh.f32 %v815_v52 }
 0x109   :  { %v820_v38 = vmul.f32 %v818_v57, %v793_v62 }
 0x10a   :  { %v385_v29 = vpop.f32.mrf.mxu1 }
 0x10b   :  { %v2832_v41 = vadd.f32 %v2309_v47, %v820_v38 }
 0x10d   :  { %v824_v17 = vpack.c.bf16 %v2832_v41, %v2832_v41 }
 0x10e   :  { %v2311_v2 = vpop.eup %2310  ;;  %v2858_v32 = vpop.f32.mrf.mxu0 }
 0x10f   :  { %v819_v8 = vsub.f32 0.0, %v2311_v2  ;;  %v837_v24 = vunpack.c.l.b16 %v824_v17 }
 0x111   :  { %v821_v13 = vmul.f32 %v819_v8, %v808_v9  ;;  %v384_v8 = vadd.f32 %v383_v11, %v2788_v56 }
 0x112   :  { %v2874_v39 = vpop.f32.mrf.mxu1 }
 0x113   :  { %v2834_v14 = vadd.f32 %v2311_v2, %v821_v13 }
 0x115   :  { %v2244_v36 = vpack.c.bf16 %v2834_v14, %v2832_v41  ;;  %v825_v18 = vpack.c.bf16 %v2834_v14, %v2834_v14 }
 0x116   :  { %v2866_v37 = vpop.f32.mrf.mxu0 }
 0x117   :  { %2245 = vst [vmem:[#allocation12] sm:$0xff] %v2244_v36   ;;  %v838_v25 = vunpack.c.l.b16 %v825_v18  ;;  %v335_v18 = vadd.f32 %v2830_v0, %v2783_v40 }
 0x119   :  { %v839_v26 = vpack.c.b16 %v838_v25, %v837_v24  ;;  %v386_v25 = vadd.f32 %v385_v29, %v2788_v56 }
 0x11a   :  { %v2878_v45 = vpop.f32.mrf.mxu1 }
 0x11b   :  { %849 = vmatmul.bf16.vlgmr.msrb.gmra.mxu3 %v839_v26  ;;  %863 = vmatmul.bf16.vlgmr.msrb.gmra.mxu0 %v839_v26 }
 0x11c   :  { %877 = vmatmul.bf16.vlgmr.msrb.gmra.mxu1 %v839_v26  ;;  %1177 = vmatpush.bf16.msrb.mxu3 %v2677_v49 }
 0x11d   :  { %1303 = vmatpush.bf16.msrb.mxu0 %v2636_v3  ;;  %1317 = vmatpush.bf16.msrb.mxu1 %v2659_v10 }
 0x11e   :  { %v2876_v42 = vpop.f32.mrf.mxu0 }
 0x120   :  { %1178 = vmatpush.bf16.msrb.mxu3 %v2684_v59 }
 0x121   :  { %1304 = vmatpush.bf16.msrb.mxu0 %v2639_v7  ;;  %1318 = vmatpush.bf16.msrb.mxu1 %v2663_v21 }
 0x122   :  { %v2882_v31 = vpop.f32.mrf.mxu1 }
 0x124   :  { %1179 = vmatpush.bf16.msrb.mxu3 %v2692_v5 }
 0x125   :  { %1305 = vmatpush.bf16.msrb.mxu0 %v2642_v16  ;;  %1319 = vmatpush.bf16.msrb.mxu1 %v2670_v33 }
 0x126   :  { %v2880_v46 = vpop.f32.mrf.mxu0 }
 0x127   :  { %3335 = vst [vmem:[#allocation17_spill] sm:$0xff] %v2880_v46 }
 0x128   :  { %1180 = vmatpush.bf16.msrb.mxu3 %v2699_v15 }
 0x129   :  { %1306 = vmatpush.bf16.msrb.mxu0 %v2645_v23  ;;  %1320 = vmatpush.bf16.msrb.mxu1 %v2675_v44 }
 0x12a   :  { %v2886_v51 = vpop.f32.mrf.mxu1 }
 0x12b   :  { %3337 = vst [vmem:[#allocation19_spill] sm:$0xff] %v2886_v51 }
 0x12c   :  { %1181 = vmatpush.bf16.msrb.mxu3 %v2708_v20 }
 0x12d   :  { %1307 = vmatpush.bf16.msrb.mxu0 %v2648_v34  ;;  %1321 = vmatpush.bf16.msrb.mxu1 %v2681_v53 }
 0x12e   :  { %v2884_v47 = vpop.f32.mrf.mxu0 }
 0x12f   :  { %3336 = vst [vmem:[#allocation18_spill] sm:$0xff] %v2884_v47 }
 0x130   :  { %1182 = vmatpush.bf16.msrb.mxu3 %v2715_v22 }
 0x131   :  { %1308 = vmatpush.bf16.msrb.mxu0 %v2651_v43  ;;  %1322 = vmatpush.bf16.msrb.mxu1 %v2689_v63 }
 0x132   :  { %v2890_v54 = vpop.f32.mrf.mxu1 }
 0x133   :  { %3339 = vst [vmem:[#allocation21_spill] sm:$0xff] %v2890_v54 }
 0x134   :  { %1183 = vmatpush.bf16.msrb.mxu3 %v2722_v30 }
 0x135   :  { %1309 = vmatpush.bf16.msrb.mxu0 %v2654_v55  ;;  %1323 = vmatpush.bf16.msrb.mxu1 %v2696_v12 }
 0x136   :  { %v2888_v52 = vpop.f32.mrf.mxu0 }
 0x137   :  { %3338 = vst [vmem:[#allocation20_spill] sm:$0xff] %v2888_v52 }
 0x138   :  { %1184 = vmatpush.bf16.msrb.mxu3 %v2728_v35 }
 0x139   :  { %1310 = vmatpush.bf16.msrb.mxu0 %v2657_v6  ;;  %1324 = vmatpush.bf16.msrb.mxu1 %v2705_v19 }
 0x13a   :  { %v2894_v58 = vpop.f32.mrf.mxu1 }
 0x13b   :  { %3341 = vst [vmem:[#allocation23_spill] sm:$0xff] %v2894_v58 }
 0x13e   :  { %v2892_v57 = vpop.f32.mrf.mxu0 }
 0x13f   :  { %3340 = vst [vmem:[#allocation22_spill] sm:$0xff] %v2892_v57 }
 0x142   :  { %v2898_v62 = vpop.f32.mrf.mxu1 }
 0x143   :  { %3343 = vst [vmem:[#allocation25_spill] sm:$0xff] %v2898_v62 }
 0x146   :  { %v2896_v60 = vpop.f32.mrf.mxu0 }
 0x147   :  { %3342 = vst [vmem:[#allocation24_spill] sm:$0xff] %v2896_v60 }
 0x14a   :  { %v2902_v38 = vpop.f32.mrf.mxu1 }
 0x14b   :  { %3345 = vst [vmem:[#allocation27_spill] sm:$0xff] %v2902_v38 }
 0x14e   :  { %v2900_v27 = vpop.f32.mrf.mxu0 }
 0x14f   :  { %3344 = vst [vmem:[#allocation26_spill] sm:$0xff] %v2900_v27 }
 0x152   :  { %v2906_v2 = vpop.f32.mrf.mxu1 }
 0x153   :  { %3347 = vst [vmem:[#allocation29_spill] sm:$0xff] %v2906_v2 }
 0x156   :  { %v2904_v1 = vpop.f32.mrf.mxu0 }
 0x157   :  { %3346 = vst [vmem:[#allocation28_spill] sm:$0xff] %v2904_v1 }
 0x15a   :  { %v2911_v9 = vpop.f32.mrf.mxu1 }
 0x15b   :  { %3349 = vst [vmem:[#allocation31_spill] sm:$0xff] %v2911_v9 }
 0x15e   :  { %v2908_v4 = vpop.f32.mrf.mxu0 }
 0x15f   :  { %3348 = vst [vmem:[#allocation30_spill] sm:$0xff] %v2908_v4  ;;  %v337_v4 = vadd.f32 %v2842_v61, %v2783_v40 }
 0x162   :  { %v2916_v60 = vpop.f32.mrf.mxu1 }
 0x163   :  { %3350 = vst [vmem:[#allocation32_spill] sm:$0xff] %v2916_v60 }
 0x198   :  { %v864_v13 = vpop.f32.mrf.mxu0 }
 0x199   :  { %v923_v17 = vadd.f32 %v864_v13, %v384_v8 }
 0x19b   :  { %v2159_v36 = vmul.f32 -1.442695, %v923_v17 }
 0x19d   :  { %2312 = vpow2.f32 %v2159_v36  ;;  %v2922_v36 = vpop.f32.mrf.mxu1 }
 0x19e   :  { %v850_v24 = vpop.f32.mrf.mxu3  ;;  %3351 = vst [vmem:[#allocation33_spill] sm:$0xff] %v2922_v36 }
 0x19f   :  { %v883_v26 = vadd.f32 %v850_v24, %v335_v18 }
 0x1a0   :  { %v866_v1 = vpop.f32.mrf.mxu0 }
 0x1a1   :  { %v2157_v27 = vmul.f32 -1.442695, %v883_v26  ;;  %v924_v2 = vadd.f32 %v866_v1, %v386_v25 }
 0x1a3   :  { %2314 = vpow2.f32 %v2157_v27  ;;  %v2160_v11 = vmul.f32 -1.442695, %v924_v2  ;;  %v2313_v8 = vpop.eup %2312 }
 0x1a4   :  { %v2920_v9 = vadd.f32 1.0, %v2313_v8 }
 0x1a5   :  { %2316 = vpow2.f32 %v2160_v11  ;;  %v878_v8 = vpop.f32.mrf.mxu1 }
 0x1a6   :  { %v852_v13 = vpop.f32.mrf.mxu3  ;;  %v963_v60 = vadd.f32 %v2808_v50, %v878_v8  ;;  %vm938_vm9 = vweird.f32 %v2920_v9 }
 0x1a7   :  { %v884_v17 = vadd.f32 %v852_v13, %v337_v4 }
 0x1a9   :  { %v2315_v0 = vpop.eup %2314  ;;  %v2158_v29 = vmul.f32 -1.442695, %v884_v17 }
 0x1aa   :  { %v891_v18 = vadd.f32 1.0, %v2315_v0 }
 0x1ab   :  { %2318 = vpow2.f32 %v2158_v29  ;;  %v2317_v27 = vpop.eup %2316  ;;  %v432_v29 = vpop.f32.mrf.mxu2 }
 0x1ac   :  { %2320 = vrcp.f32 %v891_v18  ;;  %v2925_v2 = vadd.f32 1.0, %v2317_v27  ;;  %v904_v13 = vand.u32 2147483648, %v891_v18  ;;  %v902_v0 = vand.u32 2147483647, %v891_v18 }
 0x1ad   :  { %2322 = vrcp.f32 %v2920_v9  ;;  %vm898_vm1 = vweird.f32 %v891_v18  ;;  %v880_v51 = vpop.f32.mrf.mxu1 }
 0x1ae   :  { %v905_v57 = vor.u32 1.1754944e-38, %v904_v13  ;;  %vm903_vm3 = vcmp.eq.f32.partialorder %v902_v0, 8.507059e+37  ;;  %vm953_vm13 = vweird.f32 %v2925_v2 }
 0x1b1   :  { %v2319_v1 = vpop.eup %2318 }
 0x1b2   :  { %v2321_v61 = vpop.eup %2320  ;;  %v892_v24 = vadd.f32 1.0, %v2319_v1 }
 0x1b3   :  { %v2927_v25 = vpop.eup %2322  ;;  %v894_v4 = vmul.f32 %v2321_v61, %v891_v18  ;;  %vm899_vm0 = vweird.f32 %v2321_v61 }
 0x1b4   :  { %2324 = vrcp.f32 %v892_v24  ;;  %v934_v11 = vmul.f32 %v2927_v25, %v2920_v9  ;;  %vm900_vm2 = vmor %vm898_vm1, %vm899_vm0  ;;  %v919_v18 = vand.u32 2147483648, %v892_v24  ;;  %v917_v8 = vand.u32 2147483647, %v892_v24 }
 0x1b5   :  { %2326 = vrcp.f32 %v2925_v2  ;;  %v895_v26 = vsub.f32 1.0, %v894_v4  ;;  %v433_v4 = vadd.f32 %v432_v29, %v2803_v48  ;;  %vm913_vm5 = vweird.f32 %v892_v24 }
 0x1b6   :  { %v935_v1 = vsub.f32 1.0, %v934_v11  ;;  %vm939_vm6 = vweird.f32 %v2927_v25  ;;  %vm918_vm8 = vcmp.eq.f32.partialorder %v917_v8, 8.507059e+37  ;;  %v957_v8 = vand.u32 2147483647, %v2925_v2 }
 0x1b7   :  { %v896_v17 = vmul.f32 %v2321_v61, %v895_v26  ;;  %vm940_vm10 = vmor %vm938_vm9, %vm939_vm6 }
 0x1b8   :  { %v936_v54 = vmul.f32 %v2927_v25, %v935_v1  ;;  %vm958_vm15 = vcmp.eq.f32.partialorder %v957_v8, 8.507059e+37 }
 0x1b9   :  { %v897_v27 = vadd.f32 %v2321_v61, %v896_v17 }
 0x1ba   :  { %v2325_v36 = vpop.eup %2324 }
 0x1bb   :  { %v2327_v38 = vpop.eup %2326  ;;  %v909_v52 = vmul.f32 %v2325_v36, %v892_v24  ;;  %v901_v62 = vsel %vm900_vm2, %v2321_v61, %v897_v27  ;;  %vm914_vm4 = vweird.f32 %v2325_v36 }
 0x1bc   :  { %v906_v58 = vsel %vm903_vm3, %v905_v57, %v901_v62  ;;  %v949_v17 = vmul.f32 %v2327_v38, %v2925_v2  ;;  %v937_v57 = vadd.f32 %v2927_v25, %v936_v54  ;;  %vm915_vm7 = vmor %vm913_vm5, %vm914_vm4  ;;  %v964_v62 = vadd.f32 %v2808_v50, %v880_v51 }
 0x1bd   :  { %v965_v47 = vmul.f32 %v963_v60, %v906_v58  ;;  %v910_v26 = vsub.f32 1.0, %v909_v52  ;;  %v434_v58 = vpop.f32.mrf.mxu2  ;;  %v920_v52 = vor.u32 1.1754944e-38, %v919_v18  ;;  %v944_v60 = vand.u32 2147483648, %v2920_v9 }
 0x1be   :  { %v950_v61 = vsub.f32 1.0, %v949_v17  ;;  %v435_v24 = vadd.f32 %v434_v58, %v2803_v48  ;;  %v941_v54 = vsel %vm940_vm10, %v2927_v25, %v937_v57  ;;  %vm954_vm12 = vweird.f32 %v2327_v38 }
 0x1bf   :  { %v967_v46 = vadd.f32 %v965_v47, %v433_v4  ;;  %v911_v11 = vmul.f32 %v2325_v36, %v910_v26  ;;  %v945_v4 = vor.u32 1.1754944e-38, %v944_v60  ;;  %vm955_vm14 = vmor %vm953_vm13, %vm954_vm12 }
 0x1c0   :  { %v951_v27 = vmul.f32 %v2327_v38, %v950_v61 }
 0x1c1   :  { %2328 = vtanh.f32 %v967_v46  ;;  %v912_v13 = vadd.f32 %v2325_v36, %v911_v11  ;;  %v942_v46 = vand.u32 2147483647, %v2920_v9  ;;  %v959_v9 = vand.u32 2147483648, %v2925_v2 }
 0x1c2   :  { %v952_v18 = vadd.f32 %v2327_v38, %v951_v27 }
 0x1c3   :  { %v916_v47 = vsel %vm915_vm7, %v2325_v36, %v912_v13  ;;  %vm943_vm11 = vcmp.eq.f32.partialorder %v942_v46, 8.507059e+37  ;;  %v960_v61 = vor.u32 1.1754944e-38, %v959_v9  ;;  %v389_v9 = vadd.f32 %v2874_v39, %v2788_v56 }
 0x1c4   :  { %v921_v0 = vsel %vm918_vm8, %v920_v52, %v916_v47  ;;  %v946_v36 = vsel %vm943_vm11, %v945_v4, %v941_v54  ;;  %v956_v25 = vsel %vm955_vm14, %v2327_v38, %v952_v18  ;;  %v340_v18 = vadd.f32 %v2847_v28, %v2783_v40 }
 0x1c5   :  { %v966_v29 = vmul.f32 %v964_v62, %v921_v0  ;;  %v961_v57 = vsel %vm958_vm15, %v960_v61, %v956_v25 }
 0x1c7   :  { %v2329_v1 = vpop.eup %2328  ;;  %v968_v26 = vadd.f32 %v966_v29, %v435_v24 }
 0x1c8   :  { %v971_v51 = vsub.f32 %v2832_v41, %v2329_v1 }
 0x1c9   :  { %2330 = vtanh.f32 %v968_v26 }
 0x1ca   :  { %v973_v17 = vmul.f32 %v971_v51, %v946_v36 }
 0x1cc   :  { %v2947_v11 = vadd.f32 %v2329_v1, %v973_v17 }
 0x1ce   :  { %v977_v60 = vpack.c.bf16 %v2947_v11, %v2947_v11 }
 0x1cf   :  { %v2331_v13 = vpop.eup %2330 }
 0x1d0   :  { %v972_v41 = vsub.f32 %v2834_v14, %v2331_v13  ;;  %v991_v38 = vunpack.c.l.b16 %v977_v60  ;;  %v2968_v14 = vpop.f32.mrf.mxu2  ;;  %v391_v60 = vadd.f32 %v2878_v45, %v2788_v56 }
 0x1d2   :  { %v974_v58 = vmul.f32 %v972_v41, %v961_v57 }
 0x1d4   :  { %v2951_v52 = vadd.f32 %v2331_v13, %v974_v58  ;;  %v342_v58 = vadd.f32 %v2858_v32, %v2783_v40 }
 0x1d6   :  { %v2249_v62 = vpack.c.bf16 %v2951_v52, %v2947_v11  ;;  %v978_v2 = vpack.c.bf16 %v2951_v52, %v2951_v52 }
 0x1d8   :  { %2250 = vst [vmem:[#allocation12 + $0x8] sm:$0xff] %v2249_v62   ;;  %v992_v47 = vunpack.c.l.b16 %v978_v2  ;;  %v2979_v0 = vpop.f32.mrf.mxu2 }
 0x1da   :  { %v993_v46 = vpack.c.b16 %v992_v47, %v991_v38 }
 0x1dc   :  { %1003 = vmatmul.bf16.vlgmr.msrb.gmra.mxu2 %v993_v46  ;;  %1017 = vmatmul.bf16.vlgmr.msra.gmra.mxu3 %v993_v46 }
 0x1dd   :  { %1031 = vmatmul.bf16.vlgmr.msra.gmra.mxu0 %v993_v46  ;;  %1331 = vmatpush.bf16.msrb.mxu2 %v2677_v49 }
 0x1de   :  { %1457 = vmatpush.bf16.msra.mxu3 %v2636_v3  ;;  %1471 = vmatpush.bf16.msra.mxu0 %v2659_v10 }
 0x1e0   :  { %v2987_v24 = vpop.f32.mrf.mxu2 }
 0x1e1   :  { %1332 = vmatpush.bf16.msrb.mxu2 %v2684_v59 }
 0x1e2   :  { %1458 = vmatpush.bf16.msra.mxu3 %v2639_v7  ;;  %1472 = vmatpush.bf16.msra.mxu0 %v2663_v21 }
 0x1e5   :  { %1333 = vmatpush.bf16.msrb.mxu2 %v2692_v5 }
 0x1e6   :  { %1459 = vmatpush.bf16.msra.mxu3 %v2642_v16  ;;  %1473 = vmatpush.bf16.msra.mxu0 %v2670_v33 }
 0x1e8   :  { %v2989_v29 = vpop.f32.mrf.mxu2 }
 0x1e9   :  { %1334 = vmatpush.bf16.msrb.mxu2 %v2699_v15 }
 0x1ea   :  { %1460 = vmatpush.bf16.msra.mxu3 %v2645_v23  ;;  %1474 = vmatpush.bf16.msra.mxu0 %v2675_v44 }
 0x1ed   :  { %1335 = vmatpush.bf16.msrb.mxu2 %v2708_v20 }
 0x1ee   :  { %1461 = vmatpush.bf16.msra.mxu3 %v2648_v34  ;;  %1475 = vmatpush.bf16.msra.mxu0 %v2681_v53 }
 0x1f0   :  { %v2991_v27 = vpop.f32.mrf.mxu2 }
 0x1f1   :  { %1336 = vmatpush.bf16.msrb.mxu2 %v2715_v22 }
 0x1f2   :  { %1462 = vmatpush.bf16.msra.mxu3 %v2651_v43  ;;  %1476 = vmatpush.bf16.msra.mxu0 %v2689_v63 }
 0x1f5   :  { %1337 = vmatpush.bf16.msrb.mxu2 %v2722_v30 }
 0x1f6   :  { %1463 = vmatpush.bf16.msra.mxu3 %v2654_v55  ;;  %1477 = vmatpush.bf16.msra.mxu0 %v2696_v12 }
 0x1f8   :  { %v2993_v54 = vpop.f32.mrf.mxu2 }
 0x1f9   :  { %1338 = vmatpush.bf16.msrb.mxu2 %v2728_v35 }
 0x1fa   :  { %1464 = vmatpush.bf16.msra.mxu3 %v2657_v6  ;;  %1478 = vmatpush.bf16.msra.mxu0 %v2705_v19 }
 0x200   :  { %v2995_v1 = vpop.f32.mrf.mxu2 }
 0x201   :  { %3352 = vst [vmem:[#allocation34_spill] sm:$0xff] %v2995_v1 }
 0x208   :  { %v2997_v4 = vpop.f32.mrf.mxu2 }
 0x209   :  { %3353 = vst [vmem:[#allocation35_spill] sm:$0xff] %v2997_v4 }
 0x210   :  { %v2999_v26 = vpop.f32.mrf.mxu2 }
 0x211   :  { %3354 = vst [vmem:[#allocation36_spill] sm:$0xff] %v2999_v26 }
 0x218   :  { %v3001_v51 = vpop.f32.mrf.mxu2 }
 0x219   :  { %3355 = vst [vmem:[#allocation37_spill] sm:$0xff] %v3001_v51 }
 0x220   :  { %v3003_v36 = vpop.f32.mrf.mxu2 }
 0x221   :  { %3356 = vst [vmem:[#allocation38_spill] sm:$0xff] %v3003_v36 }
 0x228   :  { %v3005_v17 = vpop.f32.mrf.mxu2 }
 0x229   :  { %3357 = vst [vmem:[#allocation39_spill] sm:$0xff] %v3005_v17 }
 0x25f   :  { %v1004_v8 = vpop.f32.mrf.mxu2  ;;  %v1018_v25 = vpop.f32.mrf.mxu3 }
 0x260   :  { %v1037_v13 = vadd.f32 %v1004_v8, %v340_v18  ;;  %v1077_v61 = vadd.f32 %v1018_v25, %v389_v9 }
 0x262   :  { %v2161_v41 = vmul.f32 -1.442695, %v1037_v13  ;;  %v2163_v57 = vmul.f32 -1.442695, %v1077_v61 }
 0x264   :  { %2332 = vpow2.f32 %v2161_v41 }
 0x265   :  { %2334 = vpow2.f32 %v2163_v57 }
 0x267   :  { %v1006_v62 = vpop.f32.mrf.mxu2  ;;  %v1020_v2 = vpop.f32.mrf.mxu3 }
 0x268   :  { %v1038_v28 = vadd.f32 %v1006_v62, %v342_v58  ;;  %v1078_v38 = vadd.f32 %v1020_v2, %v391_v60  ;;  %v1032_v58 = vpop.f32.mrf.mxu0 }
 0x26a   :  { %v2333_v47 = vpop.eup %2332  ;;  %v2162_v39 = vmul.f32 -1.442695, %v1038_v28  ;;  %v2164_v18 = vmul.f32 -1.442695, %v1078_v38 }
 0x26b   :  { %v2335_v46 = vpop.eup %2334  ;;  %v1045_v17 = vadd.f32 1.0, %v2333_v47 }
 0x26c   :  { %v3015_v9 = vadd.f32 1.0, %v2335_v46  ;;  %2336 = vpow2.f32 %v2162_v39 }
 0x26d   :  { %2338 = vrcp.f32 %v1045_v17  ;;  %v1058_v60 = vand.u32 2147483648, %v1045_v17  ;;  %v1056_v28 = vand.u32 2147483647, %v1045_v17  ;;  %vm1052_vm1 = vweird.f32 %v1045_v17 }
 0x26e   :  { %2340 = vrcp.f32 %v3015_v9  ;;  %vm1092_vm9 = vweird.f32 %v3015_v9 }
 0x26f   :  { %2342 = vpow2.f32 %v2164_v18  ;;  %v1059_v39 = vor.u32 1.1754944e-38, %v1058_v60  ;;  %v1117_v18 = vadd.f32 %v2808_v50, %v1032_v58  ;;  %vm1057_vm3 = vcmp.eq.f32.partialorder %v1056_v28, 8.507059e+37 }
 0x270   :  { %v1034_v58 = vpop.f32.mrf.mxu0 }
 0x272   :  { %v2337_v32 = vpop.eup %2336 }
 0x273   :  { %v2339_v8 = vpop.eup %2338  ;;  %v1046_v25 = vadd.f32 1.0, %v2337_v32 }
 0x274   :  { %v3018_v45 = vpop.eup %2340  ;;  %v1048_v13 = vmul.f32 %v2339_v8, %v1045_v17  ;;  %vm1053_vm0 = vweird.f32 %v2339_v8 }
 0x275   :  { %v2343_v61 = vpop.eup %2342  ;;  %2344 = vrcp.f32 %v1046_v25  ;;  %v1088_v62 = vmul.f32 %v3018_v45, %v3015_v9  ;;  %vm1054_vm2 = vmor %vm1052_vm1, %vm1053_vm0  ;;  %vm1067_vm5 = vweird.f32 %v1046_v25  ;;  %vm1093_vm6 = vweird.f32 %v3018_v45 }
 0x276   :  { %v1049_v41 = vsub.f32 1.0, %v1048_v13  ;;  %v3020_v57 = vadd.f32 1.0, %v2343_v61  ;;  %vm1094_vm10 = vmor %vm1092_vm9, %vm1093_vm6 }
 0x277   :  { %v1089_v46 = vsub.f32 1.0, %v1088_v62  ;;  %v1071_v62 = vand.u32 2147483647, %v1046_v25 }
 0x278   :  { %v1050_v2 = vmul.f32 %v2339_v8, %v1049_v41  ;;  %2346 = vrcp.f32 %v3020_v57  ;;  %v438_v41 = vadd.f32 %v2968_v14, %v2803_v48  ;;  %vm1107_vm13 = vweird.f32 %v3020_v57 }
 0x279   :  { %v1090_v4 = vmul.f32 %v3018_v45, %v1089_v46  ;;  %v1118_v46 = vadd.f32 %v2808_v50, %v1034_v58  ;;  %vm1072_vm8 = vcmp.eq.f32.partialorder %v1071_v62, 8.507059e+37 }
 0x27a   :  { %v1051_v38 = vadd.f32 %v2339_v8, %v1050_v2  ;;  %v1073_v2 = vand.u32 2147483648, %v1046_v25 }
 0x27b   :  { %v2345_v47 = vpop.eup %2344  ;;  %v1091_v28 = vadd.f32 %v3018_v45, %v1090_v4 }
 0x27c   :  { %v1055_v32 = vsel %vm1054_vm2, %v2339_v8, %v1051_v38  ;;  %v1063_v13 = vmul.f32 %v2345_v47, %v1046_v25  ;;  %vm1068_vm4 = vweird.f32 %v2345_v47  ;;  %v1074_v14 = vor.u32 1.1754944e-38, %v1073_v2 }
 0x27d   :  { %v1060_v61 = vsel %vm1057_vm3, %v1059_v39, %v1055_v32  ;;  %vm1069_vm7 = vmor %vm1067_vm5, %vm1068_vm4  ;;  %v1098_v39 = vand.u32 2147483648, %v3015_v9  ;;  %v1095_v25 = vsel %vm1094_vm10, %v3018_v45, %v1091_v28 }
 0x27e   :  { %v2347_v36 = vpop.eup %2346  ;;  %v1119_v51 = vmul.f32 %v1117_v18, %v1060_v61  ;;  %v1064_v26 = vsub.f32 1.0, %v1063_v13 }
 0x27f   :  { %v1103_v17 = vmul.f32 %v2347_v36, %v3020_v57  ;;  %v1099_v61 = vor.u32 1.1754944e-38, %v1098_v39  ;;  %vm1108_vm12 = vweird.f32 %v2347_v36 }
 0x280   :  { %v1121_v1 = vadd.f32 %v1119_v51, %v438_v41  ;;  %v1065_v60 = vmul.f32 %v2345_v47, %v1064_v26  ;;  %v1096_v26 = vand.u32 2147483647, %v3015_v9  ;;  %vm1109_vm14 = vmor %vm1107_vm13, %vm1108_vm12 }
 0x281   :  { %v1104_v38 = vsub.f32 1.0, %v1103_v17 }
 0x282   :  { %v1066_v8 = vadd.f32 %v2345_v47, %v1065_v60  ;;  %2348 = vtanh.f32 %v1121_v1  ;;  %v440_v1 = vadd.f32 %v2979_v0, %v2803_v48  ;;  %vm1097_vm11 = vcmp.eq.f32.partialorder %v1096_v26, 8.507059e+37 }
 0x283   :  { %v1105_v32 = vmul.f32 %v2347_v36, %v1104_v38  ;;  %v1100_v2 = vsel %vm1097_vm11, %v1099_v61, %v1095_v25  ;;  %v1113_v60 = vand.u32 2147483648, %v3020_v57  ;;  %v1111_v0 = vand.u32 2147483647, %v3020_v57 }
 0x284   :  { %v1070_v18 = vsel %vm1069_vm7, %v2345_v47, %v1066_v8  ;;  %v394_v25 = vadd.f32 %v2882_v31, %v2788_v56 }
 0x285   :  { %v1075_v51 = vsel %vm1072_vm8, %v1074_v14, %v1070_v18  ;;  %v1106_v17 = vadd.f32 %v2347_v36, %v1105_v32  ;;  %v1114_v8 = vor.u32 1.1754944e-38, %v1113_v60  ;;  %vm1112_vm15 = vcmp.eq.f32.partialorder %v1111_v0, 8.507059e+37 }
 0x286   :  { %v1120_v4 = vmul.f32 %v1118_v46, %v1075_v51 }
 0x287   :  { %v1110_v45 = vsel %vm1109_vm14, %v2347_v36, %v1106_v17 }
 0x288   :  { %v2349_v13 = vpop.eup %2348  ;;  %v1122_v41 = vadd.f32 %v1120_v4, %v440_v1  ;;  %v1115_v28 = vsel %vm1112_vm15, %v1114_v8, %v1110_v45 }
 0x289   :  { %v1125_v47 = vsub.f32 %v2947_v11, %v2349_v13 }
 0x28a   :  { %2350 = vtanh.f32 %v1122_v41 }
 0x28b   :  { %v1127_v9 = vmul.f32 %v1125_v47, %v1100_v2 }
 0x28d   :  { %v3043_v62 = vadd.f32 %v2349_v13, %v1127_v9  ;;  %v347_v13 = vadd.f32 %v2876_v42, %v2783_v40 }
 0x28f   :  { %v1131_v39 = vpack.c.bf16 %v3043_v62, %v3043_v62 }
 0x290   :  { %v2351_v58 = vpop.eup %2350 }
 0x291   :  { %v1126_v11 = vsub.f32 %v2951_v52, %v2351_v58  ;;  %v1145_v36 = vunpack.c.l.b16 %v1131_v39  ;;  %v345_v52 = vadd.f32 %v2866_v37, %v2783_v40  ;;  %v3358_v37 = vld [vmem:[#allocation19_spill] sm:$0xff] }
 0x292   :  { %v396_v0 = vadd.f32 %v3358_v37, %v2788_v56 }
 0x293   :  { %v1128_v14 = vmul.f32 %v1126_v11, %v1115_v28 }
 0x295   :  { %v3046_v38 = vadd.f32 %v2351_v58, %v1128_v14 }
 0x297   :  { %v1132_v46 = vpack.c.bf16 %v3046_v38, %v3046_v38  ;;  %v2254_v57 = vpack.c.bf16 %v3046_v38, %v3043_v62 }
 0x299   :  { %2255 = vst [vmem:[#allocation12 + $0x10] sm:$0xff] %v2254_v57   ;;  %v1146_v18 = vunpack.c.l.b16 %v1132_v46 }
 0x29b   :  { %v1147_v26 = vpack.c.b16 %v1146_v18, %v1145_v36 }
 0x29d   :  { %1157 = vmatmul.bf16.vlgmr.msra.gmra.mxu1 %v1147_v26  ;;  %1171 = vmatmul.bf16.vlgmr.msra.gmra.mxu2 %v1147_v26 }
 0x29e   :  { %1185 = vmatmul.bf16.vlgmr.msrb.gmra.mxu3 %v1147_v26  ;;  %1485 = vmatpush.bf16.msra.mxu1 %v2677_v49 }
 0x29f   :  { %1611 = vmatpush.bf16.msra.mxu2 %v2636_v3  ;;  %1625 = vmatpush.bf16.msrb.mxu3 %v2659_v10 }
 0x2a2   :  { %1486 = vmatpush.bf16.msra.mxu1 %v2684_v59 }
 0x2a3   :  { %1612 = vmatpush.bf16.msra.mxu2 %v2639_v7  ;;  %1626 = vmatpush.bf16.msrb.mxu3 %v2663_v21 }
 0x2a6   :  { %1487 = vmatpush.bf16.msra.mxu1 %v2692_v5 }
 0x2a7   :  { %1613 = vmatpush.bf16.msra.mxu2 %v2642_v16  ;;  %1627 = vmatpush.bf16.msrb.mxu3 %v2670_v33 }
 0x2aa   :  { %1488 = vmatpush.bf16.msra.mxu1 %v2699_v15 }
 0x2ab   :  { %1614 = vmatpush.bf16.msra.mxu2 %v2645_v23  ;;  %1628 = vmatpush.bf16.msrb.mxu3 %v2675_v44 }
 0x2ae   :  { %1489 = vmatpush.bf16.msra.mxu1 %v2708_v20 }
 0x2af   :  { %1615 = vmatpush.bf16.msra.mxu2 %v2648_v34  ;;  %1629 = vmatpush.bf16.msrb.mxu3 %v2681_v53 }
 0x2b2   :  { %1490 = vmatpush.bf16.msra.mxu1 %v2715_v22 }
 0x2b3   :  { %1616 = vmatpush.bf16.msra.mxu2 %v2651_v43  ;;  %1630 = vmatpush.bf16.msrb.mxu3 %v2689_v63 }
 0x2b6   :  { %1491 = vmatpush.bf16.msra.mxu1 %v2722_v30 }
 0x2b7   :  { %1617 = vmatpush.bf16.msra.mxu2 %v2654_v55  ;;  %1631 = vmatpush.bf16.msrb.mxu3 %v2696_v12 }
 0x2ba   :  { %1492 = vmatpush.bf16.msra.mxu1 %v2728_v35 }
 0x2bb   :  { %1618 = vmatpush.bf16.msra.mxu2 %v2657_v6  ;;  %1632 = vmatpush.bf16.msrb.mxu3 %v2705_v19 }
 0x31a   :  { %v1158_v51 = vpop.f32.mrf.mxu1 }
 0x31b   :  { %v1191_v1 = vadd.f32 %v1158_v51, %v345_v52 }
 0x31d   :  { %v2165_v4 = vmul.f32 -1.442695, %v1191_v1 }
 0x31f   :  { %2352 = vpow2.f32 %v2165_v4 }
 0x320   :  { %v1172_v32 = vpop.f32.mrf.mxu2 }
 0x321   :  { %v1231_v61 = vadd.f32 %v1172_v32, %v394_v25  ;;  %v1186_v57 = vpop.f32.mrf.mxu3 }
 0x322   :  { %v1160_v41 = vpop.f32.mrf.mxu1 }
 0x323   :  { %v2167_v47 = vmul.f32 -1.442695, %v1231_v61  ;;  %v1192_v2 = vadd.f32 %v1160_v41, %v347_v13 }
 0x325   :  { %v2353_v17 = vpop.eup %2352  ;;  %2354 = vpow2.f32 %v2167_v47  ;;  %v2166_v9 = vmul.f32 -1.442695, %v1192_v2  ;;  %v1271_v47 = vadd.f32 %v2808_v50, %v1186_v57 }
 0x326   :  { %v1199_v60 = vadd.f32 1.0, %v2353_v17 }
 0x327   :  { %2356 = vpow2.f32 %v2166_v9  ;;  %v443_v9 = vadd.f32 %v2987_v24, %v2803_v48 }
 0x328   :  { %2358 = vrcp.f32 %v1199_v60  ;;  %v1174_v45 = vpop.f32.mrf.mxu2  ;;  %v1212_v36 = vand.u32 2147483648, %v1199_v60  ;;  %v1210_v52 = vand.u32 2147483647, %v1199_v60  ;;  %vm1206_vm1 = vweird.f32 %v1199_v60 }
 0x329   :  { %v1232_v31 = vadd.f32 %v1174_v45, %v396_v0 }
 0x32a   :  { %v1213_v32 = vor.u32 1.1754944e-38, %v1212_v36  ;;  %vm1211_vm3 = vcmp.eq.f32.partialorder %v1210_v52, 8.507059e+37 }
 0x32b   :  { %v2355_v58 = vpop.eup %2354  ;;  %v2168_v8 = vmul.f32 -1.442695, %v1232_v31 }
 0x32c   :  { %v3086_v11 = vadd.f32 1.0, %v2355_v58 }
 0x32d   :  { %v2357_v42 = vpop.eup %2356  ;;  %2360 = vpow2.f32 %v2168_v8  ;;  %v1188_v8 = vpop.f32.mrf.mxu3 }
 0x32e   :  { %v2359_v28 = vpop.eup %2358  ;;  %2362 = vrcp.f32 %v3086_v11  ;;  %v1200_v39 = vadd.f32 1.0, %v2357_v42  ;;  %v1252_v36 = vand.u32 2147483648, %v3086_v11  ;;  %vm1246_vm8 = vweird.f32 %v3086_v11 }
 0x32f   :  { %v1202_v14 = vmul.f32 %v2359_v28, %v1199_v60  ;;  %vm1207_vm0 = vweird.f32 %v2359_v28  ;;  %v1250_v52 = vand.u32 2147483647, %v3086_v11 }
 0x330   :  { %2364 = vrcp.f32 %v1200_v39  ;;  %vm1208_vm2 = vmor %vm1206_vm1, %vm1207_vm0  ;;  %v1227_v60 = vand.u32 2147483648, %v1200_v39  ;;  %vm1221_vm6 = vweird.f32 %v1200_v39 }
 0x331   :  { %v1203_v46 = vsub.f32 1.0, %v1202_v14  ;;  %v1225_v14 = vand.u32 2147483647, %v1200_v39  ;;  %vm1251_vm11 = vcmp.eq.f32.partialorder %v1250_v52, 8.507059e+37 }
 0x333   :  { %v2361_v18 = vpop.eup %2360  ;;  %v1204_v26 = vmul.f32 %v2359_v28, %v1203_v46  ;;  %vm1226_vm9 = vcmp.eq.f32.partialorder %v1225_v14, 8.507059e+37 }
 0x334   :  { %v2363_v51 = vpop.eup %2362  ;;  %v3089_v1 = vadd.f32 1.0, %v2361_v18  ;;  %v1228_v18 = vor.u32 1.1754944e-38, %v1227_v60 }
 0x335   :  { %v1242_v4 = vmul.f32 %v2363_v51, %v3086_v11  ;;  %v1205_v25 = vadd.f32 %v2359_v28, %v1204_v26  ;;  %vm1247_vm5 = vweird.f32 %v2363_v51  ;;  %v1272_v26 = vadd.f32 %v2808_v50, %v1188_v8 }
 0x336   :  { %2366 = vrcp.f32 %v3089_v1  ;;  %v2365_v13 = vpop.eup %2364  ;;  %vm1248_vm10 = vmor %vm1246_vm8, %vm1247_vm5  ;;  %vm1261_vm13 = vweird.f32 %v3089_v1 }
 0x337   :  { %v1243_v61 = vsub.f32 1.0, %v1242_v4  ;;  %v1209_v41 = vsel %vm1208_vm2, %v2359_v28, %v1205_v25  ;;  %v1217_v17 = vmul.f32 %v2365_v13, %v1200_v39  ;;  %vm1222_vm4 = vweird.f32 %v2365_v13 }
 0x338   :  { %v1214_v2 = vsel %vm1211_vm3, %v1213_v32, %v1209_v41  ;;  %vm1223_vm7 = vmor %vm1221_vm6, %vm1222_vm4  ;;  %v445_v32 = vadd.f32 %v2989_v29, %v2803_v48  ;;  %v1265_v29 = vand.u32 2147483647, %v3089_v1 }
 0x339   :  { %v1273_v37 = vmul.f32 %v1271_v47, %v1214_v2  ;;  %v1244_v0 = vmul.f32 %v2363_v51, %v1243_v61  ;;  %v1218_v45 = vsub.f32 1.0, %v1217_v17  ;;  %v1253_v47 = vor.u32 1.1754944e-38, %v1252_v36 }
 0x33a   :  { %vm1266_vm15 = vcmp.eq.f32.partialorder %v1265_v29, 8.507059e+37 }
 0x33b   :  { %v1275_v31 = vadd.f32 %v1273_v37, %v443_v9  ;;  %v1219_v42 = vmul.f32 %v2365_v13, %v1218_v45  ;;  %v1245_v46 = vadd.f32 %v2363_v51, %v1244_v0  ;;  %v1267_v0 = vand.u32 2147483648, %v3089_v1 }
 0x33c   :  { %v2367_v58 = vpop.eup %2366 }
 0x33d   :  { %2368 = vtanh.f32 %v1275_v31  ;;  %v1257_v28 = vmul.f32 %v2367_v58, %v3089_v1  ;;  %v1220_v57 = vadd.f32 %v2365_v13, %v1219_v42  ;;  %v1249_v61 = vsel %vm1248_vm10, %v2363_v51, %v1245_v46 }
 0x33e   :  { %v1254_v9 = vsel %vm1251_vm11, %v1253_v47, %v1249_v61  ;;  %vm1262_vm12 = vweird.f32 %v2367_v58  ;;  %v1268_v31 = vor.u32 1.1754944e-38, %v1267_v0 }
 0x33f   :  { %v1258_v24 = vsub.f32 1.0, %v1257_v28  ;;  %v1224_v4 = vsel %vm1223_vm7, %v2365_v13, %v1220_v57  ;;  %vm1263_vm14 = vmor %vm1261_vm13, %vm1262_vm12 }
 0x340   :  { %v1229_v25 = vsel %vm1226_vm9, %v1228_v18, %v1224_v4 }
 0x341   :  { %v1274_v39 = vmul.f32 %v1272_v26, %v1229_v25  ;;  %v1259_v2 = vmul.f32 %v2367_v58, %v1258_v24 }
 0x343   :  { %v2369_v41 = vpop.eup %2368  ;;  %v1276_v50 = vadd.f32 %v1274_v39, %v445_v32  ;;  %v1260_v11 = vadd.f32 %v2367_v58, %v1259_v2 }
 0x344   :  { %v1279_v17 = vsub.f32 %v3043_v62, %v2369_v41 }
 0x345   :  { %2370 = vtanh.f32 %v1276_v50  ;;  %v1264_v51 = vsel %vm1263_vm14, %v2367_v58, %v1260_v11 }
 0x346   :  { %v1281_v37 = vmul.f32 %v1279_v17, %v1254_v9  ;;  %v1269_v60 = vsel %vm1266_vm15, %v1268_v31, %v1264_v51 }
 0x348   :  { %v3104_v13 = vadd.f32 %v2369_v41, %v1281_v37 }
 0x34a   :  { %v1285_v14 = vpack.c.bf16 %v3104_v13, %v3104_v13 }
 0x34b   :  { %v2371_v45 = vpop.eup %2370 }
 0x34c   :  { %v1280_v62 = vsub.f32 %v3046_v38, %v2371_v45  ;;  %v1299_v58 = vunpack.c.l.b16 %v1285_v14 }
 0x34e   :  { %v1282_v8 = vmul.f32 %v1280_v62, %v1269_v60 }
 0x350   :  { %v3110_v42 = vadd.f32 %v2371_v45, %v1282_v8  ;;  %v3163_v8 = vld [vmem:[%s3329_s4] ss:$0 sm:$0xff]  ;;  %s2590_s4 = smov [#allocation12]  }
 0x351   :  { %s1912_s17 = sshll.u32 %s2590_s4, 4  ;;  %s1913_s17 = int_to_ptr.vmem [resolvable:$true] %s1912_s17 }
 0x352   :  { %v2259_v28 = vpack.c.bf16 %v3110_v42, %v3104_v13  ;;  %v1286_v1 = vpack.c.bf16 %v3110_v42, %v3110_v42 }
 0x354   :  { %2260 = vst [vmem:[#allocation12 + $0x18] sm:$0xff] %v2259_v28   ;;  %v1300_v46 = vunpack.c.l.b16 %v1286_v1 }
 0x356   :  { %v1301_v57 = vpack.c.b16 %v1300_v46, %v1299_v58  ;;  %v448_v46 = vadd.f32 %v2991_v27, %v2803_v48 }
 0x358   :  { %1311 = vmatmul.bf16.vlgmr.msrb.gmra.mxu0 %v1301_v57  ;;  %1325 = vmatmul.bf16.vlgmr.msrb.gmra.mxu1 %v1301_v57 }
 0x359   :  { %1339 = vmatmul.bf16.vlgmr.msrb.gmra.mxu2 %v1301_v57  ;;  %1639 = vmatpush.bf16.msrb.mxu0 %v2677_v49 }
 0x35a   :  { %1765 = vmatpush.bf16.msrb.mxu1 %v2636_v3  ;;  %1779 = vmatpush.bf16.msrb.mxu2 %v2659_v10  ;;  %v3359_v3 = vld [vmem:[#allocation17_spill] sm:$0xff] }
 0x35d   :  { %1640 = vmatpush.bf16.msrb.mxu0 %v2684_v59 }
 0x35e   :  { %1766 = vmatpush.bf16.msrb.mxu1 %v2639_v7  ;;  %1780 = vmatpush.bf16.msrb.mxu2 %v2663_v21  ;;  %v350_v7 = vadd.f32 %v3359_v3, %v2783_v40 }
 0x361   :  { %1641 = vmatpush.bf16.msrb.mxu0 %v2692_v5 }
 0x362   :  { %1767 = vmatpush.bf16.msrb.mxu1 %v2642_v16  ;;  %1781 = vmatpush.bf16.msrb.mxu2 %v2670_v33  ;;  %v3360_v16 = vld [vmem:[#allocation21_spill] sm:$0xff] }
 0x365   :  { %1642 = vmatpush.bf16.msrb.mxu0 %v2699_v15 }
 0x366   :  { %1768 = vmatpush.bf16.msrb.mxu1 %v2645_v23  ;;  %1782 = vmatpush.bf16.msrb.mxu2 %v2675_v44  ;;  %v399_v23 = vadd.f32 %v3360_v16, %v2788_v56  ;;  %v3361_v44 = vld [vmem:[#allocation18_spill] sm:$0xff] }
 0x369   :  { %1643 = vmatpush.bf16.msrb.mxu0 %v2708_v20 }
 0x36a   :  { %1769 = vmatpush.bf16.msrb.mxu1 %v2648_v34  ;;  %1783 = vmatpush.bf16.msrb.mxu2 %v2681_v53  ;;  %v352_v53 = vadd.f32 %v3361_v44, %v2783_v40 }
 0x36d   :  { %1644 = vmatpush.bf16.msrb.mxu0 %v2715_v22 }
 0x36e   :  { %1770 = vmatpush.bf16.msrb.mxu1 %v2651_v43  ;;  %1784 = vmatpush.bf16.msrb.mxu2 %v2689_v63 }
 0x371   :  { %1645 = vmatpush.bf16.msrb.mxu0 %v2722_v30 }
 0x372   :  { %1771 = vmatpush.bf16.msrb.mxu1 %v2654_v55  ;;  %1785 = vmatpush.bf16.msrb.mxu2 %v2696_v12 }
 0x375   :  { %1646 = vmatpush.bf16.msrb.mxu0 %v2728_v35 }
 0x376   :  { %1772 = vmatpush.bf16.msrb.mxu1 %v2657_v6  ;;  %1786 = vmatpush.bf16.msrb.mxu2 %v2705_v19  ;;  %v3362_v6 = vld [vmem:[#allocation23_spill] sm:$0xff] }
 0x377   :  { %v401_v63 = vadd.f32 %v3362_v6, %v2788_v56 }
 0x3d5   :  { %v1312_v34 = vpop.f32.mrf.mxu0  ;;  %v1326_v43 = vpop.f32.mrf.mxu1 }
 0x3d6   :  { %v1345_v10 = vadd.f32 %v1312_v34, %v350_v7  ;;  %v1385_v21 = vadd.f32 %v1326_v43, %v399_v23 }
 0x3d8   :  { %v2169_v33 = vmul.f32 -1.442695, %v1345_v10  ;;  %v2171_v55 = vmul.f32 -1.442695, %v1385_v21 }
 0x3da   :  { %2372 = vpow2.f32 %v2169_v33 }
 0x3db   :  { %2374 = vpow2.f32 %v2171_v55 }
 0x3dc   :  { %v1340_v37 = vpop.f32.mrf.mxu2 }
 0x3dd   :  { %v1314_v12 = vpop.f32.mrf.mxu0  ;;  %v1328_v19 = vpop.f32.mrf.mxu1  ;;  %v1425_v14 = vadd.f32 %v3163_v8, %v1340_v37 }
 0x3de   :  { %v1346_v38 = vadd.f32 %v1314_v12, %v352_v53  ;;  %v1386_v36 = vadd.f32 %v1328_v19, %v401_v63 }
 0x3e0   :  { %v2373_v24 = vpop.eup %2372  ;;  %v2170_v18 = vmul.f32 -1.442695, %v1346_v38  ;;  %v2172_v4 = vmul.f32 -1.442695, %v1386_v36  ;;  %v450_v38 = vadd.f32 %v2993_v54, %v2803_v48 }
 0x3e1   :  { %v2375_v26 = vpop.eup %2374  ;;  %v1353_v52 = vadd.f32 1.0, %v2373_v24 }
 0x3e2   :  { %v3150_v25 = vadd.f32 1.0, %v2375_v26  ;;  %2376 = vpow2.f32 %v2170_v18 }
 0x3e3   :  { %2378 = vrcp.f32 %v1353_v52  ;;  %v1366_v11 = vand.u32 2147483648, %v1353_v52  ;;  %v1364_v29 = vand.u32 2147483647, %v1353_v52  ;;  %vm1360_vm1 = vweird.f32 %v1353_v52 }
 0x3e4   :  { %2380 = vrcp.f32 %v3150_v25  ;;  %v1342_v21 = vpop.f32.mrf.mxu2  ;;  %v1406_v53 = vand.u32 2147483648, %v3150_v25  ;;  %vm1400_vm9 = vweird.f32 %v3150_v25  ;;  %v1404_v12 = vand.u32 2147483647, %v3150_v25 }
 0x3e5   :  { %2382 = vpow2.f32 %v2172_v4  ;;  %v1367_v62 = vor.u32 1.1754944e-38, %v1366_v11  ;;  %vm1365_vm3 = vcmp.eq.f32.partialorder %v1364_v29, 8.507059e+37  ;;  %v1426_v63 = vadd.f32 %v3163_v8, %v1342_v21 }
 0x3e6   :  { %vm1405_vm11 = vcmp.eq.f32.partialorder %v1404_v12, 8.507059e+37 }
 0x3e8   :  { %v2377_v32 = vpop.eup %2376 }
 0x3e9   :  { %v2379_v61 = vpop.eup %2378  ;;  %v1354_v39 = vadd.f32 1.0, %v2377_v32 }
 0x3ea   :  { %v3153_v41 = vpop.eup %2380  ;;  %v1356_v47 = vmul.f32 %v2379_v61, %v1353_v52  ;;  %vm1361_vm0 = vweird.f32 %v2379_v61  ;;  %v1407_v52 = vor.u32 1.1754944e-38, %v1406_v53 }
 0x3eb   :  { %v2383_v2 = vpop.eup %2382  ;;  %2384 = vrcp.f32 %v1354_v39  ;;  %v1396_v9 = vmul.f32 %v3153_v41, %v3150_v25  ;;  %vm1362_vm2 = vmor %vm1360_vm1, %vm1361_vm0  ;;  %v1381_v23 = vand.u32 2147483648, %v1354_v39  ;;  %v1379_v10 = vand.u32 2147483647, %v1354_v39 }
 0x3ec   :  { %v1357_v17 = vsub.f32 1.0, %v1356_v47  ;;  %v3155_v50 = vadd.f32 1.0, %v2383_v2  ;;  %vm1375_vm5 = vweird.f32 %v1354_v39  ;;  %vm1401_vm6 = vweird.f32 %v3153_v41 }
 0x3ed   :  { %v1397_v31 = vsub.f32 1.0, %v1396_v9  ;;  %v1382_v44 = vor.u32 1.1754944e-38, %v1381_v23  ;;  %vm1380_vm8 = vcmp.eq.f32.partialorder %v1379_v10, 8.507059e+37  ;;  %vm1402_vm10 = vmor %vm1400_vm9, %vm1401_vm6 }
 0x3ee   :  { %v1358_v0 = vmul.f32 %v2379_v61, %v1357_v17  ;;  %2386 = vrcp.f32 %v3155_v50  ;;  %v1421_v25 = vand.u32 2147483648, %v3155_v50  ;;  %vm1415_vm13 = vweird.f32 %v3155_v50 }
 0x3ef   :  { %v1398_v7 = vmul.f32 %v3153_v41, %v1397_v31  ;;  %v1419_v54 = vand.u32 2147483647, %v3155_v50 }
 0x3f0   :  { %v1359_v51 = vadd.f32 %v2379_v61, %v1358_v0  ;;  %v1422_v9 = vor.u32 1.1754944e-38, %v1421_v25 }
 0x3f1   :  { %v2385_v45 = vpop.eup %2384  ;;  %v1399_v55 = vadd.f32 %v3153_v41, %v1398_v7  ;;  %vm1420_vm15 = vcmp.eq.f32.partialorder %v1419_v54, 8.507059e+37 }
 0x3f2   :  { %v1363_v60 = vsel %vm1362_vm2, %v2379_v61, %v1359_v51  ;;  %v1371_v28 = vmul.f32 %v2385_v45, %v1354_v39  ;;  %vm1376_vm4 = vweird.f32 %v2385_v45 }
 0x3f3   :  { %v1368_v1 = vsel %vm1365_vm3, %v1367_v62, %v1363_v60  ;;  %vm1377_vm7 = vmor %vm1375_vm5, %vm1376_vm4  ;;  %v1403_v24 = vsel %vm1402_vm10, %v3153_v41, %v1399_v55 }
 0x3f4   :  { %v2387_v58 = vpop.eup %2386  ;;  %v1427_v57 = vmul.f32 %v1425_v14, %v1368_v1  ;;  %v1372_v3 = vsub.f32 1.0, %v1371_v28  ;;  %v1408_v61 = vsel %vm1405_vm11, %v1407_v52, %v1403_v24 }
 0x3f5   :  { %v1411_v16 = vmul.f32 %v2387_v58, %v3155_v50  ;;  %vm1416_vm12 = vweird.f32 %v2387_v58 }
 0x3f6   :  { %v1429_v34 = vadd.f32 %v1427_v57, %v448_v46  ;;  %v1373_v43 = vmul.f32 %v2385_v45, %v1372_v3  ;;  %vm1417_vm14 = vmor %vm1415_vm13, %vm1416_vm12  ;;  %v3366_v57 = vld [vmem:[#allocation22_spill] sm:$0xff] }
 0x3f7   :  { %v1412_v27 = vsub.f32 1.0, %v1411_v16  ;;  %v357_v3 = vadd.f32 %v3366_v57, %v2783_v40 }
 0x3f8   :  { %2388 = vtanh.f32 %v1429_v34  ;;  %v1374_v33 = vadd.f32 %v2385_v45, %v1373_v43 }
 0x3f9   :  { %v1413_v18 = vmul.f32 %v2387_v58, %v1412_v27 }
 0x3fa   :  { %v1378_v6 = vsel %vm1377_vm7, %v2385_v45, %v1374_v33 }
 0x3fb   :  { %v1383_v19 = vsel %vm1380_vm8, %v1382_v44, %v1378_v6  ;;  %v1414_v47 = vadd.f32 %v2387_v58, %v1413_v18 }
 0x3fc   :  { %v1428_v36 = vmul.f32 %v1426_v63, %v1383_v19 }
 0x3fd   :  { %v1418_v41 = vsel %vm1417_vm14, %v2387_v58, %v1414_v47 }
 0x3fe   :  { %v2389_v26 = vpop.eup %2388  ;;  %v1430_v4 = vadd.f32 %v1428_v36, %v450_v38  ;;  %v1423_v37 = vsel %vm1420_vm15, %v1422_v9, %v1418_v41  ;;  %v3367_v41 = vld [vmem:[#allocation34_spill] sm:$0xff] }
 0x3ff   :  { %v1433_v32 = vsub.f32 %v3104_v13, %v2389_v26 }
 0x400   :  { %2390 = vtanh.f32 %v1430_v4 }
 0x401   :  { %v1435_v39 = vmul.f32 %v1433_v32, %v1408_v61 }
 0x403   :  { %v3181_v2 = vadd.f32 %v2389_v26, %v1435_v39 }
 0x405   :  { %v1439_v29 = vpack.c.bf16 %v3181_v2, %v3181_v2 }
 0x406   :  { %v2391_v17 = vpop.eup %2390 }
 0x407   :  { %v1434_v13 = vsub.f32 %v3110_v42, %v2391_v17  ;;  %v1453_v45 = vunpack.c.l.b16 %v1439_v29  ;;  %v3363_v42 = vld [vmem:[#allocation25_spill] sm:$0xff] }
 0x408   :  { %v404_v60 = vadd.f32 %v3363_v42, %v2788_v56 }
 0x409   :  { %v1436_v11 = vmul.f32 %v1434_v13, %v1423_v37 }
 0x40b   :  { %v3186_v0 = vadd.f32 %v2391_v17, %v1436_v11  ;;  %v453_v17 = vadd.f32 %v3367_v41, %v2803_v48  ;;  %v3372_v41 = vld [vmem:[#allocation31_spill] sm:$0xff] }
 0x40d   :  { %v2264_v51 = vpack.c.bf16 %v3186_v0, %v3181_v2  ;;  %v1440_v50 = vpack.c.bf16 %v3186_v0, %v3186_v0 }
 0x40f   :  { %2265 = vst [vmem:[#allocation12 + $0x20] sm:$0xff] %v2264_v51   ;;  %v1454_v31 = vunpack.c.l.b16 %v1440_v50 }
 0x411   :  { %v1455_v62 = vpack.c.b16 %v1454_v31, %v1453_v45 }
 0x413   :  { %1465 = vmatmul.bf16.vlgmr.msra.gmra.mxu3 %v1455_v62  ;;  %1479 = vmatmul.bf16.vlgmr.msra.gmra.mxu0 %v1455_v62 }
 0x414   :  { %1493 = vmatmul.bf16.vlgmr.msra.gmra.mxu1 %v1455_v62  ;;  %1793 = vmatpush.bf16.msra.mxu3 %v2677_v49 }
 0x418   :  { %1794 = vmatpush.bf16.msra.mxu3 %v2684_v59  ;;  %v3364_v59 = vld [vmem:[#allocation20_spill] sm:$0xff] }
 0x419   :  { %v355_v1 = vadd.f32 %v3364_v59, %v2783_v40 }
 0x41c   :  { %1795 = vmatpush.bf16.msra.mxu3 %v2692_v5 }
 0x420   :  { %1796 = vmatpush.bf16.msra.mxu3 %v2699_v15  ;;  %v3365_v15 = vld [vmem:[#allocation27_spill] sm:$0xff] }
 0x421   :  { %v406_v58 = vadd.f32 %v3365_v15, %v2788_v56  ;;  %v3368_v15 = vld [vmem:[#allocation35_spill] sm:$0xff] }
 0x424   :  { %1797 = vmatpush.bf16.msra.mxu3 %v2708_v20 }
 0x428   :  { %1798 = vmatpush.bf16.msra.mxu3 %v2715_v22 }
 0x42c   :  { %1799 = vmatpush.bf16.msra.mxu3 %v2722_v30 }
 0x430   :  { %1800 = vmatpush.bf16.msra.mxu3 %v2728_v35 }
 0x490   :  { %v1480_v14 = vpop.f32.mrf.mxu0 }
 0x491   :  { %v1539_v28 = vadd.f32 %v1480_v14, %v404_v60  ;;  %v1494_v38 = vpop.f32.mrf.mxu1 }
 0x492   :  { %v1579_v39 = vadd.f32 %v3163_v8, %v1494_v38 }
 0x493   :  { %v2175_v49 = vmul.f32 -1.442695, %v1539_v28 }
 0x495   :  { %2392 = vpow2.f32 %v2175_v49 }
 0x496   :  { %v1466_v5 = vpop.f32.mrf.mxu3 }
 0x497   :  { %v1499_v20 = vadd.f32 %v1466_v5, %v355_v1 }
 0x498   :  { %v1482_v22 = vpop.f32.mrf.mxu0 }
 0x499   :  { %v2173_v46 = vmul.f32 -1.442695, %v1499_v20  ;;  %v1540_v30 = vadd.f32 %v1482_v22, %v406_v58  ;;  %v1496_v31 = vpop.f32.mrf.mxu1  ;;  %v455_v58 = vadd.f32 %v3368_v15, %v2803_v48 }
 0x49a   :  { %v1580_v49 = vadd.f32 %v3163_v8, %v1496_v31 }
 0x49b   :  { %2394 = vpow2.f32 %v2173_v46  ;;  %v2176_v35 = vmul.f32 -1.442695, %v1540_v30  ;;  %v2393_v7 = vpop.eup %2392 }
 0x49c   :  { %v3210_v43 = vadd.f32 1.0, %v2393_v7 }
 0x49d   :  { %2396 = vpow2.f32 %v2176_v35 }
 0x49e   :  { %v1468_v16 = vpop.f32.mrf.mxu3  ;;  %v1560_v28 = vand.u32 2147483648, %v3210_v43  ;;  %vm1554_vm9 = vweird.f32 %v3210_v43  ;;  %v1558_v1 = vand.u32 2147483647, %v3210_v43 }
 0x49f   :  { %v1500_v23 = vadd.f32 %v1468_v16, %v357_v3 }
 0x4a0   :  { %v1561_v35 = vor.u32 1.1754944e-38, %v1560_v28  ;;  %vm1559_vm11 = vcmp.eq.f32.partialorder %v1558_v1, 8.507059e+37 }
 0x4a1   :  { %v2395_v34 = vpop.eup %2394  ;;  %v2174_v10 = vmul.f32 -1.442695, %v1500_v23 }
 0x4a2   :  { %v1507_v21 = vadd.f32 1.0, %v2395_v34 }
 0x4a3   :  { %2398 = vpow2.f32 %v2174_v10  ;;  %v2397_v33 = vpop.eup %2396 }
 0x4a4   :  { %2400 = vrcp.f32 %v1507_v21  ;;  %v3213_v27 = vadd.f32 1.0, %v2397_v33  ;;  %v1520_v36 = vand.u32 2147483648, %v1507_v21  ;;  %v1518_v18 = vand.u32 2147483647, %v1507_v21 }
 0x4a5   :  { %2402 = vrcp.f32 %v3210_v43  ;;  %vm1514_vm1 = vweird.f32 %v1507_v21 }
 0x4a6   :  { %v1521_v32 = vor.u32 1.1754944e-38, %v1520_v36  ;;  %vm1519_vm3 = vcmp.eq.f32.partialorder %v1518_v18, 8.507059e+37  ;;  %v1575_v34 = vand.u32 2147483648, %v3213_v27  ;;  %vm1569_vm13 = vweird.f32 %v3213_v27  ;;  %v3370_v18 = vld [vmem:[#allocation29_spill] sm:$0xff] }
 0x4a9   :  { %v2399_v55 = vpop.eup %2398 }
 0x4aa   :  { %v2401_v44 = vpop.eup %2400  ;;  %v1508_v53 = vadd.f32 1.0, %v2399_v55  ;;  %v1576_v55 = vor.u32 1.1754944e-38, %v1575_v34 }
 0x4ab   :  { %v2403_v6 = vpop.eup %2402  ;;  %v1510_v63 = vmul.f32 %v2401_v44, %v1507_v21  ;;  %vm1515_vm0 = vweird.f32 %v2401_v44 }
 0x4ac   :  { %2404 = vrcp.f32 %v1508_v53  ;;  %v1550_v19 = vmul.f32 %v2403_v6, %v3210_v43  ;;  %vm1516_vm2 = vmor %vm1514_vm1, %vm1515_vm0  ;;  %v1535_v29 = vand.u32 2147483648, %v1508_v53  ;;  %v1533_v45 = vand.u32 2147483647, %v1508_v53 }
 0x4ad   :  { %v1511_v12 = vsub.f32 1.0, %v1510_v63  ;;  %2406 = vrcp.f32 %v3213_v27  ;;  %vm1529_vm5 = vweird.f32 %v1508_v53  ;;  %vm1555_vm6 = vweird.f32 %v2403_v6 }
 0x4ae   :  { %v1551_v4 = vsub.f32 1.0, %v1550_v19  ;;  %v1536_v14 = vor.u32 1.1754944e-38, %v1535_v29  ;;  %vm1534_vm8 = vcmp.eq.f32.partialorder %v1533_v45, 8.507059e+37  ;;  %vm1556_vm10 = vmor %vm1554_vm9, %vm1555_vm6  ;;  %v1573_v43 = vand.u32 2147483647, %v3213_v27 }
 0x4af   :  { %v1512_v24 = vmul.f32 %v2401_v44, %v1511_v12 }
 0x4b0   :  { %v1552_v37 = vmul.f32 %v2403_v6, %v1551_v4  ;;  %vm1574_vm15 = vcmp.eq.f32.partialorder %v1573_v43, 8.507059e+37 }
 0x4b1   :  { %v1513_v26 = vadd.f32 %v2401_v44, %v1512_v24 }
 0x4b2   :  { %v2405_v52 = vpop.eup %2404  ;;  %v1553_v42 = vadd.f32 %v2403_v6, %v1552_v37 }
 0x4b3   :  { %v2407_v61 = vpop.eup %2406  ;;  %v1517_v47 = vsel %vm1516_vm2, %v2401_v44, %v1513_v26  ;;  %v1525_v25 = vmul.f32 %v2405_v52, %v1508_v53  ;;  %vm1530_vm4 = vweird.f32 %v2405_v52  ;;  %v409_v26 = vadd.f32 %v3370_v18, %v2788_v56 }
 0x4b4   :  { %v1522_v54 = vsel %vm1519_vm3, %v1521_v32, %v1517_v47  ;;  %v1565_v11 = vmul.f32 %v2407_v61, %v3213_v27  ;;  %vm1531_vm7 = vmor %vm1529_vm5, %vm1530_vm4  ;;  %v1557_v22 = vsel %vm1556_vm10, %v2403_v6, %v1553_v42  ;;  %vm1570_vm12 = vweird.f32 %v2407_v61 }
 0x4b5   :  { %v1581_v9 = vmul.f32 %v1579_v39, %v1522_v54  ;;  %v1526_v13 = vsub.f32 1.0, %v1525_v25  ;;  %v1562_v7 = vsel %vm1559_vm11, %v1561_v35, %v1557_v22  ;;  %vm1571_vm14 = vmor %vm1569_vm13, %vm1570_vm12  ;;  %v3371_v25 = vld [vmem:[#allocation26_spill] sm:$0xff] }
 0x4b6   :  { %v1566_v60 = vsub.f32 1.0, %v1565_v11  ;;  %v362_v54 = vadd.f32 %v3371_v25, %v2783_v40 }
 0x4b7   :  { %v1583_v51 = vadd.f32 %v1581_v9, %v453_v17  ;;  %v1527_v50 = vmul.f32 %v2405_v52, %v1526_v13  ;;  %v411_v17 = vadd.f32 %v3372_v41, %v2788_v56 }
 0x4b8   :  { %v1567_v46 = vmul.f32 %v2407_v61, %v1566_v60 }
 0x4b9   :  { %v1528_v62 = vadd.f32 %v2405_v52, %v1527_v50  ;;  %2408 = vtanh.f32 %v1583_v51 }
 0x4ba   :  { %v1568_v16 = vadd.f32 %v2407_v61, %v1567_v46 }
 0x4bb   :  { %v1532_v59 = vsel %vm1531_vm7, %v2405_v52, %v1528_v62 }
 0x4bc   :  { %v1537_v5 = vsel %vm1534_vm8, %v1536_v14, %v1532_v59  ;;  %v1572_v21 = vsel %vm1571_vm14, %v2407_v61, %v1568_v16 }
 0x4bd   :  { %v1582_v20 = vmul.f32 %v1580_v49, %v1537_v5  ;;  %v1577_v44 = vsel %vm1574_vm15, %v1576_v55, %v1572_v21  ;;  %v3373_v21 = vld [vmem:[#allocation36_spill] sm:$0xff] }
 0x4bf   :  { %v2409_v30 = vpop.eup %2408  ;;  %v1584_v57 = vadd.f32 %v1582_v20, %v455_v58 }
 0x4c0   :  { %v1587_v3 = vsub.f32 %v3181_v2, %v2409_v30 }
 0x4c1   :  { %2410 = vtanh.f32 %v1584_v57 }
 0x4c2   :  { %v1589_v23 = vmul.f32 %v1587_v3, %v1562_v7 }
 0x4c4   :  { %v3231_v10 = vadd.f32 %v2409_v30, %v1589_v23 }
 0x4c6   :  { %v1593_v63 = vpack.c.bf16 %v3231_v10, %v3231_v10 }
 0x4c7   :  { %v2411_v33 = vpop.eup %2410 }
 0x4c8   :  { %v1588_v2 = vsub.f32 %v3186_v0, %v2411_v33  ;;  %v1607_v19 = vunpack.c.l.b16 %v1593_v63  ;;  %v3369_v0 = vld [vmem:[#allocation24_spill] sm:$0xff] }
 0x4c9   :  { %v360_v24 = vadd.f32 %v3369_v0, %v2783_v40 }
 0x4ca   :  { %v1590_v53 = vmul.f32 %v1588_v2, %v1577_v44 }
 0x4cc   :  { %v3234_v6 = vadd.f32 %v2411_v33, %v1590_v53  ;;  %v458_v33 = vadd.f32 %v3373_v21, %v2803_v48 }
 0x4ce   :  { %v1594_v12 = vpack.c.bf16 %v3234_v6, %v3234_v6  ;;  %v2269_v27 = vpack.c.bf16 %v3234_v6, %v3231_v10 }
 0x4d0   :  { %2270 = vst [vmem:[#allocation12 + $0x28] sm:$0xff] %v2269_v27   ;;  %v1608_v38 = vunpack.c.l.b16 %v1594_v12 }
 0x4d2   :  { %v1609_v36 = vpack.c.b16 %v1608_v38, %v1607_v19 }
 0x4d4   :  { %1619 = vmatmul.bf16.vlgmr.msra.gmra.mxu2 %v1609_v36  ;;  %1633 = vmatmul.bf16.vlgmr.msrb.gmra.mxu3 %v1609_v36 }
 0x4d5   :  { %1647 = vmatmul.bf16.vlgmr.msrb.gmra.mxu0 %v1609_v36 }
 0x552   :  { %v1648_v15 = vpop.f32.mrf.mxu0 }
 0x553   :  { %v1733_v7 = vadd.f32 %v3163_v8, %v1648_v15 }
 0x557   :  { %v1620_v52 = vpop.f32.mrf.mxu2  ;;  %v1634_v4 = vpop.f32.mrf.mxu3 }
 0x558   :  { %v1653_v32 = vadd.f32 %v1620_v52, %v360_v24  ;;  %v1693_v61 = vadd.f32 %v1634_v4, %v409_v26 }
 0x55a   :  { %v2177_v39 = vmul.f32 -1.442695, %v1653_v32  ;;  %v2179_v47 = vmul.f32 -1.442695, %v1693_v61  ;;  %v1650_v38 = vpop.f32.mrf.mxu0 }
 0x55b   :  { %v1734_v52 = vadd.f32 %v3163_v8, %v1650_v38 }
 0x55c   :  { %2412 = vpow2.f32 %v2177_v39  ;;  %v3374_v39 = vld [vmem:[#allocation37_spill] sm:$0xff] }
 0x55d   :  { %2414 = vpow2.f32 %v2179_v47  ;;  %v460_v47 = vadd.f32 %v3374_v39, %v2803_v48 }
 0x55f   :  { %v1622_v9 = vpop.f32.mrf.mxu2  ;;  %v1636_v13 = vpop.f32.mrf.mxu3 }
 0x560   :  { %v1654_v37 = vadd.f32 %v1622_v9, %v362_v54  ;;  %v1694_v11 = vadd.f32 %v1636_v13, %v411_v17 }
 0x562   :  { %v2413_v29 = vpop.eup %2412  ;;  %v2178_v51 = vmul.f32 -1.442695, %v1654_v37  ;;  %v2180_v31 = vmul.f32 -1.442695, %v1694_v11 }
 0x563   :  { %v2415_v50 = vpop.eup %2414  ;;  %v1661_v45 = vadd.f32 1.0, %v2413_v29 }
 0x564   :  { %v3250_v62 = vadd.f32 1.0, %v2415_v50  ;;  %2416 = vpow2.f32 %v2178_v51 }
 0x565   :  { %2418 = vrcp.f32 %v1661_v45  ;;  %v1674_v58 = vand.u32 2147483648, %v1661_v45  ;;  %v1672_v46 = vand.u32 2147483647, %v1661_v45  ;;  %vm1668_vm1 = vweird.f32 %v1661_v45 }
 0x566   :  { %2420 = vrcp.f32 %v3250_v62  ;;  %v1714_v26 = vand.u32 2147483648, %v3250_v62  ;;  %vm1708_vm9 = vweird.f32 %v3250_v62  ;;  %v1712_v32 = vand.u32 2147483647, %v3250_v62 }
 0x567   :  { %2422 = vpow2.f32 %v2180_v31  ;;  %v1675_v57 = vor.u32 1.1754944e-38, %v1674_v58  ;;  %vm1673_vm3 = vcmp.eq.f32.partialorder %v1672_v46, 8.507059e+37 }
 0x568   :  { %v1715_v9 = vor.u32 1.1754944e-38, %v1714_v26  ;;  %vm1713_vm11 = vcmp.eq.f32.partialorder %v1712_v32, 8.507059e+37 }
 0x56a   :  { %v2417_v42 = vpop.eup %2416 }
 0x56b   :  { %v2419_v60 = vpop.eup %2418  ;;  %v1662_v14 = vadd.f32 1.0, %v2417_v42 }
 0x56c   :  { %v3253_v28 = vpop.eup %2420  ;;  %v1664_v49 = vmul.f32 %v2419_v60, %v1661_v45  ;;  %vm1669_vm0 = vweird.f32 %v2419_v60 }
 0x56d   :  { %v2423_v59 = vpop.eup %2422  ;;  %2424 = vrcp.f32 %v1662_v14  ;;  %v1704_v20 = vmul.f32 %v3253_v28, %v3250_v62  ;;  %vm1670_vm2 = vmor %vm1668_vm1, %vm1669_vm0  ;;  %v1689_v53 = vand.u32 2147483648, %v1662_v14  ;;  %v1687_v19 = vand.u32 2147483647, %v1662_v14 }
 0x56e   :  { %v1665_v1 = vsub.f32 1.0, %v1664_v49  ;;  %v3255_v5 = vadd.f32 1.0, %v2423_v59  ;;  %vm1683_vm5 = vweird.f32 %v1662_v14  ;;  %vm1709_vm6 = vweird.f32 %v3253_v28 }
 0x56f   :  { %v1705_v3 = vsub.f32 1.0, %v1704_v20  ;;  %v1690_v24 = vor.u32 1.1754944e-38, %v1689_v53  ;;  %vm1688_vm8 = vcmp.eq.f32.partialorder %v1687_v19, 8.507059e+37  ;;  %vm1710_vm10 = vmor %vm1708_vm9, %vm1709_vm6  ;;  %v3378_v53 = vld [vmem:[#allocation33_spill] sm:$0xff] }
 0x570   :  { %v1666_v22 = vmul.f32 %v2419_v60, %v1665_v1  ;;  %2426 = vrcp.f32 %v3255_v5  ;;  %v1729_v50 = vand.u32 2147483648, %v3255_v5  ;;  %vm1723_vm13 = vweird.f32 %v3255_v5 }
 0x571   :  { %v1706_v44 = vmul.f32 %v3253_v28, %v1705_v3  ;;  %v1727_v45 = vand.u32 2147483647, %v3255_v5 }
 0x572   :  { %v1667_v30 = vadd.f32 %v2419_v60, %v1666_v22 }
 0x573   :  { %v2425_v35 = vpop.eup %2424  ;;  %v1707_v0 = vadd.f32 %v3253_v28, %v1706_v44  ;;  %vm1728_vm15 = vcmp.eq.f32.partialorder %v1727_v45, 8.507059e+37 }
 0x574   :  { %v1671_v16 = vsel %vm1670_vm2, %v2419_v60, %v1667_v30  ;;  %v1679_v23 = vmul.f32 %v2425_v35, %v1662_v14  ;;  %vm1684_vm4 = vweird.f32 %v2425_v35  ;;  %v1730_v60 = vor.u32 1.1754944e-38, %v1729_v50 }
 0x575   :  { %v1676_v34 = vsel %vm1673_vm3, %v1675_v57, %v1671_v16  ;;  %vm1685_vm7 = vmor %vm1683_vm5, %vm1684_vm4  ;;  %v1711_v54 = vsel %vm1710_vm10, %v3253_v28, %v1707_v0  ;;  %v3376_v57 = vld [vmem:[#allocation32_spill] sm:$0xff]  ;;  %v3377_v16 = vld [vmem:[#allocation30_spill] sm:$0xff] }
 0x576   :  { %v2427_v43 = vpop.eup %2426  ;;  %v1735_v55 = vmul.f32 %v1733_v7, %v1676_v34  ;;  %v1680_v2 = vsub.f32 1.0, %v1679_v23  ;;  %v1716_v11 = vsel %vm1713_vm11, %v1715_v9, %v1711_v54  ;;  %v414_v3 = vadd.f32 %v3376_v57, %v2788_v56 }
 0x577   :  { %v1719_v63 = vmul.f32 %v2427_v43, %v3255_v5  ;;  %vm1724_vm12 = vweird.f32 %v2427_v43  ;;  %v367_v23 = vadd.f32 %v3377_v16, %v2783_v40 }
 0x578   :  { %v1737_v12 = vadd.f32 %v1735_v55, %v458_v33  ;;  %v1681_v27 = vmul.f32 %v2425_v35, %v1680_v2  ;;  %vm1725_vm14 = vmor %vm1723_vm13, %vm1724_vm12 }
 0x579   :  { %v1720_v18 = vsub.f32 1.0, %v1719_v63  ;;  %v416_v63 = vadd.f32 %v3378_v53, %v2788_v56 }
 0x57a   :  { %2428 = vtanh.f32 %v1737_v12  ;;  %v1682_v36 = vadd.f32 %v2425_v35, %v1681_v27 }
 0x57b   :  { %v1721_v41 = vmul.f32 %v2427_v43, %v1720_v18 }
 0x57c   :  { %v1686_v4 = vsel %vm1685_vm7, %v2425_v35, %v1682_v36 }
 0x57d   :  { %v1691_v61 = vsel %vm1688_vm8, %v1690_v24, %v1686_v4  ;;  %v1722_v51 = vadd.f32 %v2427_v43, %v1721_v41 }
 0x57e   :  { %v1736_v25 = vmul.f32 %v1734_v52, %v1691_v61 }
 0x57f   :  { %v1726_v62 = vsel %vm1725_vm14, %v2427_v43, %v1722_v51  ;;  %v3379_v51 = vld [vmem:[#allocation38_spill] sm:$0xff] }
 0x580   :  { %v2429_v17 = vpop.eup %2428  ;;  %v1738_v13 = vadd.f32 %v1736_v25, %v460_v47  ;;  %v1731_v14 = vsel %vm1728_vm15, %v1730_v60, %v1726_v62  ;;  %v463_v50 = vadd.f32 %v3379_v51, %v2803_v48 }
 0x581   :  { %v1741_v37 = vsub.f32 %v3231_v10, %v2429_v17 }
 0x582   :  { %2430 = vtanh.f32 %v1738_v13 }
 0x583   :  { %v1743_v29 = vmul.f32 %v1741_v37, %v1716_v11 }
 0x585   :  { %v3278_v31 = vadd.f32 %v2429_v17, %v1743_v29 }
 0x587   :  { %v1747_v59 = vpack.c.bf16 %v3278_v31, %v3278_v31 }
 0x588   :  { %v2431_v42 = vpop.eup %2430 }
 0x589   :  { %v1742_v10 = vsub.f32 %v3234_v6, %v2431_v42  ;;  %v1761_v15 = vunpack.c.l.b16 %v1747_v59  ;;  %v3375_v6 = vld [vmem:[#allocation28_spill] sm:$0xff] }
 0x58a   :  { %v365_v22 = vadd.f32 %v3375_v6, %v2783_v40 }
 0x58b   :  { %v1744_v28 = vmul.f32 %v1742_v10, %v1731_v14 }
 0x58d   :  { %v3281_v49 = vadd.f32 %v2431_v42, %v1744_v28 }
 0x58f   :  { %v1748_v1 = vpack.c.bf16 %v3281_v49, %v3281_v49  ;;  %v2274_v5 = vpack.c.bf16 %v3281_v49, %v3278_v31 }
 0x591   :  { %2275 = vst [vmem:[#allocation12 + $0x30] sm:$0xff] %v2274_v5   ;;  %v1762_v58 = vunpack.c.l.b16 %v1748_v1 }
 0x593   :  { %v1763_v20 = vpack.c.b16 %v1762_v58, %v1761_v15 }
 0x595   :  { %1773 = vmatmul.bf16.vlgmr.msrb.gmra.mxu1 %v1763_v20  ;;  %1787 = vmatmul.bf16.vlgmr.msrb.gmra.mxu2 %v1763_v20 }
 0x596   :  { %1801 = vmatmul.bf16.vlgmr.msra.gmra.mxu3 %v1763_v20 }
 0x612   :  { %v1774_v46 = vpop.f32.mrf.mxu1 }
 0x613   :  { %v1807_v30 = vadd.f32 %v1774_v46, %v365_v22 }
 0x615   :  { %v2181_v35 = vmul.f32 -1.442695, %v1807_v30 }
 0x617   :  { %2432 = vpow2.f32 %v2181_v35 }
 0x618   :  { %v1788_v7 = vpop.f32.mrf.mxu2 }
 0x619   :  { %v1847_v34 = vadd.f32 %v1788_v7, %v414_v3  ;;  %v1802_v52 = vpop.f32.mrf.mxu3  ;;  %v3380_v3 = vld [vmem:[#allocation39_spill] sm:$0xff] }
 0x61a   :  { %v1776_v43 = vpop.f32.mrf.mxu1  ;;  %v1887_v37 = vadd.f32 %v3163_v8, %v1802_v52  ;;  %v465_v7 = vadd.f32 %v3380_v3, %v2803_v48 }
 0x61b   :  { %v2183_v21 = vmul.f32 -1.442695, %v1847_v34  ;;  %v1808_v33 = vadd.f32 %v1776_v43, %v367_v23 }
 0x61d   :  { %v2433_v55 = vpop.eup %2432  ;;  %2434 = vpow2.f32 %v2183_v21  ;;  %v2182_v2 = vmul.f32 -1.442695, %v1808_v33 }
 0x61e   :  { %v1815_v44 = vadd.f32 1.0, %v2433_v55 }
 0x61f   :  { %2436 = vpow2.f32 %v2182_v2 }
 0x620   :  { %2438 = vrcp.f32 %v1815_v44  ;;  %v1790_v12 = vpop.f32.mrf.mxu2  ;;  %v1828_v4 = vand.u32 2147483648, %v1815_v44  ;;  %v1826_v61 = vand.u32 2147483647, %v1815_v44  ;;  %vm1822_vm1 = vweird.f32 %v1815_v44 }
 0x621   :  { %v1848_v27 = vadd.f32 %v1790_v12, %v416_v63  ;;  %v1804_v28 = vpop.f32.mrf.mxu3 }
 0x622   :  { %v1829_v41 = vor.u32 1.1754944e-38, %v1828_v4  ;;  %vm1827_vm3 = vcmp.eq.f32.partialorder %v1826_v61, 8.507059e+37  ;;  %v1888_v46 = vadd.f32 %v3163_v8, %v1804_v28 }
 0x623   :  { %v2435_v19 = vpop.eup %2434  ;;  %v2184_v38 = vmul.f32 -1.442695, %v1848_v27 }
 0x624   :  { %v3297_v36 = vadd.f32 1.0, %v2435_v19 }
 0x625   :  { %v2437_v40 = vpop.eup %2436  ;;  %2440 = vpow2.f32 %v2184_v38 }
 0x626   :  { %v2439_v0 = vpop.eup %2438  ;;  %2442 = vrcp.f32 %v3297_v36  ;;  %v1816_v18 = vadd.f32 1.0, %v2437_v40  ;;  %v1868_v20 = vand.u32 2147483648, %v3297_v36  ;;  %vm1862_vm8 = vweird.f32 %v3297_v36 }
 0x627   :  { %v1818_v24 = vmul.f32 %v2439_v0, %v1815_v44  ;;  %vm1823_vm0 = vweird.f32 %v2439_v0  ;;  %v1866_v30 = vand.u32 2147483647, %v3297_v36 }
 0x628   :  { %2444 = vrcp.f32 %v1816_v18  ;;  %vm1824_vm2 = vmor %vm1822_vm1, %vm1823_vm0  ;;  %v1843_v10 = vand.u32 2147483648, %v1816_v18  ;;  %v1841_v1 = vand.u32 2147483647, %v1816_v18  ;;  %vm1837_vm6 = vweird.f32 %v1816_v18 }
 0x629   :  { %v1819_v26 = vsub.f32 1.0, %v1818_v24  ;;  %v1869_v43 = vor.u32 1.1754944e-38, %v1868_v20  ;;  %vm1867_vm11 = vcmp.eq.f32.partialorder %v1866_v30, 8.507059e+37 }
 0x62a   :  { %v1844_v22 = vor.u32 1.1754944e-38, %v1843_v10  ;;  %vm1842_vm9 = vcmp.eq.f32.partialorder %v1841_v1, 8.507059e+37 }
 0x62b   :  { %v2441_v56 = vpop.eup %2440  ;;  %v1820_v32 = vmul.f32 %v2439_v0, %v1819_v26 }
 0x62c   :  { %v2443_v39 = vpop.eup %2442  ;;  %v3300_v47 = vadd.f32 1.0, %v2441_v56 }
 0x62d   :  { %v1858_v25 = vmul.f32 %v2443_v39, %v3297_v36  ;;  %v1821_v54 = vadd.f32 %v2439_v0, %v1820_v32  ;;  %vm1863_vm5 = vweird.f32 %v2443_v39 }
 0x62e   :  { %2446 = vrcp.f32 %v3300_v47  ;;  %v2445_v17 = vpop.eup %2444  ;;  %vm1864_vm10 = vmor %vm1862_vm8, %vm1863_vm5  ;;  %v1883_v63 = vand.u32 2147483648, %v3300_v47  ;;  %vm1877_vm13 = vweird.f32 %v3300_v47  ;;  %v1881_v48 = vand.u32 2147483647, %v3300_v47 }
 0x62f   :  { %v1859_v9 = vsub.f32 1.0, %v1858_v25  ;;  %v1825_v13 = vsel %vm1824_vm2, %v2439_v0, %v1821_v54  ;;  %v1833_v29 = vmul.f32 %v2445_v17, %v1816_v18  ;;  %vm1838_vm4 = vweird.f32 %v2445_v17 }
 0x630   :  { %v1830_v11 = vsel %vm1827_vm3, %v1829_v41, %v1825_v13  ;;  %vm1839_vm7 = vmor %vm1837_vm6, %vm1838_vm4  ;;  %v1884_v19 = vor.u32 1.1754944e-38, %v1883_v63  ;;  %vm1882_vm15 = vcmp.eq.f32.partialorder %v1881_v48, 8.507059e+37 }
 0x631   :  { %v1889_v45 = vmul.f32 %v1887_v37, %v1830_v11  ;;  %v1860_v62 = vmul.f32 %v2443_v39, %v1859_v9  ;;  %v1834_v42 = vsub.f32 1.0, %v1833_v29 }
 0x633   :  { %v1891_v60 = vadd.f32 %v1889_v45, %v463_v50  ;;  %v1835_v59 = vmul.f32 %v2445_v17, %v1834_v42  ;;  %v1861_v15 = vadd.f32 %v2443_v39, %v1860_v62 }
 0x634   :  { %v2447_v14 = vpop.eup %2446 }
 0x635   :  { %2448 = vtanh.f32 %v1891_v60  ;;  %v1873_v5 = vmul.f32 %v2447_v14, %v3300_v47  ;;  %v1836_v58 = vadd.f32 %v2445_v17, %v1835_v59  ;;  %v1865_v16 = vsel %vm1864_vm10, %v2443_v39, %v1861_v15 }
 0x636   :  { %v1870_v55 = vsel %vm1867_vm11, %v1869_v43, %v1865_v16  ;;  %vm1878_vm12 = vweird.f32 %v2447_v14 }
 0x637   :  { %v1874_v6 = vsub.f32 1.0, %v1873_v5  ;;  %v1840_v35 = vsel %vm1839_vm7, %v2445_v17, %v1836_v58  ;;  %vm1879_vm14 = vmor %vm1877_vm13, %vm1878_vm12 }
 0x638   :  { %v1845_v57 = vsel %vm1842_vm9, %v1844_v22, %v1840_v35 }
 0x639   :  { %v1890_v23 = vmul.f32 %v1888_v46, %v1845_v57  ;;  %v1875_v21 = vmul.f32 %v2447_v14, %v1874_v6 }
 0x63b   :  { %v2449_v34 = vpop.eup %2448  ;;  %v1892_v8 = vadd.f32 %v1890_v23, %v465_v7  ;;  %v1876_v44 = vadd.f32 %v2447_v14, %v1875_v21 }
 0x63c   :  { %v1895_v33 = vsub.f32 %v3278_v31, %v2449_v34 }
 0x63d   :  { %2450 = vtanh.f32 %v1892_v8  ;;  %v1880_v12 = vsel %vm1879_vm14, %v2447_v14, %v1876_v44 }
 0x63e   :  { %v1897_v2 = vmul.f32 %v1895_v33, %v1870_v55  ;;  %v1885_v38 = vsel %vm1882_vm15, %v1884_v19, %v1880_v12 }
 0x640   :  { %v1899_v53 = vadd.f32 %v2449_v34, %v1897_v2 }
 0x643   :  { %v2451_v27 = vpop.eup %2450 }
 0x644   :  { %v1896_v31 = vsub.f32 %v3281_v49, %v2451_v27 }
 0x646   :  { %v1898_v36 = vmul.f32 %v1896_v31, %v1885_v38 }
 0x648   :  { %v1900_v40 = vadd.f32 %v2451_v27, %v1898_v36 }
 0x64a   :  { %v2279_v0 = vpack.c.bf16 %v1900_v40, %v1899_v53 }
 0x64c   :  { %2280 = vst [vmem:[#allocation12 + $0x38] sm:$0xff] %v2279_v0  }
 0x64d   :  { %1920 = dma.vmem_to_hbm [thread:$0]  %s1913_s17, 1024, %s1915_s20, [#allocation6], %s2585_s30, %s2585_s30, %s2586_s6  }
 0x64e   :  { %2579 = dma.done.wait [#allocation6], 1024  }
 0x64f   :  { %2580 = vsyncadd [#allocation6], 4294966272 }
 0x650   :  { %1925 = vsyncpa [#allocation5], 1 }
 0x651   :  { %1926 = vsyncpa [#allocation8], 1 }
 0x652   :  { %1927 = vsyncpa [#allocation11], 1 }
 0x653   :  { %1928 = vsyncpa [#allocation6], 1 }

</bundles_post_ra>
